<compile_context>
chip_gen: v7x
topology: tpu7x:2x2x1
jax: 0.10.0
libtpu: 0.0.40
codegen_flags: <defaults>
</compile_context>

<pallas_src>
import functools
import math

import jax
import jax.numpy as jnp
from jax.experimental import pallas as pl
from jax.experimental.pallas import tpu as pltpu


def _round_up(x, m):
    return ((x + m - 1) // m) * m


# ----------------------------------------------------------------------------
# Pallas kernel 1: fused GEMM + bias + (optional) LeakyReLU (conv hot path)
#   Single K block, adaptive tm, lane-dense N=128 output, bf16 in / f32 accumulate.
# ----------------------------------------------------------------------------
def _gemm_bias_act_kernel(x_ref, w_ref, b_ref, o_ref, *, act, slope):
    y = jnp.dot(x_ref[...], w_ref[...], preferred_element_type=jnp.float32)
    y = y + b_ref[...]
    if act:
        y = jnp.where(y > 0, y, slope * y)
    o_ref[...] = y.astype(o_ref.dtype)


def matmul_bias_act(x, w, b, *, act, slope=0.2,
                    in_dtype=jnp.bfloat16, out_dtype=jnp.bfloat16, tn=128):
    """out = act(x @ w + b); x:(M,K) w:(K,N) b:(N,).  f32 accumulation on MXU."""
    M, K = x.shape
    Kw, N = w.shape
    assert K == Kw
    Kp = _round_up(K, 128)          # lane-dense activation tile, MXU-clean K
    Np = _round_up(N, tn)           # Cout in {2,16,32} -> 128 (lane-dense output)
    if M <= 512:                    # adaptive tm: no dead-row padding on tiny layers
        Mp = _round_up(M, 16)
        tm = Mp
    else:
        tm = 256
        Mp = _round_up(M, tm)

    xp = jnp.pad(x, ((0, Mp - M), (0, Kp - K))).astype(in_dtype)
    wp = jnp.pad(w, ((0, Kp - K), (0, Np - N))).astype(in_dtype)
    bp = jnp.pad(b.astype(jnp.float32), (0, Np - N)).reshape(1, Np)

    grid = (Mp // tm, Np // tn)
    kernel = functools.partial(_gemm_bias_act_kernel, act=act, slope=slope)
    itemsize = 4 if in_dtype == jnp.float32 else 2
    out_itemsize = 4 if out_dtype == jnp.float32 else 2
    cost = pl.CostEstimate(
        flops=2 * Mp * Kp * Np,
        transcendentals=0,
        bytes_accessed=(Mp * Kp + Kp * Np) * itemsize + Mp * Np * out_itemsize + Np * 4)

    out = pl.pallas_call(
        kernel,
        out_shape=jax.ShapeDtypeStruct((Mp, Np), out_dtype),
        grid_spec=pltpu.PrefetchScalarGridSpec(
            num_scalar_prefetch=0,
            grid=grid,
            in_specs=[
                pl.BlockSpec((tm, Kp), lambda i, j: (i, 0)),
                pl.BlockSpec((Kp, tn), lambda i, j: (0, j)),
                pl.BlockSpec((1, tn), lambda i, j: (0, j)),
            ],
            out_specs=pl.BlockSpec((tm, tn), lambda i, j: (i, j))),
        compiler_params=pltpu.CompilerParams(
            dimension_semantics=("parallel", "parallel")),
        cost_estimate=cost,
    )(xp, wp, bp)
    return out[:M, :N]


def conv3x3(x_nhwc, w_hwio, b, *, stride=1, act=True,
            in_dtype=jnp.bfloat16, out_dtype=jnp.bfloat16):
    """3x3 conv, padding=1, NHWC, via im2col (JAX glue) + fused Pallas GEMM."""
    B, H, W, Cin = x_nhwc.shape
    Cout = w_hwio.shape[-1]
    xp = jnp.pad(x_nhwc, ((0, 0), (1, 1), (1, 1), (0, 0)))
    Ho = (H - 1) // stride + 1
    Wo = (W - 1) // stride + 1
    cols = []
    for kh in range(3):
        for kw in range(3):
            cols.append(
                xp[:, kh:kh + stride * (Ho - 1) + 1:stride,
                      kw:kw + stride * (Wo - 1) + 1:stride, :])
    patches = jnp.concatenate(cols, axis=-1).reshape(B * Ho * Wo, 9 * Cin)
    wmat = w_hwio.reshape(9 * Cin, Cout)
    out = matmul_bias_act(patches, wmat, b, act=act,
                          in_dtype=in_dtype, out_dtype=out_dtype)
    return out.reshape(B, Ho, Wo, Cout)


# ----------------------------------------------------------------------------
# Pallas kernel 2: fused VecInt (scaling & squaring) + final bilinear warp
#   grid_sample(align_corners=True, padding='zeros') expressed gather-free with a
#   SEPARABLE hat-weight formulation, processed one output row at a time:
#     stage 1 (MXU):  tmp = img(C*H, W) @ Wx(W, W)        Wx[j,x] = hat(lx[x]-j)
#     stage 2 (VPU):  out[c,x] = sum_i Wy[i,x]*tmp[c*H+i,x]  Wy[i,x] = hat(ly[x]-i)
#   All arrays stay in row layout (..., W); the velocity field ping-pongs between
#   two VMEM scratches; coordinates are in-kernel iotas; rows stored in place.
# ----------------------------------------------------------------------------
def _integrate_warp_kernel(flow_ref, src_ref, flow_out_ref, ysrc_ref,
                           vec_a, vec_b, *, nsteps, H, W, Cs):
    i_col = jax.lax.broadcasted_iota(jnp.int32, (H, 1), 0).astype(jnp.float32)
    j_col = jax.lax.broadcasted_iota(jnp.int32, (W, 1), 0).astype(jnp.float32)
    gx_row = jax.lax.broadcasted_iota(jnp.int32, (1, W), 1).astype(jnp.float32)

    def warp_row(field_ref, img, y):
        # field_ref: (2H, W) ref with the sampling displacement field (dy rows 0..H-1,
        #            dx rows H..2H-1).  img: (Ci*H, W) array being sampled.
        dyr = field_ref[pl.ds(y, 1), :]                      # (1, W)
        dxr = field_ref[pl.ds(H + y, 1), :]                  # (1, W)
        ly = y.astype(jnp.float32) + dyr                     # (1, W)
        lx = gx_row + dxr                                    # (1, W)
        wy = jnp.maximum(0.0, 1.0 - jnp.abs(ly - i_col))     # (H, W)
        wx = jnp.maximum(0.0, 1.0 - jnp.abs(lx - j_col))     # (W, W)
        tmp = jnp.dot(img, wx, preferred_element_type=jnp.float32)   # (Ci*H, W)
        ci = img.shape[0] // H
        rows = [jnp.sum(wy * tmp[c * H:(c + 1) * H, :], axis=0, keepdims=True)
                for c in range(ci)]
        return rows, dyr, dxr

    # ---- VecInt: vec = flow / 2^nsteps; repeat vec += warp(vec, vec) ----
    vec_a[...] = flow_ref[0] * (1.0 / (2 ** nsteps))
    bufs = (vec_a, vec_b)
    for s in range(nsteps):
        src_s = bufs[s % 2]
        dst_s = bufs[(s + 1) % 2]

        @pl.loop(0, H)
        def _(y):
            rows, dyr, dxr = warp_row(src_s, src_s[...], y)
            dst_s[pl.ds(y, 1), :] = dyr + rows[0]
            dst_s[pl.ds(H + y, 1), :] = dxr + rows[1]

    final = bufs[nsteps % 2]
    flow_out_ref[0] = final[...]

    # ---- SpatialTransformer: warp the source image with the integrated flow ----
    @pl.loop(0, H)
    def _(y):
        rows, _, _ = warp_row(final, src_ref[0], y)
        for c in range(Cs):
            ysrc_ref[0, pl.ds(c * H + y, 1), :] = rows[c]


def integrate_and_warp(flow_full_nchw, source_nchw, *, nsteps):
    """Fused VecInt(nsteps) + SpatialTransformer(source, integrated_flow)."""
    B, C, H, W = flow_full_nchw.shape
    assert C == 2
    Cs = source_nchw.shape[1]

    # Row layout: (B, C*H, W) is a pure view of NCHW (no data movement on host).
    flow_rows = flow_full_nchw.astype(jnp.float32).reshape(B, 2 * H, W)
    src_rows = source_nchw.astype(jnp.float32).reshape(B, Cs * H, W)

    kernel = functools.partial(_integrate_warp_kernel,
                               nsteps=nsteps, H=H, W=W, Cs=Cs)
    cost = pl.CostEstimate(
        flops=2 * B * H * H * W * W * (2 * nsteps + Cs)
        + 4 * B * (nsteps + 1) * H * W * (H + W),
        transcendentals=0,
        bytes_accessed=2 * B * (2 + Cs) * H * W * 4)

    flow_int, y_src = pl.pallas_call(
        kernel,
        out_shape=(jax.ShapeDtypeStruct((B, 2 * H, W), jnp.float32),
                   jax.ShapeDtypeStruct((B, Cs * H, W), jnp.float32)),
        grid_spec=pltpu.PrefetchScalarGridSpec(
            num_scalar_prefetch=0,
            grid=(B,),
            in_specs=[
                pl.BlockSpec((1, 2 * H, W), lambda b: (b, 0, 0)),
                pl.BlockSpec((1, Cs * H, W), lambda b: (b, 0, 0)),
            ],
            out_specs=[
                pl.BlockSpec((1, 2 * H, W), lambda b: (b, 0, 0)),
                pl.BlockSpec((1, Cs * H, W), lambda b: (b, 0, 0)),
            ],
            scratch_shapes=[pltpu.VMEM((2 * H, W), jnp.float32),
                            pltpu.VMEM((2 * H, W), jnp.float32)]),
        compiler_params=pltpu.CompilerParams(
            dimension_semantics=("parallel",)),
        cost_estimate=cost,
    )(flow_rows, src_rows)

    return flow_int.reshape(B, 2, H, W), y_src.reshape(B, Cs, H, W)


# ----------------------------------------------------------------------------
# JAX glue: nearest upsample, RescaleTransform (bilinear, align_corners=True)
# ----------------------------------------------------------------------------
def upsample_nearest2x(x_nhwc):
    x = jnp.repeat(x_nhwc, 2, axis=1)
    x = jnp.repeat(x, 2, axis=2)
    return x


def _linear_resize_matrix(n_out, n_in):
    if n_in == 1:
        return jnp.ones((n_out, 1), jnp.float32)
    src = jnp.arange(n_out, dtype=jnp.float32) * (n_in - 1) / (n_out - 1)
    idx = jnp.arange(n_in, dtype=jnp.float32)
    return jnp.maximum(0.0, 1.0 - jnp.abs(src[:, None] - idx[None, :]))


def rescale_transform(flow_nchw, factor):
    """VoxelMorph RescaleTransform, factor>1: scale values, bilinear upsample."""
    B, C, H, W = flow_nchw.shape
    Ah = _linear_resize_matrix(H * factor, H)
    Aw = _linear_resize_matrix(W * factor, W)
    x = flow_nchw * float(factor)
    x = jnp.einsum('oh,bchw->bcow', Ah, x)
    x = jnp.einsum('pw,bcow->bcop', Aw, x)
    return x


# ----------------------------------------------------------------------------
# Parameters (deterministic synthetic init matching the module's shapes)
# ----------------------------------------------------------------------------
ENC_NF = (16, 32, 32, 32)
DEC_NF = (32, 32, 32, 32, 32, 16, 16)


def _regnet_channel_plan(int_downsize=2):
    nlayers_uparm = len(ENC_NF) - int(math.log2(int_downsize))
    plan = {'down': [], 'up': [], 'extra': []}
    prev = 2
    for nf in ENC_NF:
        plan['down'].append((prev, nf))
        prev = nf
    enc_hist = list(reversed(ENC_NF))
    for i, nf in enumerate(DEC_NF[:nlayers_uparm]):
        cin = prev + enc_hist[i] if i > 0 else prev
        plan['up'].append((cin, nf))
        prev = nf
    prev = prev + 2 if int_downsize == 1 else prev + enc_hist[nlayers_uparm]
    for nf in DEC_NF[len(ENC_NF):]:
        plan['extra'].append((prev, nf))
        prev = nf
    plan['flow'] = (prev, 2)
    return plan


def _init_conv(key, cin, cout):
    kw, kb = jax.random.split(key)
    scale = 1.0 / math.sqrt(9 * cin)
    w = scale * jax.random.normal(kw, (3, 3, cin, cout), jnp.float32)
    b = scale * jax.random.normal(kb, (cout,), jnp.float32)
    return w, b


def init_regnet_params(key, int_downsize=2):
    plan = _regnet_channel_plan(int_downsize)
    params = {'down': [], 'up': [], 'extra': []}
    for group in ('down', 'up', 'extra'):
        for cin, cout in plan[group]:
            key, sub = jax.random.split(key)
            params[group].append(_init_conv(sub, cin, cout))
    cin, cout = plan['flow']
    key, sub = jax.random.split(key)
    wf = 1e-5 * jax.random.normal(sub, (3, 3, cin, cout), jnp.float32)
    bf = jnp.zeros((cout,), jnp.float32)
    params['flow'] = (wf, bf)
    return params


# ----------------------------------------------------------------------------
# RegNet forward (2D, int_steps=7, int_downsize=2, registration=False)
# ----------------------------------------------------------------------------
def regnet_forward(params, source, target, *, int_steps=7, int_downsize=2):
    # source, target: NCHW (B, 1, H, W)
    x = jnp.concatenate([source, target], axis=1)          # (B, 2, H, W)
    x = jnp.transpose(x, (0, 2, 3, 1)).astype(jnp.bfloat16)  # NHWC, bf16 activations

    # ---- Unet (cpoints_level = int_downsize) ----
    x_enc = [x]
    for (w, b) in params['down']:
        x_enc.append(conv3x3(x_enc[-1], w, b, stride=2, act=True))
    x = x_enc.pop()
    for (w, b) in params['up']:
        x = conv3x3(x, w, b, stride=1, act=True)
        x = upsample_nearest2x(x)
        x = jnp.concatenate([x, x_enc.pop()], axis=-1)
    for (w, b) in params['extra']:
        x = conv3x3(x, w, b, stride=1, act=True)

    # ---- flow head (no activation, kept in f32: 1e-5-scale weights) ----
    wf, bf = params['flow']
    flow = conv3x3(x, wf, bf, stride=1, act=False,
                   in_dtype=jnp.float32, out_dtype=jnp.float32)   # (B, Hd, Wd, 2)
    preint_flow = jnp.transpose(flow, (0, 3, 1, 2))               # NCHW; resize is None

    # ---- fullsize (RescaleTransform) THEN fused VecInt + SpatialTransformer,
    #      matching the module's forward order (VecInt built at full resolution) ----
    flow_full = rescale_transform(preint_flow, int_downsize)
    flow_int, y_source = integrate_and_warp(flow_full, source, nsteps=int_steps)
    return y_source, flow_int, preint_flow


if __name__ == "__main__":
    key = jax.random.PRNGKey(0)
    k_src, k_tgt, k_par = jax.random.split(key, 3)

    B, H, W = 2, 16, 16
    source = jax.random.normal(k_src, (B, 1, H, W), jnp.float32)
    target = jax.random.normal(k_tgt, (B, 1, H, W), jnp.float32)
    params = init_regnet_params(k_par, int_downsize=2)

    fwd = jax.jit(functools.partial(regnet_forward, int_steps=7, int_downsize=2))
    y_source, flow_field, preint_flow = fwd(params, source, target)
    jax.block_until_ready((y_source, flow_field, preint_flow))

    assert y_source.shape == (B, 1, H, W)
    assert flow_field.shape == (B, 2, H, W)
    assert preint_flow.shape == (B, 2, H // 2, W // 2)
    print("KERNEL_OK")
</pallas_src>

<mosaic_0001>
module attributes {stable_mosaic.version = 11 : i64} {
  func.func @_gemm_bias_act_kernel(%arg0: i32, %arg1: i32, %arg2: memref<128x128xbf16, #tpu.memory_space<vmem>>, %arg3: memref<128x128xbf16, #tpu.memory_space<vmem>>, %arg4: memref<1x128xf32, #tpu.memory_space<vmem>>, %arg5: memref<128x128xbf16, #tpu.memory_space<vmem>>) attributes {dimension_semantics = [#tpu.dimension_semantics<parallel>, #tpu.dimension_semantics<parallel>], iteration_bounds = array<i64: 1, 1>, scalar_prefetch = 0 : i64, scratch_operands = 0 : i64, tpu.core_type = #tpu.core_type<tc>, window_params = [{transform_indices = @transform_0, window_bounds = array<i64: 128, 128>}, {transform_indices = @transform_1, window_bounds = array<i64: 128, 128>}, {transform_indices = @transform_2, window_bounds = array<i64: 1, 128>}, {transform_indices = @transform_3, window_bounds = array<i64: 128, 128>}]} {
    %c0 = arith.constant 0 : index
    %c0_0 = arith.constant 0 : index
    %0 = vector.load %arg2[%c0, %c0_0] : memref<128x128xbf16, #tpu.memory_space<vmem>>, vector<128x128xbf16>
    %c0_1 = arith.constant 0 : index
    %c0_2 = arith.constant 0 : index
    %1 = vector.load %arg3[%c0_1, %c0_2] : memref<128x128xbf16, #tpu.memory_space<vmem>>, vector<128x128xbf16>
    %cst = arith.constant dense<0.000000e+00> : vector<128x128xf32>
    %2 = tpu.matmul %0, %1, %cst {dimension_numbers = #tpu.dot_dimension_numbers<[1], [0], [0], [1], [0, 0, 1, 1], [], []>} : vector<128x128xbf16>, vector<128x128xbf16>, vector<128x128xf32> -> vector<128x128xf32>
    %c0_3 = arith.constant 0 : index
    %c0_4 = arith.constant 0 : index
    %3 = vector.load %arg4[%c0_3, %c0_4] : memref<1x128xf32, #tpu.memory_space<vmem>>, vector<1x128xf32>
    %4 = vector.broadcast %3 : vector<1x128xf32> to vector<128x128xf32>
    %5 = arith.addf %2, %4 : vector<128x128xf32>
    %cst_5 = arith.constant 0.000000e+00 : f32
    %6 = vector.broadcast %cst_5 : f32 to vector<128x128xf32>
    %7 = arith.cmpf ogt, %5, %6 : vector<128x128xf32>
    %cst_6 = arith.constant 2.000000e-01 : f32
    %8 = vector.broadcast %cst_6 : f32 to vector<128x128xf32>
    %9 = arith.mulf %8, %5 : vector<128x128xf32>
    %10 = arith.select %7, %5, %9 : vector<128x128xi1>, vector<128x128xf32>
    %11 = arith.truncf %10 : vector<128x128xf32> to vector<128x128xbf16>
    %c0_7 = arith.constant 0 : index
    %c0_8 = arith.constant 0 : index
    %12 = vector.load %arg5[%c0_7, %c0_8] : memref<128x128xbf16, #tpu.memory_space<vmem>>, vector<128x128xbf16>
    tpu.vector_store %arg5[%c0_7, %c0_8], %11 {strides = array<i32>} : memref<128x128xbf16, #tpu.memory_space<vmem>>, vector<128x128xbf16>,
    return
  }
  func.func @transform_0(%arg0: i32, %arg1: i32) -> (i32, i32) {
    %c0_i32 = arith.constant 0 : i32
    %c0_i32_0 = arith.constant 0 : i32
    return %arg0, %c0_i32 : i32, i32
  }
  func.func @transform_1(%arg0: i32, %arg1: i32) -> (i32, i32) {
    %c0_i32 = arith.constant 0 : i32
    %c0_i32_0 = arith.constant 0 : i32
    return %c0_i32, %arg1 : i32, i32
  }
  func.func @transform_2(%arg0: i32, %arg1: i32) -> (i32, i32) {
    %c0_i32 = arith.constant 0 : i32
    %c0_i32_0 = arith.constant 0 : i32
    return %c0_i32, %arg1 : i32, i32
  }
  func.func @transform_3(%arg0: i32, %arg1: i32) -> (i32, i32) {
    %c0_i32 = arith.constant 0 : i32
    return %arg0, %arg1 : i32, i32
  }
}

module attributes {stable_mosaic.version = 11 : i64} {
  func.func @_gemm_bias_act_kernel(%arg0: i32, %arg1: i32, %arg2: memref<32x256xbf16, #tpu.memory_space<vmem>>, %arg3: memref<256x128xbf16, #tpu.memory_space<vmem>>, %arg4: memref<1x128xf32, #tpu.memory_space<vmem>>, %arg5: memref<32x128xbf16, #tpu.memory_space<vmem>>) attributes {dimension_semantics = [#tpu.dimension_semantics<parallel>, #tpu.dimension_semantics<parallel>], iteration_bounds = array<i64: 1, 1>, scalar_prefetch = 0 : i64, scratch_operands = 0 : i64, tpu.core_type = #tpu.core_type<tc>, window_params = [{transform_indices = @transform_0, window_bounds = array<i64: 32, 256>}, {transform_indices = @transform_1, window_bounds = array<i64: 256, 128>}, {transform_indices = @transform_2, window_bounds = array<i64: 1, 128>}, {transform_indices = @transform_3, window_bounds = array<i64: 32, 128>}]} {
    %c0 = arith.constant 0 : index
    %c0_0 = arith.constant 0 : index
    %0 = vector.load %arg2[%c0, %c0_0] : memref<32x256xbf16, #tpu.memory_space<vmem>>, vector<32x256xbf16>
    %c0_1 = arith.constant 0 : index
    %c0_2 = arith.constant 0 : index
    %1 = vector.load %arg3[%c0_1, %c0_2] : memref<256x128xbf16, #tpu.memory_space<vmem>>, vector<256x128xbf16>
    %cst = arith.constant dense<0.000000e+00> : vector<32x128xf32>
    %2 = tpu.matmul %0, %1, %cst {dimension_numbers = #tpu.dot_dimension_numbers<[1], [0], [0], [1], [0, 0, 1, 1], [], []>} : vector<32x256xbf16>, vector<256x128xbf16>, vector<32x128xf32> -> vector<32x128xf32>
    %c0_3 = arith.constant 0 : index
    %c0_4 = arith.constant 0 : index
    %3 = vector.load %arg4[%c0_3, %c0_4] : memref<1x128xf32, #tpu.memory_space<vmem>>, vector<1x128xf32>
    %4 = vector.broadcast %3 : vector<1x128xf32> to vector<32x128xf32>
    %5 = arith.addf %2, %4 : vector<32x128xf32>
    %cst_5 = arith.constant 0.000000e+00 : f32
    %6 = vector.broadcast %cst_5 : f32 to vector<32x128xf32>
    %7 = arith.cmpf ogt, %5, %6 : vector<32x128xf32>
    %cst_6 = arith.constant 2.000000e-01 : f32
    %8 = vector.broadcast %cst_6 : f32 to vector<32x128xf32>
    %9 = arith.mulf %8, %5 : vector<32x128xf32>
    %10 = arith.select %7, %5, %9 : vector<32x128xi1>, vector<32x128xf32>
    %11 = arith.truncf %10 : vector<32x128xf32> to vector<32x128xbf16>
    %c0_7 = arith.constant 0 : index
    %c0_8 = arith.constant 0 : index
    %12 = vector.load %arg5[%c0_7, %c0_8] : memref<32x128xbf16, #tpu.memory_space<vmem>>, vector<32x128xbf16>
    tpu.vector_store %arg5[%c0_7, %c0_8], %11 {strides = array<i32>} : memref<32x128xbf16, #tpu.memory_space<vmem>>, vector<32x128xbf16>,
    return
  }
  func.func @transform_0(%arg0: i32, %arg1: i32) -> (i32, i32) {
    %c0_i32 = arith.constant 0 : i32
    %c0_i32_0 = arith.constant 0 : i32
    return %arg0, %c0_i32 : i32, i32
  }
  func.func @transform_1(%arg0: i32, %arg1: i32) -> (i32, i32) {
    %c0_i32 = arith.constant 0 : i32
    %c0_i32_0 = arith.constant 0 : i32
    return %c0_i32, %arg1 : i32, i32
  }
  func.func @transform_2(%arg0: i32, %arg1: i32) -> (i32, i32) {
    %c0_i32 = arith.constant 0 : i32
    %c0_i32_0 = arith.constant 0 : i32
    return %c0_i32, %arg1 : i32, i32
  }
  func.func @transform_3(%arg0: i32, %arg1: i32) -> (i32, i32) {
    %c0_i32 = arith.constant 0 : i32
    return %arg0, %arg1 : i32, i32
  }
}

module attributes {stable_mosaic.version = 11 : i64} {
  func.func @_gemm_bias_act_kernel(%arg0: i32, %arg1: i32, %arg2: memref<16x384xbf16, #tpu.memory_space<vmem>>, %arg3: memref<384x128xbf16, #tpu.memory_space<vmem>>, %arg4: memref<1x128xf32, #tpu.memory_space<vmem>>, %arg5: memref<16x128xbf16, #tpu.memory_space<vmem>>) attributes {dimension_semantics = [#tpu.dimension_semantics<parallel>, #tpu.dimension_semantics<parallel>], iteration_bounds = array<i64: 1, 1>, scalar_prefetch = 0 : i64, scratch_operands = 0 : i64, tpu.core_type = #tpu.core_type<tc>, window_params = [{transform_indices = @transform_0, window_bounds = array<i64: 16, 384>}, {transform_indices = @transform_1, window_bounds = array<i64: 384, 128>}, {transform_indices = @transform_2, window_bounds = array<i64: 1, 128>}, {transform_indices = @transform_3, window_bounds = array<i64: 16, 128>}]} {
    %c0 = arith.constant 0 : index
    %c0_0 = arith.constant 0 : index
    %0 = vector.load %arg2[%c0, %c0_0] : memref<16x384xbf16, #tpu.memory_space<vmem>>, vector<16x384xbf16>
    %c0_1 = arith.constant 0 : index
    %c0_2 = arith.constant 0 : index
    %1 = vector.load %arg3[%c0_1, %c0_2] : memref<384x128xbf16, #tpu.memory_space<vmem>>, vector<384x128xbf16>
    %cst = arith.constant dense<0.000000e+00> : vector<16x128xf32>
    %2 = tpu.matmul %0, %1, %cst {dimension_numbers = #tpu.dot_dimension_numbers<[1], [0], [0], [1], [0, 0, 1, 1], [], []>} : vector<16x384xbf16>, vector<384x128xbf16>, vector<16x128xf32> -> vector<16x128xf32>
    %c0_3 = arith.constant 0 : index
    %c0_4 = arith.constant 0 : index
    %3 = vector.load %arg4[%c0_3, %c0_4] : memref<1x128xf32, #tpu.memory_space<vmem>>, vector<1x128xf32>
    %4 = vector.broadcast %3 : vector<1x128xf32> to vector<16x128xf32>
    %5 = arith.addf %2, %4 : vector<16x128xf32>
    %cst_5 = arith.constant 0.000000e+00 : f32
    %6 = vector.broadcast %cst_5 : f32 to vector<16x128xf32>
    %7 = arith.cmpf ogt, %5, %6 : vector<16x128xf32>
    %cst_6 = arith.constant 2.000000e-01 : f32
    %8 = vector.broadcast %cst_6 : f32 to vector<16x128xf32>
    %9 = arith.mulf %8, %5 : vector<16x128xf32>
    %10 = arith.select %7, %5, %9 : vector<16x128xi1>, vector<16x128xf32>
    %11 = arith.truncf %10 : vector<16x128xf32> to vector<16x128xbf16>
    %c0_7 = arith.constant 0 : index
    %c0_8 = arith.constant 0 : index
    %12 = vector.load %arg5[%c0_7, %c0_8] : memref<16x128xbf16, #tpu.memory_space<vmem>>, vector<16x128xbf16>
    tpu.vector_store %arg5[%c0_7, %c0_8], %11 {strides = array<i32>} : memref<16x128xbf16, #tpu.memory_space<vmem>>, vector<16x128xbf16>,
    return
  }
  func.func @transform_0(%arg0: i32, %arg1: i32) -> (i32, i32) {
    %c0_i32 = arith.constant 0 : i32
    %c0_i32_0 = arith.constant 0 : i32
    return %arg0, %c0_i32 : i32, i32
  }
  func.func @transform_1(%arg0: i32, %arg1: i32) -> (i32, i32) {
    %c0_i32 = arith.constant 0 : i32
    %c0_i32_0 = arith.constant 0 : i32
    return %c0_i32, %arg1 : i32, i32
  }
  func.func @transform_2(%arg0: i32, %arg1: i32) -> (i32, i32) {
    %c0_i32 = arith.constant 0 : i32
    %c0_i32_0 = arith.constant 0 : i32
    return %c0_i32, %arg1 : i32, i32
  }
  func.func @transform_3(%arg0: i32, %arg1: i32) -> (i32, i32) {
    %c0_i32 = arith.constant 0 : i32
    return %arg0, %arg1 : i32, i32
  }
}

module attributes {stable_mosaic.version = 11 : i64} {
  func.func @_gemm_bias_act_kernel(%arg0: i32, %arg1: i32, %arg2: memref<16x640xbf16, #tpu.memory_space<vmem>>, %arg3: memref<640x128xbf16, #tpu.memory_space<vmem>>, %arg4: memref<1x128xf32, #tpu.memory_space<vmem>>, %arg5: memref<16x128xbf16, #tpu.memory_space<vmem>>) attributes {dimension_semantics = [#tpu.dimension_semantics<parallel>, #tpu.dimension_semantics<parallel>], iteration_bounds = array<i64: 1, 1>, scalar_prefetch = 0 : i64, scratch_operands = 0 : i64, tpu.core_type = #tpu.core_type<tc>, window_params = [{transform_indices = @transform_0, window_bounds = array<i64: 16, 640>}, {transform_indices = @transform_1, window_bounds = array<i64: 640, 128>}, {transform_indices = @transform_2, window_bounds = array<i64: 1, 128>}, {transform_indices = @transform_3, window_bounds = array<i64: 16, 128>}]} {
    %c0 = arith.constant 0 : index
    %c0_0 = arith.constant 0 : index
    %0 = vector.load %arg2[%c0, %c0_0] : memref<16x640xbf16, #tpu.memory_space<vmem>>, vector<16x640xbf16>
    %c0_1 = arith.constant 0 : index
    %c0_2 = arith.constant 0 : index
    %1 = vector.load %arg3[%c0_1, %c0_2] : memref<640x128xbf16, #tpu.memory_space<vmem>>, vector<640x128xbf16>
    %cst = arith.constant dense<0.000000e+00> : vector<16x128xf32>
    %2 = tpu.matmul %0, %1, %cst {dimension_numbers = #tpu.dot_dimension_numbers<[1], [0], [0], [1], [0, 0, 1, 1], [], []>} : vector<16x640xbf16>, vector<640x128xbf16>, vector<16x128xf32> -> vector<16x128xf32>
    %c0_3 = arith.constant 0 : index
    %c0_4 = arith.constant 0 : index
    %3 = vector.load %arg4[%c0_3, %c0_4] : memref<1x128xf32, #tpu.memory_space<vmem>>, vector<1x128xf32>
    %4 = vector.broadcast %3 : vector<1x128xf32> to vector<16x128xf32>
    %5 = arith.addf %2, %4 : vector<16x128xf32>
    %cst_5 = arith.constant 0.000000e+00 : f32
    %6 = vector.broadcast %cst_5 : f32 to vector<16x128xf32>
    %7 = arith.cmpf ogt, %5, %6 : vector<16x128xf32>
    %cst_6 = arith.constant 2.000000e-01 : f32
    %8 = vector.broadcast %cst_6 : f32 to vector<16x128xf32>
    %9 = arith.mulf %8, %5 : vector<16x128xf32>
    %10 = arith.select %7, %5, %9 : vector<16x128xi1>, vector<16x128xf32>
    %11 = arith.truncf %10 : vector<16x128xf32> to vector<16x128xbf16>
    %c0_7 = arith.constant 0 : index
    %c0_8 = arith.constant 0 : index
    %12 = vector.load %arg5[%c0_7, %c0_8] : memref<16x128xbf16, #tpu.memory_space<vmem>>, vector<16x128xbf16>
    tpu.vector_store %arg5[%c0_7, %c0_8], %11 {strides = array<i32>} : memref<16x128xbf16, #tpu.memory_space<vmem>>, vector<16x128xbf16>,
    return
  }
  func.func @transform_0(%arg0: i32, %arg1: i32) -> (i32, i32) {
    %c0_i32 = arith.constant 0 : i32
    %c0_i32_0 = arith.constant 0 : i32
    return %arg0, %c0_i32 : i32, i32
  }
  func.func @transform_1(%arg0: i32, %arg1: i32) -> (i32, i32) {
    %c0_i32 = arith.constant 0 : i32
    %c0_i32_0 = arith.constant 0 : i32
    return %c0_i32, %arg1 : i32, i32
  }
  func.func @transform_2(%arg0: i32, %arg1: i32) -> (i32, i32) {
    %c0_i32 = arith.constant 0 : i32
    %c0_i32_0 = arith.constant 0 : i32
    return %c0_i32, %arg1 : i32, i32
  }
  func.func @transform_3(%arg0: i32, %arg1: i32) -> (i32, i32) {
    %c0_i32 = arith.constant 0 : i32
    return %arg0, %arg1 : i32, i32
  }
}

module attributes {stable_mosaic.version = 11 : i64} {
  func.func @_gemm_bias_act_kernel(%arg0: i32, %arg1: i32, %arg2: memref<32x640xbf16, #tpu.memory_space<vmem>>, %arg3: memref<640x128xbf16, #tpu.memory_space<vmem>>, %arg4: memref<1x128xf32, #tpu.memory_space<vmem>>, %arg5: memref<32x128xbf16, #tpu.memory_space<vmem>>) attributes {dimension_semantics = [#tpu.dimension_semantics<parallel>, #tpu.dimension_semantics<parallel>], iteration_bounds = array<i64: 1, 1>, scalar_prefetch = 0 : i64, scratch_operands = 0 : i64, tpu.core_type = #tpu.core_type<tc>, window_params = [{transform_indices = @transform_0, window_bounds = array<i64: 32, 640>}, {transform_indices = @transform_1, window_bounds = array<i64: 640, 128>}, {transform_indices = @transform_2, window_bounds = array<i64: 1, 128>}, {transform_indices = @transform_3, window_bounds = array<i64: 32, 128>}]} {
    %c0 = arith.constant 0 : index
    %c0_0 = arith.constant 0 : index
    %0 = vector.load %arg2[%c0, %c0_0] : memref<32x640xbf16, #tpu.memory_space<vmem>>, vector<32x640xbf16>
    %c0_1 = arith.constant 0 : index
    %c0_2 = arith.constant 0 : index
    %1 = vector.load %arg3[%c0_1, %c0_2] : memref<640x128xbf16, #tpu.memory_space<vmem>>, vector<640x128xbf16>
    %cst = arith.constant dense<0.000000e+00> : vector<32x128xf32>
    %2 = tpu.matmul %0, %1, %cst {dimension_numbers = #tpu.dot_dimension_numbers<[1], [0], [0], [1], [0, 0, 1, 1], [], []>} : vector<32x640xbf16>, vector<640x128xbf16>, vector<32x128xf32> -> vector<32x128xf32>
    %c0_3 = arith.constant 0 : index
    %c0_4 = arith.constant 0 : index
    %3 = vector.load %arg4[%c0_3, %c0_4] : memref<1x128xf32, #tpu.memory_space<vmem>>, vector<1x128xf32>
    %4 = vector.broadcast %3 : vector<1x128xf32> to vector<32x128xf32>
    %5 = arith.addf %2, %4 : vector<32x128xf32>
    %cst_5 = arith.constant 0.000000e+00 : f32
    %6 = vector.broadcast %cst_5 : f32 to vector<32x128xf32>
    %7 = arith.cmpf ogt, %5, %6 : vector<32x128xf32>
    %cst_6 = arith.constant 2.000000e-01 : f32
    %8 = vector.broadcast %cst_6 : f32 to vector<32x128xf32>
    %9 = arith.mulf %8, %5 : vector<32x128xf32>
    %10 = arith.select %7, %5, %9 : vector<32x128xi1>, vector<32x128xf32>
    %11 = arith.truncf %10 : vector<32x128xf32> to vector<32x128xbf16>
    %c0_7 = arith.constant 0 : index
    %c0_8 = arith.constant 0 : index
    %12 = vector.load %arg5[%c0_7, %c0_8] : memref<32x128xbf16, #tpu.memory_space<vmem>>, vector<32x128xbf16>
    tpu.vector_store %arg5[%c0_7, %c0_8], %11 {strides = array<i32>} : memref<32x128xbf16, #tpu.memory_space<vmem>>, vector<32x128xbf16>,
    return
  }
  func.func @transform_0(%arg0: i32, %arg1: i32) -> (i32, i32) {
    %c0_i32 = arith.constant 0 : i32
    %c0_i32_0 = arith.constant 0 : i32
    return %arg0, %c0_i32 : i32, i32
  }
  func.func @transform_1(%arg0: i32, %arg1: i32) -> (i32, i32) {
    %c0_i32 = arith.constant 0 : i32
    %c0_i32_0 = arith.constant 0 : i32
    return %c0_i32, %arg1 : i32, i32
  }
  func.func @transform_2(%arg0: i32, %arg1: i32) -> (i32, i32) {
    %c0_i32 = arith.constant 0 : i32
    %c0_i32_0 = arith.constant 0 : i32
    return %c0_i32, %arg1 : i32, i32
  }
  func.func @transform_3(%arg0: i32, %arg1: i32) -> (i32, i32) {
    %c0_i32 = arith.constant 0 : i32
    return %arg0, %arg1 : i32, i32
  }
}

module attributes {stable_mosaic.version = 11 : i64} {
  func.func @_gemm_bias_act_kernel(%arg0: i32, %arg1: i32, %arg2: memref<128x512xbf16, #tpu.memory_space<vmem>>, %arg3: memref<512x128xbf16, #tpu.memory_space<vmem>>, %arg4: memref<1x128xf32, #tpu.memory_space<vmem>>, %arg5: memref<128x128xbf16, #tpu.memory_space<vmem>>) attributes {dimension_semantics = [#tpu.dimension_semantics<parallel>, #tpu.dimension_semantics<parallel>], iteration_bounds = array<i64: 1, 1>, scalar_prefetch = 0 : i64, scratch_operands = 0 : i64, tpu.core_type = #tpu.core_type<tc>, window_params = [{transform_indices = @transform_0, window_bounds = array<i64: 128, 512>}, {transform_indices = @transform_1, window_bounds = array<i64: 512, 128>}, {transform_indices = @transform_2, window_bounds = array<i64: 1, 128>}, {transform_indices = @transform_3, window_bounds = array<i64: 128, 128>}]} {
    %c0 = arith.constant 0 : index
    %c0_0 = arith.constant 0 : index
    %0 = vector.load %arg2[%c0, %c0_0] : memref<128x512xbf16, #tpu.memory_space<vmem>>, vector<128x512xbf16>
    %c0_1 = arith.constant 0 : index
    %c0_2 = arith.constant 0 : index
    %1 = vector.load %arg3[%c0_1, %c0_2] : memref<512x128xbf16, #tpu.memory_space<vmem>>, vector<512x128xbf16>
    %cst = arith.constant dense<0.000000e+00> : vector<128x128xf32>
    %2 = tpu.matmul %0, %1, %cst {dimension_numbers = #tpu.dot_dimension_numbers<[1], [0], [0], [1], [0, 0, 1, 1], [], []>} : vector<128x512xbf16>, vector<512x128xbf16>, vector<128x128xf32> -> vector<128x128xf32>
    %c0_3 = arith.constant 0 : index
    %c0_4 = arith.constant 0 : index
    %3 = vector.load %arg4[%c0_3, %c0_4] : memref<1x128xf32, #tpu.memory_space<vmem>>, vector<1x128xf32>
    %4 = vector.broadcast %3 : vector<1x128xf32> to vector<128x128xf32>
    %5 = arith.addf %2, %4 : vector<128x128xf32>
    %cst_5 = arith.constant 0.000000e+00 : f32
    %6 = vector.broadcast %cst_5 : f32 to vector<128x128xf32>
    %7 = arith.cmpf ogt, %5, %6 : vector<128x128xf32>
    %cst_6 = arith.constant 2.000000e-01 : f32
    %8 = vector.broadcast %cst_6 : f32 to vector<128x128xf32>
    %9 = arith.mulf %8, %5 : vector<128x128xf32>
    %10 = arith.select %7, %5, %9 : vector<128x128xi1>, vector<128x128xf32>
    %11 = arith.truncf %10 : vector<128x128xf32> to vector<128x128xbf16>
    %c0_7 = arith.constant 0 : index
    %c0_8 = arith.constant 0 : index
    %12 = vector.load %arg5[%c0_7, %c0_8] : memref<128x128xbf16, #tpu.memory_space<vmem>>, vector<128x128xbf16>
    tpu.vector_store %arg5[%c0_7, %c0_8], %11 {strides = array<i32>} : memref<128x128xbf16, #tpu.memory_space<vmem>>, vector<128x128xbf16>,
    return
  }
  func.func @transform_0(%arg0: i32, %arg1: i32) -> (i32, i32) {
    %c0_i32 = arith.constant 0 : i32
    %c0_i32_0 = arith.constant 0 : i32
    return %arg0, %c0_i32 : i32, i32
  }
  func.func @transform_1(%arg0: i32, %arg1: i32) -> (i32, i32) {
    %c0_i32 = arith.constant 0 : i32
    %c0_i32_0 = arith.constant 0 : i32
    return %c0_i32, %arg1 : i32, i32
  }
  func.func @transform_2(%arg0: i32, %arg1: i32) -> (i32, i32) {
    %c0_i32 = arith.constant 0 : i32
    %c0_i32_0 = arith.constant 0 : i32
    return %c0_i32, %arg1 : i32, i32
  }
  func.func @transform_3(%arg0: i32, %arg1: i32) -> (i32, i32) {
    %c0_i32 = arith.constant 0 : i32
    return %arg0, %arg1 : i32, i32
  }
}

module attributes {stable_mosaic.version = 11 : i64} {
  func.func @_gemm_bias_act_kernel(%arg0: i32, %arg1: i32, %arg2: memref<128x384xbf16, #tpu.memory_space<vmem>>, %arg3: memref<384x128xbf16, #tpu.memory_space<vmem>>, %arg4: memref<1x128xf32, #tpu.memory_space<vmem>>, %arg5: memref<128x128xbf16, #tpu.memory_space<vmem>>) attributes {dimension_semantics = [#tpu.dimension_semantics<parallel>, #tpu.dimension_semantics<parallel>], iteration_bounds = array<i64: 1, 1>, scalar_prefetch = 0 : i64, scratch_operands = 0 : i64, tpu.core_type = #tpu.core_type<tc>, window_params = [{transform_indices = @transform_0, window_bounds = array<i64: 128, 384>}, {transform_indices = @transform_1, window_bounds = array<i64: 384, 128>}, {transform_indices = @transform_2, window_bounds = array<i64: 1, 128>}, {transform_indices = @transform_3, window_bounds = array<i64: 128, 128>}]} {
    %c0 = arith.constant 0 : index
    %c0_0 = arith.constant 0 : index
    %0 = vector.load %arg2[%c0, %c0_0] : memref<128x384xbf16, #tpu.memory_space<vmem>>, vector<128x384xbf16>
    %c0_1 = arith.constant 0 : index
    %c0_2 = arith.constant 0 : index
    %1 = vector.load %arg3[%c0_1, %c0_2] : memref<384x128xbf16, #tpu.memory_space<vmem>>, vector<384x128xbf16>
    %cst = arith.constant dense<0.000000e+00> : vector<128x128xf32>
    %2 = tpu.matmul %0, %1, %cst {dimension_numbers = #tpu.dot_dimension_numbers<[1], [0], [0], [1], [0, 0, 1, 1], [], []>} : vector<128x384xbf16>, vector<384x128xbf16>, vector<128x128xf32> -> vector<128x128xf32>
    %c0_3 = arith.constant 0 : index
    %c0_4 = arith.constant 0 : index
    %3 = vector.load %arg4[%c0_3, %c0_4] : memref<1x128xf32, #tpu.memory_space<vmem>>, vector<1x128xf32>
    %4 = vector.broadcast %3 : vector<1x128xf32> to vector<128x128xf32>
    %5 = arith.addf %2, %4 : vector<128x128xf32>
    %cst_5 = arith.constant 0.000000e+00 : f32
    %6 = vector.broadcast %cst_5 : f32 to vector<128x128xf32>
    %7 = arith.cmpf ogt, %5, %6 : vector<128x128xf32>
    %cst_6 = arith.constant 2.000000e-01 : f32
    %8 = vector.broadcast %cst_6 : f32 to vector<128x128xf32>
    %9 = arith.mulf %8, %5 : vector<128x128xf32>
    %10 = arith.select %7, %5, %9 : vector<128x128xi1>, vector<128x128xf32>
    %11 = arith.truncf %10 : vector<128x128xf32> to vector<128x128xbf16>
    %c0_7 = arith.constant 0 : index
    %c0_8 = arith.constant 0 : index
    %12 = vector.load %arg5[%c0_7, %c0_8] : memref<128x128xbf16, #tpu.memory_space<vmem>>, vector<128x128xbf16>
    tpu.vector_store %arg5[%c0_7, %c0_8], %11 {strides = array<i32>} : memref<128x128xbf16, #tpu.memory_space<vmem>>, vector<128x128xbf16>,
    return
  }
  func.func @transform_0(%arg0: i32, %arg1: i32) -> (i32, i32) {
    %c0_i32 = arith.constant 0 : i32
    %c0_i32_0 = arith.constant 0 : i32
    return %arg0, %c0_i32 : i32, i32
  }
  func.func @transform_1(%arg0: i32, %arg1: i32) -> (i32, i32) {
    %c0_i32 = arith.constant 0 : i32
    %c0_i32_0 = arith.constant 0 : i32
    return %c0_i32, %arg1 : i32, i32
  }
  func.func @transform_2(%arg0: i32, %arg1: i32) -> (i32, i32) {
    %c0_i32 = arith.constant 0 : i32
    %c0_i32_0 = arith.constant 0 : i32
    return %c0_i32, %arg1 : i32, i32
  }
  func.func @transform_3(%arg0: i32, %arg1: i32) -> (i32, i32) {
    %c0_i32 = arith.constant 0 : i32
    return %arg0, %arg1 : i32, i32
  }
}

module attributes {stable_mosaic.version = 11 : i64} {
  func.func @_gemm_bias_act_kernel(%arg0: i32, %arg1: i32, %arg2: memref<128x256xbf16, #tpu.memory_space<vmem>>, %arg3: memref<256x128xbf16, #tpu.memory_space<vmem>>, %arg4: memref<1x128xf32, #tpu.memory_space<vmem>>, %arg5: memref<128x128xbf16, #tpu.memory_space<vmem>>) attributes {dimension_semantics = [#tpu.dimension_semantics<parallel>, #tpu.dimension_semantics<parallel>], iteration_bounds = array<i64: 1, 1>, scalar_prefetch = 0 : i64, scratch_operands = 0 : i64, tpu.core_type = #tpu.core_type<tc>, window_params = [{transform_indices = @transform_0, window_bounds = array<i64: 128, 256>}, {transform_indices = @transform_1, window_bounds = array<i64: 256, 128>}, {transform_indices = @transform_2, window_bounds = array<i64: 1, 128>}, {transform_indices = @transform_3, window_bounds = array<i64: 128, 128>}]} {
    %c0 = arith.constant 0 : index
    %c0_0 = arith.constant 0 : index
    %0 = vector.load %arg2[%c0, %c0_0] : memref<128x256xbf16, #tpu.memory_space<vmem>>, vector<128x256xbf16>
    %c0_1 = arith.constant 0 : index
    %c0_2 = arith.constant 0 : index
    %1 = vector.load %arg3[%c0_1, %c0_2] : memref<256x128xbf16, #tpu.memory_space<vmem>>, vector<256x128xbf16>
    %cst = arith.constant dense<0.000000e+00> : vector<128x128xf32>
    %2 = tpu.matmul %0, %1, %cst {dimension_numbers = #tpu.dot_dimension_numbers<[1], [0], [0], [1], [0, 0, 1, 1], [], []>} : vector<128x256xbf16>, vector<256x128xbf16>, vector<128x128xf32> -> vector<128x128xf32>
    %c0_3 = arith.constant 0 : index
    %c0_4 = arith.constant 0 : index
    %3 = vector.load %arg4[%c0_3, %c0_4] : memref<1x128xf32, #tpu.memory_space<vmem>>, vector<1x128xf32>
    %4 = vector.broadcast %3 : vector<1x128xf32> to vector<128x128xf32>
    %5 = arith.addf %2, %4 : vector<128x128xf32>
    %cst_5 = arith.constant 0.000000e+00 : f32
    %6 = vector.broadcast %cst_5 : f32 to vector<128x128xf32>
    %7 = arith.cmpf ogt, %5, %6 : vector<128x128xf32>
    %cst_6 = arith.constant 2.000000e-01 : f32
    %8 = vector.broadcast %cst_6 : f32 to vector<128x128xf32>
    %9 = arith.mulf %8, %5 : vector<128x128xf32>
    %10 = arith.select %7, %5, %9 : vector<128x128xi1>, vector<128x128xf32>
    %11 = arith.truncf %10 : vector<128x128xf32> to vector<128x128xbf16>
    %c0_7 = arith.constant 0 : index
    %c0_8 = arith.constant 0 : index
    %12 = vector.load %arg5[%c0_7, %c0_8] : memref<128x128xbf16, #tpu.memory_space<vmem>>, vector<128x128xbf16>
    tpu.vector_store %arg5[%c0_7, %c0_8], %11 {strides = array<i32>} : memref<128x128xbf16, #tpu.memory_space<vmem>>, vector<128x128xbf16>,
    return
  }
  func.func @transform_0(%arg0: i32, %arg1: i32) -> (i32, i32) {
    %c0_i32 = arith.constant 0 : i32
    %c0_i32_0 = arith.constant 0 : i32
    return %arg0, %c0_i32 : i32, i32
  }
  func.func @transform_1(%arg0: i32, %arg1: i32) -> (i32, i32) {
    %c0_i32 = arith.constant 0 : i32
    %c0_i32_0 = arith.constant 0 : i32
    return %c0_i32, %arg1 : i32, i32
  }
  func.func @transform_2(%arg0: i32, %arg1: i32) -> (i32, i32) {
    %c0_i32 = arith.constant 0 : i32
    %c0_i32_0 = arith.constant 0 : i32
    return %c0_i32, %arg1 : i32, i32
  }
  func.func @transform_3(%arg0: i32, %arg1: i32) -> (i32, i32) {
    %c0_i32 = arith.constant 0 : i32
    return %arg0, %arg1 : i32, i32
  }
}

module attributes {stable_mosaic.version = 11 : i64} {
  func.func @_gemm_bias_act_kernel(%arg0: i32, %arg1: i32, %arg2: memref<128x256xf32, #tpu.memory_space<vmem>>, %arg3: memref<256x128xf32, #tpu.memory_space<vmem>>, %arg4: memref<1x128xf32, #tpu.memory_space<vmem>>, %arg5: memref<128x128xf32, #tpu.memory_space<vmem>>) attributes {dimension_semantics = [#tpu.dimension_semantics<parallel>, #tpu.dimension_semantics<parallel>], iteration_bounds = array<i64: 1, 1>, scalar_prefetch = 0 : i64, scratch_operands = 0 : i64, tpu.core_type = #tpu.core_type<tc>, window_params = [{transform_indices = @transform_0, window_bounds = array<i64: 128, 256>}, {transform_indices = @transform_1, window_bounds = array<i64: 256, 128>}, {transform_indices = @transform_2, window_bounds = array<i64: 1, 128>}, {transform_indices = @transform_3, window_bounds = array<i64: 128, 128>}]} {
    %c0 = arith.constant 0 : index
    %c0_0 = arith.constant 0 : index
    %0 = vector.load %arg2[%c0, %c0_0] : memref<128x256xf32, #tpu.memory_space<vmem>>, vector<128x256xf32>
    %c0_1 = arith.constant 0 : index
    %c0_2 = arith.constant 0 : index
    %1 = vector.load %arg3[%c0_1, %c0_2] : memref<256x128xf32, #tpu.memory_space<vmem>>, vector<256x128xf32>
    %cst = arith.constant dense<0.000000e+00> : vector<128x128xf32>
    %2 = tpu.matmul %0, %1, %cst {dimension_numbers = #tpu.dot_dimension_numbers<[1], [0], [0], [1], [0, 0, 1, 1], [], []>} : vector<128x256xf32>, vector<256x128xf32>, vector<128x128xf32> -> vector<128x128xf32>
    %c0_3 = arith.constant 0 : index
    %c0_4 = arith.constant 0 : index
    %3 = vector.load %arg4[%c0_3, %c0_4] : memref<1x128xf32, #tpu.memory_space<vmem>>, vector<1x128xf32>
    %4 = vector.broadcast %3 : vector<1x128xf32> to vector<128x128xf32>
    %5 = arith.addf %2, %4 : vector<128x128xf32>
    %c0_5 = arith.constant 0 : index
    %c0_6 = arith.constant 0 : index
    %6 = vector.load %arg5[%c0_5, %c0_6] : memref<128x128xf32, #tpu.memory_space<vmem>>, vector<128x128xf32>
    tpu.vector_store %arg5[%c0_5, %c0_6], %5 {strides = array<i32>} : memref<128x128xf32, #tpu.memory_space<vmem>>, vector<128x128xf32>,
    return
  }
  func.func @transform_0(%arg0: i32, %arg1: i32) -> (i32, i32) {
    %c0_i32 = arith.constant 0 : i32
    %c0_i32_0 = arith.constant 0 : i32
    return %arg0, %c0_i32 : i32, i32
  }
  func.func @transform_1(%arg0: i32, %arg1: i32) -> (i32, i32) {
    %c0_i32 = arith.constant 0 : i32
    %c0_i32_0 = arith.constant 0 : i32
    return %c0_i32, %arg1 : i32, i32
  }
  func.func @transform_2(%arg0: i32, %arg1: i32) -> (i32, i32) {
    %c0_i32 = arith.constant 0 : i32
    %c0_i32_0 = arith.constant 0 : i32
    return %c0_i32, %arg1 : i32, i32
  }
  func.func @transform_3(%arg0: i32, %arg1: i32) -> (i32, i32) {
    %c0_i32 = arith.constant 0 : i32
    return %arg0, %arg1 : i32, i32
  }
}

module attributes {stable_mosaic.version = 11 : i64} {
  func.func @_integrate_warp_kernel(%arg0: i32, %arg1: memref<1x32x16xf32, #tpu.memory_space<vmem>>, %arg2: memref<1x16x16xf32, #tpu.memory_space<vmem>>, %arg3: memref<1x32x16xf32, #tpu.memory_space<vmem>>, %arg4: memref<1x16x16xf32, #tpu.memory_space<vmem>>, %arg5: memref<32x16xf32, #tpu.memory_space<vmem>>, %arg6: memref<32x16xf32, #tpu.memory_space<vmem>>) attributes {dimension_semantics = [#tpu.dimension_semantics<parallel>], iteration_bounds = array<i64: 2>, scalar_prefetch = 0 : i64, scratch_operands = 2 : i64, tpu.core_type = #tpu.core_type<tc>, window_params = [{transform_indices = @transform_0, window_bounds = array<i64: 1, 32, 16>}, {transform_indices = @transform_1, window_bounds = array<i64: 1, 16, 16>}, {transform_indices = @transform_2, window_bounds = array<i64: 1, 32, 16>}, {transform_indices = @transform_3, window_bounds = array<i64: 1, 16, 16>}]} {
    %0 = tpu.iota {dimensions = array<i32: 0>} : vector<16x1xi32>
    %1 = arith.sitofp %0 : vector<16x1xi32> to vector<16x1xf32>
    %2 = tpu.iota {dimensions = array<i32: 0>} : vector<16x1xi32>
    %3 = arith.sitofp %2 : vector<16x1xi32> to vector<16x1xf32>
    %4 = tpu.iota {dimensions = array<i32: 1>} : vector<1x16xi32>
    %5 = arith.sitofp %4 : vector<1x16xi32> to vector<1x16xf32>
    %c0 = arith.constant 0 : index
    %c0_0 = arith.constant 0 : index
    %c0_1 = arith.constant 0 : index
    %6 = vector.load %arg1[%c0, %c0_0, %c0_1] : memref<1x32x16xf32, #tpu.memory_space<vmem>>, vector<1x32x16xf32>
    %7 = vector.shape_cast %6 : vector<1x32x16xf32> to vector<32x16xf32>
    %cst = arith.constant 7.812500e-03 : f32
    %8 = vector.broadcast %cst : f32 to vector<32x16xf32>
    %9 = arith.mulf %7, %8 : vector<32x16xf32>
    %c0_2 = arith.constant 0 : index
    %c0_3 = arith.constant 0 : index
    %10 = vector.load %arg5[%c0_2, %c0_3] : memref<32x16xf32, #tpu.memory_space<vmem>>, vector<32x16xf32>
    tpu.vector_store %arg5[%c0_2, %c0_3], %9 {strides = array<i32>} : memref<32x16xf32, #tpu.memory_space<vmem>>, vector<32x16xf32>,
    %c0_i32 = arith.constant 0 : i32
    %c16_i32 = arith.constant 16 : i32
    %11 = arith.addi %c0_i32, %c16_i32 : i32
    %c1_i32 = arith.constant 1 : i32
    scf.for %arg7 = %c0_i32 to %11 step %c1_i32  : i32 {
      %c1_i32_38 = arith.constant 1 : i32
      %23 = arith.muli %arg7, %c1_i32_38 : i32
      %c0_i32_39 = arith.constant 0 : i32
      %24 = arith.addi %c0_i32_39, %23 : i32
      %c0_40 = arith.constant 0 : index
      %c0_41 = arith.constant 0 : index
      %25 = vector.load %arg5[%c0_40, %c0_41] : memref<32x16xf32, #tpu.memory_space<vmem>>, vector<32x16xf32>
      %26 = arith.index_cast %24 : i32 to index
      %c0_42 = arith.constant 0 : index
      %27 = vector.load %arg5[%26, %c0_42] : memref<32x16xf32, #tpu.memory_space<vmem>>, vector<1x16xf32>
      %c16_i32_43 = arith.constant 16 : i32
      %28 = arith.addi %c16_i32_43, %24 : i32
      %29 = arith.index_cast %28 : i32 to index
      %c0_44 = arith.constant 0 : index
      %30 = vector.load %arg5[%29, %c0_44] : memref<32x16xf32, #tpu.memory_space<vmem>>, vector<1x16xf32>
      %31 = arith.sitofp %24 : i32 to f32
      %32 = vector.broadcast %31 : f32 to vector<1x16xf32>
      %33 = arith.addf %32, %27 : vector<1x16xf32>
      %34 = arith.addf %5, %30 : vector<1x16xf32>
      %35 = vector.broadcast %33 : vector<1x16xf32> to vector<16x16xf32>
      %36 = vector.broadcast %1 : vector<16x1xf32> to vector<16x16xf32>
      %37 = arith.subf %35, %36 : vector<16x16xf32>
      %38 = math.absf %37 : vector<16x16xf32>
      %cst_45 = arith.constant 1.000000e+00 : f32
      %39 = vector.broadcast %cst_45 : f32 to vector<16x16xf32>
      %40 = arith.subf %39, %38 : vector<16x16xf32>
      %cst_46 = arith.constant 0.000000e+00 : f32
      %41 = vector.broadcast %cst_46 : f32 to vector<16x16xf32>
      %42 = arith.maximumf %41, %40 : vector<16x16xf32>
      %43 = vector.broadcast %34 : vector<1x16xf32> to vector<16x16xf32>
      %44 = vector.broadcast %3 : vector<16x1xf32> to vector<16x16xf32>
      %45 = arith.subf %43, %44 : vector<16x16xf32>
      %46 = math.absf %45 : vector<16x16xf32>
      %cst_47 = arith.constant 1.000000e+00 : f32
      %47 = vector.broadcast %cst_47 : f32 to vector<16x16xf32>
      %48 = arith.subf %47, %46 : vector<16x16xf32>
      %cst_48 = arith.constant 0.000000e+00 : f32
      %49 = vector.broadcast %cst_48 : f32 to vector<16x16xf32>
      %50 = arith.maximumf %49, %48 : vector<16x16xf32>
      %cst_49 = arith.constant dense<0.000000e+00> : vector<32x16xf32>
      %51 = tpu.matmul %25, %50, %cst_49 {dimension_numbers = #tpu.dot_dimension_numbers<[1], [0], [0], [1], [0, 0, 1, 1], [], []>} : vector<32x16xf32>, vector<16x16xf32>, vector<32x16xf32> -> vector<32x16xf32>
      %52 = vector.extract_strided_slice %51 {offsets = [0, 0], sizes = [16, 16], strides = [1, 1]} : vector<32x16xf32> to vector<16x16xf32>
      %53 = arith.mulf %42, %52 : vector<16x16xf32>
      %cst_50 = arith.constant dense<0.000000e+00> : vector<16xf32>
      %54 = vector.multi_reduction <add>, %53, %cst_50 [0] : vector<16x16xf32> to vector<16xf32>
      %55 = vector.shape_cast %54 : vector<16xf32> to vector<1x16xf32>
      %56 = vector.extract_strided_slice %51 {offsets = [16, 0], sizes = [16, 16], strides = [1, 1]} : vector<32x16xf32> to vector<16x16xf32>
      %57 = arith.mulf %42, %56 : vector<16x16xf32>
      %cst_51 = arith.constant dense<0.000000e+00> : vector<16xf32>
      %58 = vector.multi_reduction <add>, %57, %cst_51 [0] : vector<16x16xf32> to vector<16xf32>
      %59 = vector.shape_cast %58 : vector<16xf32> to vector<1x16xf32>
      %60 = arith.addf %27, %55 : vector<1x16xf32>
      %61 = arith.index_cast %24 : i32 to index
      %c0_52 = arith.constant 0 : index
      %62 = vector.load %arg6[%61, %c0_52] : memref<32x16xf32, #tpu.memory_space<vmem>>, vector<1x16xf32>
      tpu.vector_store %arg6[%61, %c0_52], %60 {strides = array<i32>} : memref<32x16xf32, #tpu.memory_space<vmem>>, vector<1x16xf32>,
      %63 = arith.addf %30, %59 : vector<1x16xf32>
      %c16_i32_53 = arith.constant 16 : i32
      %64 = arith.addi %c16_i32_53, %24 : i32
      %65 = arith.index_cast %64 : i32 to index
      %c0_54 = arith.constant 0 : index
      %66 = vector.load %arg6[%65, %c0_54] : memref<32x16xf32, #tpu.memory_space<vmem>>, vector<1x16xf32>
      tpu.vector_store %arg6[%65, %c0_54], %63 {strides = array<i32>} : memref<32x16xf32, #tpu.memory_space<vmem>>, vector<1x16xf32>,
    }
    %c16_i32_4 = arith.constant 16 : i32
    %c0_i32_5 = arith.constant 0 : i32
    %c16_i32_6 = arith.constant 16 : i32
    %12 = arith.addi %c0_i32_5, %c16_i32_6 : i32
    %c1_i32_7 = arith.constant 1 : i32
    scf.for %arg7 = %c0_i32_5 to %12 step %c1_i32_7  : i32 {
      %c1_i32_38 = arith.constant 1 : i32
      %23 = arith.muli %arg7, %c1_i32_38 : i32
      %c0_i32_39 = arith.constant 0 : i32
      %24 = arith.addi %c0_i32_39, %23 : i32
      %c0_40 = arith.constant 0 : index
      %c0_41 = arith.constant 0 : index
      %25 = vector.load %arg6[%c0_40, %c0_41] : memref<32x16xf32, #tpu.memory_space<vmem>>, vector<32x16xf32>
      %26 = arith.index_cast %24 : i32 to index
      %c0_42 = arith.constant 0 : index
      %27 = vector.load %arg6[%26, %c0_42] : memref<32x16xf32, #tpu.memory_space<vmem>>, vector<1x16xf32>
      %c16_i32_43 = arith.constant 16 : i32
      %28 = arith.addi %c16_i32_43, %24 : i32
      %29 = arith.index_cast %28 : i32 to index
      %c0_44 = arith.constant 0 : index
      %30 = vector.load %arg6[%29, %c0_44] : memref<32x16xf32, #tpu.memory_space<vmem>>, vector<1x16xf32>
      %31 = arith.sitofp %24 : i32 to f32
      %32 = vector.broadcast %31 : f32 to vector<1x16xf32>
      %33 = arith.addf %32, %27 : vector<1x16xf32>
      %34 = arith.addf %5, %30 : vector<1x16xf32>
      %35 = vector.broadcast %33 : vector<1x16xf32> to vector<16x16xf32>
      %36 = vector.broadcast %1 : vector<16x1xf32> to vector<16x16xf32>
      %37 = arith.subf %35, %36 : vector<16x16xf32>
      %38 = math.absf %37 : vector<16x16xf32>
      %cst_45 = arith.constant 1.000000e+00 : f32
      %39 = vector.broadcast %cst_45 : f32 to vector<16x16xf32>
      %40 = arith.subf %39, %38 : vector<16x16xf32>
      %cst_46 = arith.constant 0.000000e+00 : f32
      %41 = vector.broadcast %cst_46 : f32 to vector<16x16xf32>
      %42 = arith.maximumf %41, %40 : vector<16x16xf32>
      %43 = vector.broadcast %34 : vector<1x16xf32> to vector<16x16xf32>
      %44 = vector.broadcast %3 : vector<16x1xf32> to vector<16x16xf32>
      %45 = arith.subf %43, %44 : vector<16x16xf32>
      %46 = math.absf %45 : vector<16x16xf32>
      %cst_47 = arith.constant 1.000000e+00 : f32
      %47 = vector.broadcast %cst_47 : f32 to vector<16x16xf32>
      %48 = arith.subf %47, %46 : vector<16x16xf32>
      %cst_48 = arith.constant 0.000000e+00 : f32
      %49 = vector.broadcast %cst_48 : f32 to vector<16x16xf32>
      %50 = arith.maximumf %49, %48 : vector<16x16xf32>
      %cst_49 = arith.constant dense<0.000000e+00> : vector<32x16xf32>
      %51 = tpu.matmul %25, %50, %cst_49 {dimension_numbers = #tpu.dot_dimension_numbers<[1], [0], [0], [1], [0, 0, 1, 1], [], []>} : vector<32x16xf32>, vector<16x16xf32>, vector<32x16xf32> -> vector<32x16xf32>
      %52 = vector.extract_strided_slice %51 {offsets = [0, 0], sizes = [16, 16], strides = [1, 1]} : vector<32x16xf32> to vector<16x16xf32>
      %53 = arith.mulf %42, %52 : vector<16x16xf32>
      %cst_50 = arith.constant dense<0.000000e+00> : vector<16xf32>
      %54 = vector.multi_reduction <add>, %53, %cst_50 [0] : vector<16x16xf32> to vector<16xf32>
      %55 = vector.shape_cast %54 : vector<16xf32> to vector<1x16xf32>
      %56 = vector.extract_strided_slice %51 {offsets = [16, 0], sizes = [16, 16], strides = [1, 1]} : vector<32x16xf32> to vector<16x16xf32>
      %57 = arith.mulf %42, %56 : vector<16x16xf32>
      %cst_51 = arith.constant dense<0.000000e+00> : vector<16xf32>
      %58 = vector.multi_reduction <add>, %57, %cst_51 [0] : vector<16x16xf32> to vector<16xf32>
      %59 = vector.shape_cast %58 : vector<16xf32> to vector<1x16xf32>
      %60 = arith.addf %27, %55 : vector<1x16xf32>
      %61 = arith.index_cast %24 : i32 to index
      %c0_52 = arith.constant 0 : index
      %62 = vector.load %arg5[%61, %c0_52] : memref<32x16xf32, #tpu.memory_space<vmem>>, vector<1x16xf32>
      tpu.vector_store %arg5[%61, %c0_52], %60 {strides = array<i32>} : memref<32x16xf32, #tpu.memory_space<vmem>>, vector<1x16xf32>,
      %63 = arith.addf %30, %59 : vector<1x16xf32>
      %c16_i32_53 = arith.constant 16 : i32
      %64 = arith.addi %c16_i32_53, %24 : i32
      %65 = arith.index_cast %64 : i32 to index
      %c0_54 = arith.constant 0 : index
      %66 = vector.load %arg5[%65, %c0_54] : memref<32x16xf32, #tpu.memory_space<vmem>>, vector<1x16xf32>
      tpu.vector_store %arg5[%65, %c0_54], %63 {strides = array<i32>} : memref<32x16xf32, #tpu.memory_space<vmem>>, vector<1x16xf32>,
    }
    %c16_i32_8 = arith.constant 16 : i32
    %c0_i32_9 = arith.constant 0 : i32
    %c16_i32_10 = arith.constant 16 : i32
    %13 = arith.addi %c0_i32_9, %c16_i32_10 : i32
    %c1_i32_11 = arith.constant 1 : i32
    scf.for %arg7 = %c0_i32_9 to %13 step %c1_i32_11  : i32 {
      %c1_i32_38 = arith.constant 1 : i32
      %23 = arith.muli %arg7, %c1_i32_38 : i32
      %c0_i32_39 = arith.constant 0 : i32
      %24 = arith.addi %c0_i32_39, %23 : i32
      %c0_40 = arith.constant 0 : index
      %c0_41 = arith.constant 0 : index
      %25 = vector.load %arg5[%c0_40, %c0_41] : memref<32x16xf32, #tpu.memory_space<vmem>>, vector<32x16xf32>
      %26 = arith.index_cast %24 : i32 to index
      %c0_42 = arith.constant 0 : index
      %27 = vector.load %arg5[%26, %c0_42] : memref<32x16xf32, #tpu.memory_space<vmem>>, vector<1x16xf32>
      %c16_i32_43 = arith.constant 16 : i32
      %28 = arith.addi %c16_i32_43, %24 : i32
      %29 = arith.index_cast %28 : i32 to index
      %c0_44 = arith.constant 0 : index
      %30 = vector.load %arg5[%29, %c0_44] : memref<32x16xf32, #tpu.memory_space<vmem>>, vector<1x16xf32>
      %31 = arith.sitofp %24 : i32 to f32
      %32 = vector.broadcast %31 : f32 to vector<1x16xf32>
      %33 = arith.addf %32, %27 : vector<1x16xf32>
      %34 = arith.addf %5, %30 : vector<1x16xf32>
      %35 = vector.broadcast %33 : vector<1x16xf32> to vector<16x16xf32>
      %36 = vector.broadcast %1 : vector<16x1xf32> to vector<16x16xf32>
      %37 = arith.subf %35, %36 : vector<16x16xf32>
      %38 = math.absf %37 : vector<16x16xf32>
      %cst_45 = arith.constant 1.000000e+00 : f32
      %39 = vector.broadcast %cst_45 : f32 to vector<16x16xf32>
      %40 = arith.subf %39, %38 : vector<16x16xf32>
      %cst_46 = arith.constant 0.000000e+00 : f32
      %41 = vector.broadcast %cst_46 : f32 to vector<16x16xf32>
      %42 = arith.maximumf %41, %40 : vector<16x16xf32>
      %43 = vector.broadcast %34 : vector<1x16xf32> to vector<16x16xf32>
      %44 = vector.broadcast %3 : vector<16x1xf32> to vector<16x16xf32>
      %45 = arith.subf %43, %44 : vector<16x16xf32>
      %46 = math.absf %45 : vector<16x16xf32>
      %cst_47 = arith.constant 1.000000e+00 : f32
      %47 = vector.broadcast %cst_47 : f32 to vector<16x16xf32>
      %48 = arith.subf %47, %46 : vector<16x16xf32>
      %cst_48 = arith.constant 0.000000e+00 : f32
      %49 = vector.broadcast %cst_48 : f32 to vector<16x16xf32>
      %50 = arith.maximumf %49, %48 : vector<16x16xf32>
      %cst_49 = arith.constant dense<0.000000e+00> : vector<32x16xf32>
      %51 = tpu.matmul %25, %50, %cst_49 {dimension_numbers = #tpu.dot_dimension_numbers<[1], [0], [0], [1], [0, 0, 1, 1], [], []>} : vector<32x16xf32>, vector<16x16xf32>, vector<32x16xf32> -> vector<32x16xf32>
      %52 = vector.extract_strided_slice %51 {offsets = [0, 0], sizes = [16, 16], strides = [1, 1]} : vector<32x16xf32> to vector<16x16xf32>
      %53 = arith.mulf %42, %52 : vector<16x16xf32>
      %cst_50 = arith.constant dense<0.000000e+00> : vector<16xf32>
      %54 = vector.multi_reduction <add>, %53, %cst_50 [0] : vector<16x16xf32> to vector<16xf32>
      %55 = vector.shape_cast %54 : vector<16xf32> to vector<1x16xf32>
      %56 = vector.extract_strided_slice %51 {offsets = [16, 0], sizes = [16, 16], strides = [1, 1]} : vector<32x16xf32> to vector<16x16xf32>
      %57 = arith.mulf %42, %56 : vector<16x16xf32>
      %cst_51 = arith.constant dense<0.000000e+00> : vector<16xf32>
      %58 = vector.multi_reduction <add>, %57, %cst_51 [0] : vector<16x16xf32> to vector<16xf32>
      %59 = vector.shape_cast %58 : vector<16xf32> to vector<1x16xf32>
      %60 = arith.addf %27, %55 : vector<1x16xf32>
      %61 = arith.index_cast %24 : i32 to index
      %c0_52 = arith.constant 0 : index
      %62 = vector.load %arg6[%61, %c0_52] : memref<32x16xf32, #tpu.memory_space<vmem>>, vector<1x16xf32>
      tpu.vector_store %arg6[%61, %c0_52], %60 {strides = array<i32>} : memref<32x16xf32, #tpu.memory_space<vmem>>, vector<1x16xf32>,
      %63 = arith.addf %30, %59 : vector<1x16xf32>
      %c16_i32_53 = arith.constant 16 : i32
      %64 = arith.addi %c16_i32_53, %24 : i32
      %65 = arith.index_cast %64 : i32 to index
      %c0_54 = arith.constant 0 : index
      %66 = vector.load %arg6[%65, %c0_54] : memref<32x16xf32, #tpu.memory_space<vmem>>, vector<1x16xf32>
      tpu.vector_store %arg6[%65, %c0_54], %63 {strides = array<i32>} : memref<32x16xf32, #tpu.memory_space<vmem>>, vector<1x16xf32>,
    }
    %c16_i32_12 = arith.constant 16 : i32
    %c0_i32_13 = arith.constant 0 : i32
    %c16_i32_14 = arith.constant 16 : i32
    %14 = arith.addi %c0_i32_13, %c16_i32_14 : i32
    %c1_i32_15 = arith.constant 1 : i32
    scf.for %arg7 = %c0_i32_13 to %14 step %c1_i32_15  : i32 {
      %c1_i32_38 = arith.constant 1 : i32
      %23 = arith.muli %arg7, %c1_i32_38 : i32
      %c0_i32_39 = arith.constant 0 : i32
      %24 = arith.addi %c0_i32_39, %23 : i32
      %c0_40 = arith.constant 0 : index
      %c0_41 = arith.constant 0 : index
      %25 = vector.load %arg6[%c0_40, %c0_41] : memref<32x16xf32, #tpu.memory_space<vmem>>, vector<32x16xf32>
      %26 = arith.index_cast %24 : i32 to index
      %c0_42 = arith.constant 0 : index
      %27 = vector.load %arg6[%26, %c0_42] : memref<32x16xf32, #tpu.memory_space<vmem>>, vector<1x16xf32>
      %c16_i32_43 = arith.constant 16 : i32
      %28 = arith.addi %c16_i32_43, %24 : i32
      %29 = arith.index_cast %28 : i32 to index
      %c0_44 = arith.constant 0 : index
      %30 = vector.load %arg6[%29, %c0_44] : memref<32x16xf32, #tpu.memory_space<vmem>>, vector<1x16xf32>
      %31 = arith.sitofp %24 : i32 to f32
      %32 = vector.broadcast %31 : f32 to vector<1x16xf32>
      %33 = arith.addf %32, %27 : vector<1x16xf32>
      %34 = arith.addf %5, %30 : vector<1x16xf32>
      %35 = vector.broadcast %33 : vector<1x16xf32> to vector<16x16xf32>
      %36 = vector.broadcast %1 : vector<16x1xf32> to vector<16x16xf32>
      %37 = arith.subf %35, %36 : vector<16x16xf32>
      %38 = math.absf %37 : vector<16x16xf32>
      %cst_45 = arith.constant 1.000000e+00 : f32
      %39 = vector.broadcast %cst_45 : f32 to vector<16x16xf32>
      %40 = arith.subf %39, %38 : vector<16x16xf32>
      %cst_46 = arith.constant 0.000000e+00 : f32
      %41 = vector.broadcast %cst_46 : f32 to vector<16x16xf32>
      %42 = arith.maximumf %41, %40 : vector<16x16xf32>
      %43 = vector.broadcast %34 : vector<1x16xf32> to vector<16x16xf32>
      %44 = vector.broadcast %3 : vector<16x1xf32> to vector<16x16xf32>
      %45 = arith.subf %43, %44 : vector<16x16xf32>
      %46 = math.absf %45 : vector<16x16xf32>
      %cst_47 = arith.constant 1.000000e+00 : f32
      %47 = vector.broadcast %cst_47 : f32 to vector<16x16xf32>
      %48 = arith.subf %47, %46 : vector<16x16xf32>
      %cst_48 = arith.constant 0.000000e+00 : f32
      %49 = vector.broadcast %cst_48 : f32 to vector<16x16xf32>
      %50 = arith.maximumf %49, %48 : vector<16x16xf32>
      %cst_49 = arith.constant dense<0.000000e+00> : vector<32x16xf32>
      %51 = tpu.matmul %25, %50, %cst_49 {dimension_numbers = #tpu.dot_dimension_numbers<[1], [0], [0], [1], [0, 0, 1, 1], [], []>} : vector<32x16xf32>, vector<16x16xf32>, vector<32x16xf32> -> vector<32x16xf32>
      %52 = vector.extract_strided_slice %51 {offsets = [0, 0], sizes = [16, 16], strides = [1, 1]} : vector<32x16xf32> to vector<16x16xf32>
      %53 = arith.mulf %42, %52 : vector<16x16xf32>
      %cst_50 = arith.constant dense<0.000000e+00> : vector<16xf32>
      %54 = vector.multi_reduction <add>, %53, %cst_50 [0] : vector<16x16xf32> to vector<16xf32>
      %55 = vector.shape_cast %54 : vector<16xf32> to vector<1x16xf32>
      %56 = vector.extract_strided_slice %51 {offsets = [16, 0], sizes = [16, 16], strides = [1, 1]} : vector<32x16xf32> to vector<16x16xf32>
      %57 = arith.mulf %42, %56 : vector<16x16xf32>
      %cst_51 = arith.constant dense<0.000000e+00> : vector<16xf32>
      %58 = vector.multi_reduction <add>, %57, %cst_51 [0] : vector<16x16xf32> to vector<16xf32>
      %59 = vector.shape_cast %58 : vector<16xf32> to vector<1x16xf32>
      %60 = arith.addf %27, %55 : vector<1x16xf32>
      %61 = arith.index_cast %24 : i32 to index
      %c0_52 = arith.constant 0 : index
      %62 = vector.load %arg5[%61, %c0_52] : memref<32x16xf32, #tpu.memory_space<vmem>>, vector<1x16xf32>
      tpu.vector_store %arg5[%61, %c0_52], %60 {strides = array<i32>} : memref<32x16xf32, #tpu.memory_space<vmem>>, vector<1x16xf32>,
      %63 = arith.addf %30, %59 : vector<1x16xf32>
      %c16_i32_53 = arith.constant 16 : i32
      %64 = arith.addi %c16_i32_53, %24 : i32
      %65 = arith.index_cast %64 : i32 to index
      %c0_54 = arith.constant 0 : index
      %66 = vector.load %arg5[%65, %c0_54] : memref<32x16xf32, #tpu.memory_space<vmem>>, vector<1x16xf32>
      tpu.vector_store %arg5[%65, %c0_54], %63 {strides = array<i32>} : memref<32x16xf32, #tpu.memory_space<vmem>>, vector<1x16xf32>,
    }
    %c16_i32_16 = arith.constant 16 : i32
    %c0_i32_17 = arith.constant 0 : i32
    %c16_i32_18 = arith.constant 16 : i32
    %15 = arith.addi %c0_i32_17, %c16_i32_18 : i32
    %c1_i32_19 = arith.constant 1 : i32
    scf.for %arg7 = %c0_i32_17 to %15 step %c1_i32_19  : i32 {
      %c1_i32_38 = arith.constant 1 : i32
      %23 = arith.muli %arg7, %c1_i32_38 : i32
      %c0_i32_39 = arith.constant 0 : i32
      %24 = arith.addi %c0_i32_39, %23 : i32
      %c0_40 = arith.constant 0 : index
      %c0_41 = arith.constant 0 : index
      %25 = vector.load %arg5[%c0_40, %c0_41] : memref<32x16xf32, #tpu.memory_space<vmem>>, vector<32x16xf32>
      %26 = arith.index_cast %24 : i32 to index
      %c0_42 = arith.constant 0 : index
      %27 = vector.load %arg5[%26, %c0_42] : memref<32x16xf32, #tpu.memory_space<vmem>>, vector<1x16xf32>
      %c16_i32_43 = arith.constant 16 : i32
      %28 = arith.addi %c16_i32_43, %24 : i32
      %29 = arith.index_cast %28 : i32 to index
      %c0_44 = arith.constant 0 : index
      %30 = vector.load %arg5[%29, %c0_44] : memref<32x16xf32, #tpu.memory_space<vmem>>, vector<1x16xf32>
      %31 = arith.sitofp %24 : i32 to f32
      %32 = vector.broadcast %31 : f32 to vector<1x16xf32>
      %33 = arith.addf %32, %27 : vector<1x16xf32>
      %34 = arith.addf %5, %30 : vector<1x16xf32>
      %35 = vector.broadcast %33 : vector<1x16xf32> to vector<16x16xf32>
      %36 = vector.broadcast %1 : vector<16x1xf32> to vector<16x16xf32>
      %37 = arith.subf %35, %36 : vector<16x16xf32>
      %38 = math.absf %37 : vector<16x16xf32>
      %cst_45 = arith.constant 1.000000e+00 : f32
      %39 = vector.broadcast %cst_45 : f32 to vector<16x16xf32>
      %40 = arith.subf %39, %38 : vector<16x16xf32>
      %cst_46 = arith.constant 0.000000e+00 : f32
      %41 = vector.broadcast %cst_46 : f32 to vector<16x16xf32>
      %42 = arith.maximumf %41, %40 : vector<16x16xf32>
      %43 = vector.broadcast %34 : vector<1x16xf32> to vector<16x16xf32>
      %44 = vector.broadcast %3 : vector<16x1xf32> to vector<16x16xf32>
      %45 = arith.subf %43, %44 : vector<16x16xf32>
      %46 = math.absf %45 : vector<16x16xf32>
      %cst_47 = arith.constant 1.000000e+00 : f32
      %47 = vector.broadcast %cst_47 : f32 to vector<16x16xf32>
      %48 = arith.subf %47, %46 : vector<16x16xf32>
      %cst_48 = arith.constant 0.000000e+00 : f32
      %49 = vector.broadcast %cst_48 : f32 to vector<16x16xf32>
      %50 = arith.maximumf %49, %48 : vector<16x16xf32>
      %cst_49 = arith.constant dense<0.000000e+00> : vector<32x16xf32>
      %51 = tpu.matmul %25, %50, %cst_49 {dimension_numbers = #tpu.dot_dimension_numbers<[1], [0], [0], [1], [0, 0, 1, 1], [], []>} : vector<32x16xf32>, vector<16x16xf32>, vector<32x16xf32> -> vector<32x16xf32>
      %52 = vector.extract_strided_slice %51 {offsets = [0, 0], sizes = [16, 16], strides = [1, 1]} : vector<32x16xf32> to vector<16x16xf32>
      %53 = arith.mulf %42, %52 : vector<16x16xf32>
      %cst_50 = arith.constant dense<0.000000e+00> : vector<16xf32>
      %54 = vector.multi_reduction <add>, %53, %cst_50 [0] : vector<16x16xf32> to vector<16xf32>
      %55 = vector.shape_cast %54 : vector<16xf32> to vector<1x16xf32>
      %56 = vector.extract_strided_slice %51 {offsets = [16, 0], sizes = [16, 16], strides = [1, 1]} : vector<32x16xf32> to vector<16x16xf32>
      %57 = arith.mulf %42, %56 : vector<16x16xf32>
      %cst_51 = arith.constant dense<0.000000e+00> : vector<16xf32>
      %58 = vector.multi_reduction <add>, %57, %cst_51 [0] : vector<16x16xf32> to vector<16xf32>
      %59 = vector.shape_cast %58 : vector<16xf32> to vector<1x16xf32>
      %60 = arith.addf %27, %55 : vector<1x16xf32>
      %61 = arith.index_cast %24 : i32 to index
      %c0_52 = arith.constant 0 : index
      %62 = vector.load %arg6[%61, %c0_52] : memref<32x16xf32, #tpu.memory_space<vmem>>, vector<1x16xf32>
      tpu.vector_store %arg6[%61, %c0_52], %60 {strides = array<i32>} : memref<32x16xf32, #tpu.memory_space<vmem>>, vector<1x16xf32>,
      %63 = arith.addf %30, %59 : vector<1x16xf32>
      %c16_i32_53 = arith.constant 16 : i32
      %64 = arith.addi %c16_i32_53, %24 : i32
      %65 = arith.index_cast %64 : i32 to index
      %c0_54 = arith.constant 0 : index
      %66 = vector.load %arg6[%65, %c0_54] : memref<32x16xf32, #tpu.memory_space<vmem>>, vector<1x16xf32>
      tpu.vector_store %arg6[%65, %c0_54], %63 {strides = array<i32>} : memref<32x16xf32, #tpu.memory_space<vmem>>, vector<1x16xf32>,
    }
    %c16_i32_20 = arith.constant 16 : i32
    %c0_i32_21 = arith.constant 0 : i32
    %c16_i32_22 = arith.constant 16 : i32
    %16 = arith.addi %c0_i32_21, %c16_i32_22 : i32
    %c1_i32_23 = arith.constant 1 : i32
    scf.for %arg7 = %c0_i32_21 to %16 step %c1_i32_23  : i32 {
      %c1_i32_38 = arith.constant 1 : i32
      %23 = arith.muli %arg7, %c1_i32_38 : i32
      %c0_i32_39 = arith.constant 0 : i32
      %24 = arith.addi %c0_i32_39, %23 : i32
      %c0_40 = arith.constant 0 : index
      %c0_41 = arith.constant 0 : index
      %25 = vector.load %arg6[%c0_40, %c0_41] : memref<32x16xf32, #tpu.memory_space<vmem>>, vector<32x16xf32>
      %26 = arith.index_cast %24 : i32 to index
      %c0_42 = arith.constant 0 : index
      %27 = vector.load %arg6[%26, %c0_42] : memref<32x16xf32, #tpu.memory_space<vmem>>, vector<1x16xf32>
      %c16_i32_43 = arith.constant 16 : i32
      %28 = arith.addi %c16_i32_43, %24 : i32
      %29 = arith.index_cast %28 : i32 to index
      %c0_44 = arith.constant 0 : index
      %30 = vector.load %arg6[%29, %c0_44] : memref<32x16xf32, #tpu.memory_space<vmem>>, vector<1x16xf32>
      %31 = arith.sitofp %24 : i32 to f32
      %32 = vector.broadcast %31 : f32 to vector<1x16xf32>
      %33 = arith.addf %32, %27 : vector<1x16xf32>
      %34 = arith.addf %5, %30 : vector<1x16xf32>
      %35 = vector.broadcast %33 : vector<1x16xf32> to vector<16x16xf32>
      %36 = vector.broadcast %1 : vector<16x1xf32> to vector<16x16xf32>
      %37 = arith.subf %35, %36 : vector<16x16xf32>
      %38 = math.absf %37 : vector<16x16xf32>
      %cst_45 = arith.constant 1.000000e+00 : f32
      %39 = vector.broadcast %cst_45 : f32 to vector<16x16xf32>
      %40 = arith.subf %39, %38 : vector<16x16xf32>
      %cst_46 = arith.constant 0.000000e+00 : f32
      %41 = vector.broadcast %cst_46 : f32 to vector<16x16xf32>
      %42 = arith.maximumf %41, %40 : vector<16x16xf32>
      %43 = vector.broadcast %34 : vector<1x16xf32> to vector<16x16xf32>
      %44 = vector.broadcast %3 : vector<16x1xf32> to vector<16x16xf32>
      %45 = arith.subf %43, %44 : vector<16x16xf32>
      %46 = math.absf %45 : vector<16x16xf32>
      %cst_47 = arith.constant 1.000000e+00 : f32
      %47 = vector.broadcast %cst_47 : f32 to vector<16x16xf32>
      %48 = arith.subf %47, %46 : vector<16x16xf32>
      %cst_48 = arith.constant 0.000000e+00 : f32
      %49 = vector.broadcast %cst_48 : f32 to vector<16x16xf32>
      %50 = arith.maximumf %49, %48 : vector<16x16xf32>
      %cst_49 = arith.constant dense<0.000000e+00> : vector<32x16xf32>
      %51 = tpu.matmul %25, %50, %cst_49 {dimension_numbers = #tpu.dot_dimension_numbers<[1], [0], [0], [1], [0, 0, 1, 1], [], []>} : vector<32x16xf32>, vector<16x16xf32>, vector<32x16xf32> -> vector<32x16xf32>
      %52 = vector.extract_strided_slice %51 {offsets = [0, 0], sizes = [16, 16], strides = [1, 1]} : vector<32x16xf32> to vector<16x16xf32>
      %53 = arith.mulf %42, %52 : vector<16x16xf32>
      %cst_50 = arith.constant dense<0.000000e+00> : vector<16xf32>
      %54 = vector.multi_reduction <add>, %53, %cst_50 [0] : vector<16x16xf32> to vector<16xf32>
      %55 = vector.shape_cast %54 : vector<16xf32> to vector<1x16xf32>
      %56 = vector.extract_strided_slice %51 {offsets = [16, 0], sizes = [16, 16], strides = [1, 1]} : vector<32x16xf32> to vector<16x16xf32>
      %57 = arith.mulf %42, %56 : vector<16x16xf32>
      %cst_51 = arith.constant dense<0.000000e+00> : vector<16xf32>
      %58 = vector.multi_reduction <add>, %57, %cst_51 [0] : vector<16x16xf32> to vector<16xf32>
      %59 = vector.shape_cast %58 : vector<16xf32> to vector<1x16xf32>
      %60 = arith.addf %27, %55 : vector<1x16xf32>
      %61 = arith.index_cast %24 : i32 to index
      %c0_52 = arith.constant 0 : index
      %62 = vector.load %arg5[%61, %c0_52] : memref<32x16xf32, #tpu.memory_space<vmem>>, vector<1x16xf32>
      tpu.vector_store %arg5[%61, %c0_52], %60 {strides = array<i32>} : memref<32x16xf32, #tpu.memory_space<vmem>>, vector<1x16xf32>,
      %63 = arith.addf %30, %59 : vector<1x16xf32>
      %c16_i32_53 = arith.constant 16 : i32
      %64 = arith.addi %c16_i32_53, %24 : i32
      %65 = arith.index_cast %64 : i32 to index
      %c0_54 = arith.constant 0 : index
      %66 = vector.load %arg5[%65, %c0_54] : memref<32x16xf32, #tpu.memory_space<vmem>>, vector<1x16xf32>
      tpu.vector_store %arg5[%65, %c0_54], %63 {strides = array<i32>} : memref<32x16xf32, #tpu.memory_space<vmem>>, vector<1x16xf32>,
    }
    %c16_i32_24 = arith.constant 16 : i32
    %c0_i32_25 = arith.constant 0 : i32
    %c16_i32_26 = arith.constant 16 : i32
    %17 = arith.addi %c0_i32_25, %c16_i32_26 : i32
    %c1_i32_27 = arith.constant 1 : i32
    scf.for %arg7 = %c0_i32_25 to %17 step %c1_i32_27  : i32 {
      %c1_i32_38 = arith.constant 1 : i32
      %23 = arith.muli %arg7, %c1_i32_38 : i32
      %c0_i32_39 = arith.constant 0 : i32
      %24 = arith.addi %c0_i32_39, %23 : i32
      %c0_40 = arith.constant 0 : index
      %c0_41 = arith.constant 0 : index
      %25 = vector.load %arg5[%c0_40, %c0_41] : memref<32x16xf32, #tpu.memory_space<vmem>>, vector<32x16xf32>
      %26 = arith.index_cast %24 : i32 to index
      %c0_42 = arith.constant 0 : index
      %27 = vector.load %arg5[%26, %c0_42] : memref<32x16xf32, #tpu.memory_space<vmem>>, vector<1x16xf32>
      %c16_i32_43 = arith.constant 16 : i32
      %28 = arith.addi %c16_i32_43, %24 : i32
      %29 = arith.index_cast %28 : i32 to index
      %c0_44 = arith.constant 0 : index
      %30 = vector.load %arg5[%29, %c0_44] : memref<32x16xf32, #tpu.memory_space<vmem>>, vector<1x16xf32>
      %31 = arith.sitofp %24 : i32 to f32
      %32 = vector.broadcast %31 : f32 to vector<1x16xf32>
      %33 = arith.addf %32, %27 : vector<1x16xf32>
      %34 = arith.addf %5, %30 : vector<1x16xf32>
      %35 = vector.broadcast %33 : vector<1x16xf32> to vector<16x16xf32>
      %36 = vector.broadcast %1 : vector<16x1xf32> to vector<16x16xf32>
      %37 = arith.subf %35, %36 : vector<16x16xf32>
      %38 = math.absf %37 : vector<16x16xf32>
      %cst_45 = arith.constant 1.000000e+00 : f32
      %39 = vector.broadcast %cst_45 : f32 to vector<16x16xf32>
      %40 = arith.subf %39, %38 : vector<16x16xf32>
      %cst_46 = arith.constant 0.000000e+00 : f32
      %41 = vector.broadcast %cst_46 : f32 to vector<16x16xf32>
      %42 = arith.maximumf %41, %40 : vector<16x16xf32>
      %43 = vector.broadcast %34 : vector<1x16xf32> to vector<16x16xf32>
      %44 = vector.broadcast %3 : vector<16x1xf32> to vector<16x16xf32>
      %45 = arith.subf %43, %44 : vector<16x16xf32>
      %46 = math.absf %45 : vector<16x16xf32>
      %cst_47 = arith.constant 1.000000e+00 : f32
      %47 = vector.broadcast %cst_47 : f32 to vector<16x16xf32>
      %48 = arith.subf %47, %46 : vector<16x16xf32>
      %cst_48 = arith.constant 0.000000e+00 : f32
      %49 = vector.broadcast %cst_48 : f32 to vector<16x16xf32>
      %50 = arith.maximumf %49, %48 : vector<16x16xf32>
      %cst_49 = arith.constant dense<0.000000e+00> : vector<32x16xf32>
      %51 = tpu.matmul %25, %50, %cst_49 {dimension_numbers = #tpu.dot_dimension_numbers<[1], [0], [0], [1], [0, 0, 1, 1], [], []>} : vector<32x16xf32>, vector<16x16xf32>, vector<32x16xf32> -> vector<32x16xf32>
      %52 = vector.extract_strided_slice %51 {offsets = [0, 0], sizes = [16, 16], strides = [1, 1]} : vector<32x16xf32> to vector<16x16xf32>
      %53 = arith.mulf %42, %52 : vector<16x16xf32>
      %cst_50 = arith.constant dense<0.000000e+00> : vector<16xf32>
      %54 = vector.multi_reduction <add>, %53, %cst_50 [0] : vector<16x16xf32> to vector<16xf32>
      %55 = vector.shape_cast %54 : vector<16xf32> to vector<1x16xf32>
      %56 = vector.extract_strided_slice %51 {offsets = [16, 0], sizes = [16, 16], strides = [1, 1]} : vector<32x16xf32> to vector<16x16xf32>
      %57 = arith.mulf %42, %56 : vector<16x16xf32>
      %cst_51 = arith.constant dense<0.000000e+00> : vector<16xf32>
      %58 = vector.multi_reduction <add>, %57, %cst_51 [0] : vector<16x16xf32> to vector<16xf32>
      %59 = vector.shape_cast %58 : vector<16xf32> to vector<1x16xf32>
      %60 = arith.addf %27, %55 : vector<1x16xf32>
      %61 = arith.index_cast %24 : i32 to index
      %c0_52 = arith.constant 0 : index
      %62 = vector.load %arg6[%61, %c0_52] : memref<32x16xf32, #tpu.memory_space<vmem>>, vector<1x16xf32>
      tpu.vector_store %arg6[%61, %c0_52], %60 {strides = array<i32>} : memref<32x16xf32, #tpu.memory_space<vmem>>, vector<1x16xf32>,
      %63 = arith.addf %30, %59 : vector<1x16xf32>
      %c16_i32_53 = arith.constant 16 : i32
      %64 = arith.addi %c16_i32_53, %24 : i32
      %65 = arith.index_cast %64 : i32 to index
      %c0_54 = arith.constant 0 : index
      %66 = vector.load %arg6[%65, %c0_54] : memref<32x16xf32, #tpu.memory_space<vmem>>, vector<1x16xf32>
      tpu.vector_store %arg6[%65, %c0_54], %63 {strides = array<i32>} : memref<32x16xf32, #tpu.memory_space<vmem>>, vector<1x16xf32>,
    }
    %c16_i32_28 = arith.constant 16 : i32
    %c0_29 = arith.constant 0 : index
    %c0_30 = arith.constant 0 : index
    %18 = vector.load %arg6[%c0_29, %c0_30] : memref<32x16xf32, #tpu.memory_space<vmem>>, vector<32x16xf32>
    %c0_31 = arith.constant 0 : index
    %c0_32 = arith.constant 0 : index
    %c0_33 = arith.constant 0 : index
    %19 = vector.load %arg3[%c0_31, %c0_32, %c0_33] : memref<1x32x16xf32, #tpu.memory_space<vmem>>, vector<1x32x16xf32>
    %20 = vector.shape_cast %19 : vector<1x32x16xf32> to vector<32x16xf32>
    %21 = vector.shape_cast %18 : vector<32x16xf32> to vector<1x32x16xf32>
    tpu.vector_store %arg3[%c0_31, %c0_32, %c0_33], %21 {strides = array<i32>} : memref<1x32x16xf32, #tpu.memory_space<vmem>>, vector<1x32x16xf32>,
    %c0_i32_34 = arith.constant 0 : i32
    %c16_i32_35 = arith.constant 16 : i32
    %22 = arith.addi %c0_i32_34, %c16_i32_35 : i32
    %c1_i32_36 = arith.constant 1 : i32
    scf.for %arg7 = %c0_i32_34 to %22 step %c1_i32_36  : i32 {
      %c1_i32_38 = arith.constant 1 : i32
      %23 = arith.muli %arg7, %c1_i32_38 : i32
      %c0_i32_39 = arith.constant 0 : i32
      %24 = arith.addi %c0_i32_39, %23 : i32
      %c0_40 = arith.constant 0 : index
      %c0_41 = arith.constant 0 : index
      %c0_42 = arith.constant 0 : index
      %25 = vector.load %arg2[%c0_40, %c0_41, %c0_42] : memref<1x16x16xf32, #tpu.memory_space<vmem>>, vector<1x16x16xf32>
      %26 = vector.shape_cast %25 : vector<1x16x16xf32> to vector<16x16xf32>
      %27 = arith.index_cast %24 : i32 to index
      %c0_43 = arith.constant 0 : index
      %28 = vector.load %arg6[%27, %c0_43] : memref<32x16xf32, #tpu.memory_space<vmem>>, vector<1x16xf32>
      %c16_i32_44 = arith.constant 16 : i32
      %29 = arith.addi %c16_i32_44, %24 : i32
      %30 = arith.index_cast %29 : i32 to index
      %c0_45 = arith.constant 0 : index
      %31 = vector.load %arg6[%30, %c0_45] : memref<32x16xf32, #tpu.memory_space<vmem>>, vector<1x16xf32>
      %32 = arith.sitofp %24 : i32 to f32
      %33 = vector.broadcast %32 : f32 to vector<1x16xf32>
      %34 = arith.addf %33, %28 : vector<1x16xf32>
      %35 = arith.addf %5, %31 : vector<1x16xf32>
      %36 = vector.broadcast %34 : vector<1x16xf32> to vector<16x16xf32>
      %37 = vector.broadcast %1 : vector<16x1xf32> to vector<16x16xf32>
      %38 = arith.subf %36, %37 : vector<16x16xf32>
      %39 = math.absf %38 : vector<16x16xf32>
      %cst_46 = arith.constant 1.000000e+00 : f32
      %40 = vector.broadcast %cst_46 : f32 to vector<16x16xf32>
      %41 = arith.subf %40, %39 : vector<16x16xf32>
      %cst_47 = arith.constant 0.000000e+00 : f32
      %42 = vector.broadcast %cst_47 : f32 to vector<16x16xf32>
      %43 = arith.maximumf %42, %41 : vector<16x16xf32>
      %44 = vector.broadcast %35 : vector<1x16xf32> to vector<16x16xf32>
      %45 = vector.broadcast %3 : vector<16x1xf32> to vector<16x16xf32>
      %46 = arith.subf %44, %45 : vector<16x16xf32>
      %47 = math.absf %46 : vector<16x16xf32>
      %cst_48 = arith.constant 1.000000e+00 : f32
      %48 = vector.broadcast %cst_48 : f32 to vector<16x16xf32>
      %49 = arith.subf %48, %47 : vector<16x16xf32>
      %cst_49 = arith.constant 0.000000e+00 : f32
      %50 = vector.broadcast %cst_49 : f32 to vector<16x16xf32>
      %51 = arith.maximumf %50, %49 : vector<16x16xf32>
      %cst_50 = arith.constant dense<0.000000e+00> : vector<16x16xf32>
      %52 = tpu.matmul %26, %51, %cst_50 {dimension_numbers = #tpu.dot_dimension_numbers<[1], [0], [0], [1], [0, 0, 1, 1], [], []>} : vector<16x16xf32>, vector<16x16xf32>, vector<16x16xf32> -> vector<16x16xf32>
      %53 = arith.mulf %43, %52 : vector<16x16xf32>
      %cst_51 = arith.constant dense<0.000000e+00> : vector<16xf32>
      %54 = vector.multi_reduction <add>, %53, %cst_51 [0] : vector<16x16xf32> to vector<16xf32>
      %55 = vector.shape_cast %54 : vector<16xf32> to vector<1x16xf32>
      %c0_i32_52 = arith.constant 0 : i32
      %56 = arith.addi %c0_i32_52, %24 : i32
      %c0_53 = arith.constant 0 : index
      %57 = arith.index_cast %56 : i32 to index
      %c0_54 = arith.constant 0 : index
      %58 = vector.load %arg4[%c0_53, %57, %c0_54] : memref<1x16x16xf32, #tpu.memory_space<vmem>>, vector<1x1x16xf32>
      %59 = vector.shape_cast %58 : vector<1x1x16xf32> to vector<1x16xf32>
      %60 = vector.shape_cast %55 : vector<1x16xf32> to vector<1x1x16xf32>
      tpu.vector_store %arg4[%c0_53, %57, %c0_54], %60 {strides = array<i32>} : memref<1x16x16xf32, #tpu.memory_space<vmem>>, vector<1x1x16xf32>,
    }
    %c16_i32_37 = arith.constant 16 : i32
    return
  }
  func.func @transform_0(%arg0: i32) -> (i32, i32, i32) {
    %c0_i32 = arith.constant 0 : i32
    %c0_i32_0 = arith.constant 0 : i32
    %c0_i32_1 = arith.constant 0 : i32
    return %arg0, %c0_i32, %c0_i32_0 : i32, i32, i32
  }
  func.func @transform_1(%arg0: i32) -> (i32, i32, i32) {
    %c0_i32 = arith.constant 0 : i32
    %c0_i32_0 = arith.constant 0 : i32
    %c0_i32_1 = arith.constant 0 : i32
    return %arg0, %c0_i32, %c0_i32_0 : i32, i32, i32
  }
  func.func @transform_2(%arg0: i32) -> (i32, i32, i32) {
    %c0_i32 = arith.constant 0 : i32
    %c0_i32_0 = arith.constant 0 : i32
    %c0_i32_1 = arith.constant 0 : i32
    return %arg0, %c0_i32, %c0_i32_0 : i32, i32, i32
  }
  func.func @transform_3(%arg0: i32) -> (i32, i32, i32) {
    %c0_i32 = arith.constant 0 : i32
    %c0_i32_0 = arith.constant 0 : i32
    %c0_i32_1 = arith.constant 0 : i32
    return %arg0, %c0_i32, %c0_i32_0 : i32, i32, i32
  }
}

</mosaic_0001>

<bundles_post_ra>
// kernel: regnet_forward.12
= control target key start
LH: loop header
LB: loop body
LE: loop exit
PB: predicated region body
PF: predicated region fallthrough
CT: control target
= control target key end

     0   :  { %s672_s1 = inlined_call_operand.vmem [shape: bf16[128,128], index: 1, kind: input, shape index: {}]   ;;  %s673_s0 = inlined_call_operand.vmem [shape: bf16[128,128], index: 0, kind: input, shape index: {}]   ;;  %s674_s2 = inlined_call_operand.vmem [shape: f32[1,128], index: 2, kind: input, shape index: {}]   ;;  %s675_s3 = inlined_call_operand.vmem [shape: bf16[128,128], index: 3, kind: output, shape index: {}]  }
   0x1   :  { %v539_v0 = vld [vmem:[%s672_s1] sm:$0xff]   ;;  %v540_v1 = vld [vmem:[%s672_s1 + $0x8] sm:$0xff]   ;;  %v541_v2 = vld [vmem:[%s672_s1 + $0x10] sm:$0xff]  }
   0x2   :  { %491 = vmatprep.subr.bf16.mxu0 %v539_v0  ;;  %523 = vmatprep.subr.bf16.mxu1 %v539_v0  ;;  %v542_v3 = vld [vmem:[%s672_s1 + $0x18] sm:$0xff]   ;;  %v547_v4 = vld [vmem:[%s673_s0] sm:$0xff]   ;;  %v544_v7 = vld [vmem:[%s672_s1 + $0x28] sm:$0xff]  }
   0x3   :  { %492 = vmatpush3.bf16.msra.mxu0 %v539_v0  ;;  %531 = vmatpush3.bf16.msra.mxu1 %v539_v0  ;;  %v548_v5 = vld [vmem:[%s673_s0 + $0x20] sm:$0xff]   ;;  %v545_v8 = vld [vmem:[%s672_s1 + $0x30] sm:$0xff]   ;;  %v546_v9 = vld [vmem:[%s672_s1 + $0x38] sm:$0xff]  }
   0x4   :  { %493 = vmatprep.subr.bf16.mxu0 %v540_v1  ;;  %524 = vmatprep.subr.bf16.mxu1 %v540_v1  ;;  %v543_v6 = vld [vmem:[%s672_s1 + $0x20] sm:$0xff]   ;;  %v549_v10 = vld [vmem:[%s673_s0 + $0x8] sm:$0xff]   ;;  %v551_v12 = vld [vmem:[%s673_s0 + $0x10] sm:$0xff]  }
   0x5   :  { %507 = vmatprep.mubr.bf16.mxu0 %v547_v4  ;;  %515 = vmatprep.mubr.bf16.mxu1 %v548_v5  ;;  %v550_v11 = vld [vmem:[%s673_s0 + $0x28] sm:$0xff]   ;;  %v552_v13 = vld [vmem:[%s673_s0 + $0x30] sm:$0xff]   ;;  %v553_v14 = vld [vmem:[%s673_s0 + $0x18] sm:$0xff]  }
   0x6   :  { %v554_v15 = vld [vmem:[%s673_s0 + $0x38] sm:$0xff]   ;;  %v626_v16 = vld [vmem:[%s674_s2] ss:$0 sm:$0xff] }
   0x7   :  { %494 = vmatpush3.bf16.msra.mxu0 %v540_v1  ;;  %532 = vmatpush3.bf16.msra.mxu1 %v540_v1 }
   0x8   :  { %495 = vmatprep.subr.bf16.mxu0 %v541_v2  ;;  %525 = vmatprep.subr.bf16.mxu1 %v541_v2 }
   0xb   :  { %496 = vmatpush3.bf16.msra.mxu0 %v541_v2  ;;  %533 = vmatpush3.bf16.msra.mxu1 %v541_v2 }
   0xc   :  { %497 = vmatprep.subr.bf16.mxu0 %v542_v3  ;;  %526 = vmatprep.subr.bf16.mxu1 %v542_v3 }
   0xf   :  { %498 = vmatpush3.bf16.msra.mxu0 %v542_v3  ;;  %534 = vmatpush3.bf16.msra.mxu1 %v542_v3 }
  0x10   :  { %499 = vmatprep.subr.bf16.mxu0 %v543_v6  ;;  %527 = vmatprep.subr.bf16.mxu1 %v543_v6 }
  0x13   :  { %500 = vmatpush3.bf16.msra.mxu0 %v543_v6  ;;  %535 = vmatpush3.bf16.msra.mxu1 %v543_v6 }
  0x14   :  { %501 = vmatprep.subr.bf16.mxu0 %v544_v7  ;;  %528 = vmatprep.subr.bf16.mxu1 %v544_v7 }
  0x17   :  { %502 = vmatpush3.bf16.msra.mxu0 %v544_v7  ;;  %536 = vmatpush3.bf16.msra.mxu1 %v544_v7 }
  0x18   :  { %503 = vmatprep.subr.bf16.mxu0 %v545_v8  ;;  %529 = vmatprep.subr.bf16.mxu1 %v545_v8 }
  0x1b   :  { %504 = vmatpush3.bf16.msra.mxu0 %v545_v8  ;;  %537 = vmatpush3.bf16.msra.mxu1 %v545_v8 }
  0x1c   :  { %505 = vmatprep.subr.bf16.mxu0 %v546_v9  ;;  %530 = vmatprep.subr.bf16.mxu1 %v546_v9 }
  0x1f   :  { %506 = vmatpush3.bf16.msra.mxu0 %v546_v9  ;;  %538 = vmatpush3.bf16.msra.mxu1 %v546_v9 }
  0x22   :  { %508 = vmatmul.mubr.bf16.vlgmr.msra.gmra.mrb[0].mxu0 %v549_v10  ;;  %516 = vmatmul.mubr.bf16.vlgmr.msra.gmra.mrb[0].mxu1 %v550_v11 }
  0x23   :  { %511 = vmatprep.mubr.bf16.mxu0 %v551_v12  ;;  %519 = vmatprep.mubr.bf16.mxu1 %v552_v13 }
  0x2a   :  { %512 = vmatmul.mubr.bf16.gmra.mrb[4].mxu0 %v553_v14  ;;  %520 = vmatmul.mubr.bf16.gmra.mrb[4].mxu1 %v554_v15 }
  0xf5   :  { %v509_v17 = vpop.f32.mrb[0].mxu0  ;;  %v517_v18 = vpop.f32.mrb[0].mxu1 }
  0xf6   :  { %v193_v19 = vadd.f32 %v509_v17, %v626_v16  ;;  %v225_v20 = vadd.f32 %v517_v18, %v626_v16  ;;  %v184_v21 = vpop.f32.mrb[1].mxu0  ;;  %v216_v22 = vpop.f32.mrb[1].mxu1 }
  0xf7   :  { %v185_v23 = vadd.f32 %v626_v16, %v184_v21  ;;  %v217_v24 = vadd.f32 %v626_v16, %v216_v22  ;;  %v510_v25 = vpop.f32.mrb[2].mxu0  ;;  %v518_v26 = vpop.f32.mrb[2].mxu1 }
  0xf8   :  { %vm249_vm0 = vcmp.gt.f32.partialorder %v193_v19, 0.0  ;;  %v265_v27 = vmul.f32 0.2, %v193_v19  ;;  %vm257_vm1 = vcmp.gt.f32.partialorder %v225_v20, 0.0  ;;  %v273_v28 = vmul.f32 0.2, %v225_v20 }
  0xf9   :  { %vm247_vm2 = vcmp.gt.f32.partialorder %v185_v23, 0.0  ;;  %v263_v29 = vmul.f32 0.2, %v185_v23  ;;  %vm255_vm3 = vcmp.gt.f32.partialorder %v217_v24, 0.0  ;;  %v271_v30 = vmul.f32 0.2, %v217_v24 }
  0xfa   :  { %v196_v31 = vadd.f32 %v510_v25, %v626_v16  ;;  %v228_v32 = vadd.f32 %v518_v26, %v626_v16  ;;  %v187_v33 = vpop.f32.mrb[3].mxu0  ;;  %v219_v34 = vpop.f32.mrb[3].mxu1  ;;  %v281_v35 = vsel %vm249_vm0, %v193_v19, %v265_v27  ;;  %v289_v36 = vsel %vm257_vm1, %v225_v20, %v273_v28 }
  0xfb   :  { %v188_v37 = vadd.f32 %v626_v16, %v187_v33  ;;  %v220_v38 = vadd.f32 %v626_v16, %v219_v34  ;;  %v279_v43 = vsel %vm247_vm2, %v185_v23, %v263_v29  ;;  %v287_v44 = vsel %vm255_vm3, %v217_v24, %v271_v30 }
  0xfc   :  { %vm250_vm4 = vcmp.gt.f32.partialorder %v196_v31, 0.0  ;;  %v266_v39 = vmul.f32 0.2, %v196_v31  ;;  %vm258_vm5 = vcmp.gt.f32.partialorder %v228_v32, 0.0  ;;  %v274_v40 = vmul.f32 0.2, %v228_v32 }
  0xfd   :  { %vm248_vm6 = vcmp.gt.f32.partialorder %v188_v37, 0.0  ;;  %v264_v41 = vmul.f32 0.2, %v188_v37  ;;  %vm256_vm7 = vcmp.gt.f32.partialorder %v220_v38, 0.0  ;;  %v272_v42 = vmul.f32 0.2, %v220_v38 }
  0xfe   :  { %v282_v45 = vsel %vm250_vm4, %v196_v31, %v266_v39  ;;  %v290_v46 = vsel %vm258_vm5, %v228_v32, %v274_v40  ;;  %v513_v47 = vpop.f32.mrb[4].mxu0  ;;  %v521_v48 = vpop.f32.mrb[4].mxu1 }
  0xff   :  { %v436_v49 = vpack.c.bf16 %v282_v45, %v281_v35  ;;  %v456_v50 = vpack.c.bf16 %v290_v46, %v289_v36  ;;  %v280_v51 = vsel %vm248_vm6, %v188_v37, %v264_v41  ;;  %v288_v52 = vsel %vm256_vm7, %v220_v38, %v272_v42  ;;  %v200_v53 = vpop.f32.mrb[5].mxu0  ;;  %v232_v54 = vpop.f32.mrb[5].mxu1 }
 0x100   :  { %v431_v55 = vpack.c.bf16 %v280_v51, %v279_v43  ;;  %v451_v56 = vpack.c.bf16 %v288_v52, %v287_v44  ;;  %v209_v57 = vadd.f32 %v513_v47, %v626_v16  ;;  %v241_v58 = vadd.f32 %v521_v48, %v626_v16  ;;  %v514_v59 = vpop.f32.mrb[6].mxu0  ;;  %v522_v60 = vpop.f32.mrb[6].mxu1 }
 0x101   :  { %468 = vst [vmem:[%s675_s3 + $0x8] sm:$0xff] %v436_v49   ;;  %472 = vst [vmem:[%s675_s3 + $0x28] sm:$0xff] %v456_v50   ;;  %v201_v61 = vadd.f32 %v626_v16, %v200_v53  ;;  %v233_v62 = vadd.f32 %v626_v16, %v232_v54  ;;  %v212_v63 = vadd.f32 %v514_v59, %v626_v16  ;;  %v203_v1 = vpop.f32.mrb[7].mxu0  ;;  %v235_v2 = vpop.f32.mrb[7].mxu1 }
 0x102   :  { %v244_v0 = vadd.f32 %v522_v60, %v626_v16  ;;  %432 = vst [vmem:[%s675_s3] sm:$0xff] %v431_v55   ;;  %471 = vst [vmem:[%s675_s3 + $0x20] sm:$0xff] %v451_v56   ;;  %v269_v3 = vmul.f32 0.2, %v209_v57  ;;  %vm253_vm8 = vcmp.gt.f32.partialorder %v209_v57, 0.0  ;;  %v277_v4 = vmul.f32 0.2, %v241_v58 }
 0x103   :  { %vm261_vm9 = vcmp.gt.f32.partialorder %v241_v58, 0.0  ;;  %vm251_vm10 = vcmp.gt.f32.partialorder %v201_v61, 0.0  ;;  %vm254_vm11 = vcmp.gt.f32.partialorder %v212_v63, 0.0  ;;  %v270_v5 = vmul.f32 0.2, %v212_v63 }
 0x104   :  { %v267_v6 = vmul.f32 0.2, %v201_v61  ;;  %vm259_vm12 = vcmp.gt.f32.partialorder %v233_v62, 0.0  ;;  %vm262_vm13 = vcmp.gt.f32.partialorder %v244_v0, 0.0  ;;  %v278_v7 = vmul.f32 0.2, %v244_v0 }
 0x105   :  { %v285_v8 = vsel %vm253_vm8, %v209_v57, %v269_v3  ;;  %v286_v9 = vsel %vm254_vm11, %v212_v63, %v270_v5  ;;  %v204_v10 = vadd.f32 %v626_v16, %v203_v1  ;;  %v236_v11 = vadd.f32 %v626_v16, %v235_v2 }
 0x106   :  { %v293_v12 = vsel %vm261_vm9, %v241_v58, %v277_v4  ;;  %v275_v13 = vmul.f32 0.2, %v233_v62  ;;  %v446_v14 = vpack.c.bf16 %v286_v9, %v285_v8  ;;  %v294_v15 = vsel %vm262_vm13, %v244_v0, %v278_v7 }
 0x107   :  { %v466_v17 = vpack.c.bf16 %v294_v15, %v293_v12  ;;  %vm252_vm14 = vcmp.gt.f32.partialorder %v204_v10, 0.0  ;;  %v268_v18 = vmul.f32 0.2, %v204_v10  ;;  %vm260_vm15 = vcmp.gt.f32.partialorder %v236_v11, 0.0 }
 0x108   :  { %470 = vst [vmem:[%s675_s3 + $0x18] sm:$0xff] %v446_v14   ;;  %v276_v19 = vmul.f32 0.2, %v236_v11  ;;  %v283_v20 = vsel %vm251_vm10, %v201_v61, %v267_v6  ;;  %v291_v21 = vsel %vm259_vm12, %v233_v62, %v275_v13 }
 0x109   :  { %474 = vst [vmem:[%s675_s3 + $0x38] sm:$0xff] %v466_v17   ;;  %v284_v16 = vsel %vm252_vm14, %v204_v10, %v268_v18 }
 0x10a   :  { %v441_v22 = vpack.c.bf16 %v284_v16, %v283_v20  ;;  %v292_v23 = vsel %vm260_vm15, %v236_v11, %v276_v19 }
 0x10b   :  { %v461_v24 = vpack.c.bf16 %v292_v23, %v291_v21 }
 0x10c   :  { %469 = vst [vmem:[%s675_s3 + $0x10] sm:$0xff] %v441_v22  }
 0x10d   :  { %473 = vst [vmem:[%s675_s3 + $0x30] sm:$0xff] %v461_v24  }

// kernel: regnet_forward.13
= control target key start
LH: loop header
LB: loop body
LE: loop exit
PB: predicated region body
PF: predicated region fallthrough
CT: control target
= control target key end

     0   :  { %s454_s1 = inlined_call_operand.vmem [shape: bf16[256,128], index: 1, kind: input, shape index: {}]   ;;  %s455_s0 = inlined_call_operand.vmem [shape: bf16[32,256], index: 0, kind: input, shape index: {}]   ;;  %s456_s2 = inlined_call_operand.vmem [shape: f32[1,128], index: 2, kind: input, shape index: {}]   ;;  %s457_s3 = inlined_call_operand.vmem [shape: bf16[32,128], index: 3, kind: output, shape index: {}]  }
   0x1   :  { %v343_v0 = vld [vmem:[%s454_s1 + $0x40] sm:$0xff]   ;;  %v345_v2 = vld [vmem:[%s454_s1 + $0x48] sm:$0xff]   ;;  %v347_v4 = vld [vmem:[%s454_s1 + $0x50] sm:$0xff]  }
   0x2   :  { %v344_v1 = vld [vmem:[%s454_s1] sm:$0xff]   ;;  %299 = vmatprep.subr.bf16.mxu0 %v343_v0  ;;  %327 = vmatprep.subr.bf16.mxu1 %v343_v0  ;;  %v346_v3 = vld [vmem:[%s454_s1 + $0x8] sm:$0xff]   ;;  %v348_v5 = vld [vmem:[%s454_s1 + $0x10] sm:$0xff]  }
   0x3   :  { %300 = vmatpush3.bf16.msra.mxu0 %v344_v1  ;;  %335 = vmatpush3.bf16.msra.mxu1 %v344_v1  ;;  %v349_v6 = vld [vmem:[%s454_s1 + $0x58] sm:$0xff]   ;;  %v351_v8 = vld [vmem:[%s454_s1 + $0x60] sm:$0xff]   ;;  %v353_v10 = vld [vmem:[%s454_s1 + $0x68] sm:$0xff]  }
   0x4   :  { %301 = vmatprep.subr.bf16.mxu0 %v345_v2  ;;  %328 = vmatprep.subr.bf16.mxu1 %v345_v2  ;;  %v350_v7 = vld [vmem:[%s454_s1 + $0x18] sm:$0xff]   ;;  %v352_v9 = vld [vmem:[%s454_s1 + $0x20] sm:$0xff]   ;;  %v354_v13 = vld [vmem:[%s454_s1 + $0x28] sm:$0xff]  }
   0x5   :  { %v361_v11 = vld [vmem:[%s455_s0 + $0x4] ss:$8 sps:$4 sm:$0xff]   ;;  %v364_v12 = vld [vmem:[%s455_s0 + $0x14] ss:$8 sps:$4 sm:$0xff]   ;;  %v359_v18 = vld [vmem:[%s455_s0] ss:$8 sps:$4 sm:$0xff]  }
   0x6   :  { %v355_v14 = vld [vmem:[%s454_s1 + $0x70] sm:$0xff]   ;;  %206 = vmatprep.mubr.bf16.mxu0 %v361_v11  ;;  %214 = vmatprep.mubr.bf16.mxu1 %v364_v12  ;;  %v357_v16 = vld [vmem:[%s454_s1 + $0x78] sm:$0xff]   ;;  %v259_v22 = vld [vmem:[%s456_s2] ss:$0 sm:$0xff] }
   0x7   :  { %302 = vmatpush3.bf16.msra.mxu0 %v346_v3  ;;  %336 = vmatpush3.bf16.msra.mxu1 %v346_v3  ;;  %v356_v15 = vld [vmem:[%s454_s1 + $0x30] sm:$0xff]   ;;  %v358_v17 = vld [vmem:[%s454_s1 + $0x38] sm:$0xff]  }
   0x8   :  { %303 = vmatprep.subr.bf16.mxu0 %v347_v4  ;;  %329 = vmatprep.subr.bf16.mxu1 %v347_v4  ;;  %v362_v19 = vld [vmem:[%s455_s0 + $0x10] ss:$8 sps:$4 sm:$0xff]  }
   0xb   :  { %304 = vmatpush3.bf16.msra.mxu0 %v348_v5  ;;  %337 = vmatpush3.bf16.msra.mxu1 %v348_v5 }
   0xc   :  { %305 = vmatprep.subr.bf16.mxu0 %v349_v6  ;;  %330 = vmatprep.subr.bf16.mxu1 %v349_v6 }
   0xf   :  { %306 = vmatpush3.bf16.msra.mxu0 %v350_v7  ;;  %338 = vmatpush3.bf16.msra.mxu1 %v350_v7 }
  0x10   :  { %307 = vmatprep.subr.bf16.mxu0 %v351_v8  ;;  %331 = vmatprep.subr.bf16.mxu1 %v351_v8 }
  0x13   :  { %308 = vmatpush3.bf16.msra.mxu0 %v352_v9  ;;  %339 = vmatpush3.bf16.msra.mxu1 %v352_v9 }
  0x14   :  { %309 = vmatprep.subr.bf16.mxu0 %v353_v10  ;;  %332 = vmatprep.subr.bf16.mxu1 %v353_v10 }
  0x17   :  { %310 = vmatpush3.bf16.msra.mxu0 %v354_v13  ;;  %340 = vmatpush3.bf16.msra.mxu1 %v354_v13 }
  0x18   :  { %311 = vmatprep.subr.bf16.mxu0 %v355_v14  ;;  %333 = vmatprep.subr.bf16.mxu1 %v355_v14 }
  0x1b   :  { %312 = vmatpush3.bf16.msra.mxu0 %v356_v15  ;;  %341 = vmatpush3.bf16.msra.mxu1 %v356_v15 }
  0x1c   :  { %313 = vmatprep.subr.bf16.mxu0 %v357_v16  ;;  %334 = vmatprep.subr.bf16.mxu1 %v357_v16 }
  0x1f   :  { %314 = vmatpush3.bf16.msra.mxu0 %v358_v17  ;;  %342 = vmatpush3.bf16.msra.mxu1 %v358_v17 }
  0x22   :  { %207 = vmatmul.mubr.bf16.vlgmr.msra.gmra.mrb[0].mxu0 %v359_v18  ;;  %215 = vmatmul.mubr.bf16.vlgmr.msra.gmra.mrb[0].mxu1 %v362_v19 }
  0xf5   :  { %v315_v20 = vpop.f32.mrb[0].mxu0  ;;  %v321_v21 = vpop.f32.mrb[0].mxu1 }
  0xf6   :  { %v316_v23 = vpop.f32.mrb[1].mxu0  ;;  %v322_v24 = vpop.f32.mrb[1].mxu1 }
  0xf7   :  { %v317_v25 = vadd.f32 %v316_v23, %v315_v20  ;;  %v323_v26 = vadd.f32 %v322_v24, %v321_v21  ;;  %v318_v27 = vpop.f32.mrb[2].mxu0  ;;  %v324_v28 = vpop.f32.mrb[2].mxu1 }
  0xf8   :  { %v319_v29 = vpop.f32.mrb[3].mxu0  ;;  %v325_v30 = vpop.f32.mrb[3].mxu1 }
  0xf9   :  { %v209_v31 = vadd.f32 %v317_v25, %v259_v22  ;;  %v217_v32 = vadd.f32 %v323_v26, %v259_v22  ;;  %v320_v33 = vadd.f32 %v319_v29, %v318_v27  ;;  %v326_v34 = vadd.f32 %v325_v30, %v324_v28 }
  0xfb   :  { %v227_v35 = vmul.f32 0.2, %v209_v31  ;;  %v229_v36 = vmul.f32 0.2, %v217_v32  ;;  %v212_v37 = vadd.f32 %v320_v33, %v259_v22  ;;  %v220_v38 = vadd.f32 %v326_v34, %v259_v22 }
  0xfc   :  { %vm223_vm0 = vcmp.gt.f32.partialorder %v209_v31, 0.0  ;;  %vm225_vm1 = vcmp.gt.f32.partialorder %v217_v32, 0.0 }
  0xfd   :  { %vm224_vm2 = vcmp.gt.f32.partialorder %v212_v37, 0.0  ;;  %v228_v39 = vmul.f32 0.2, %v212_v37  ;;  %vm226_vm3 = vcmp.gt.f32.partialorder %v220_v38, 0.0  ;;  %v230_v40 = vmul.f32 0.2, %v220_v38 }
  0xfe   :  { %v231_v41 = vsel %vm223_vm0, %v209_v31, %v227_v35  ;;  %v233_v42 = vsel %vm225_vm1, %v217_v32, %v229_v36 }
  0xff   :  { %v232_v43 = vsel %vm224_vm2, %v212_v37, %v228_v39  ;;  %v234_v44 = vsel %vm226_vm3, %v220_v38, %v230_v40 }
 0x100   :  { %v291_v45 = vpack.c.bf16 %v232_v43, %v231_v41  ;;  %v296_v46 = vpack.c.bf16 %v234_v44, %v233_v42 }
 0x102   :  { %292 = vst [vmem:[%s457_s3] sm:$0xff] %v291_v45   ;;  %298 = vst [vmem:[%s457_s3 + $0x8] sm:$0xff] %v296_v46  }

// kernel: regnet_forward.14
= control target key start
LH: loop header
LB: loop body
LE: loop exit
PB: predicated region body
PF: predicated region fallthrough
CT: control target
= control target key end

     0   :  { %v454_v1 = vmov 0.0   ;;  %vm455_vm0 = vmmov 0   ;;  %s563_s1 = inlined_call_operand.vmem [shape: bf16[384,128], index: 1, kind: input, shape index: {}]   ;;  %s564_s0 = inlined_call_operand.vmem [shape: bf16[16,384], index: 0, kind: input, shape index: {}]   ;;  %s565_s2 = inlined_call_operand.vmem [shape: f32[1,128], index: 2, kind: input, shape index: {}]   ;;  %s566_s3 = inlined_call_operand.vmem [shape: bf16[16,128], index: 3, kind: output, shape index: {}]  }
   0x1   :  { %v426_v0 = vld [vmem:[%s563_s1 + $0x40] sm:$0xff]   ;;  %404 = vmatprep.subr.bf16.mxu1 %v454_v1  ;;  %420 = vmatprep.mubr.msk.bf16.mxu1 %vm455_vm0, %v454_v1  ;;  %v429_v4 = vld [vmem:[%s563_s1 + $0x48] sm:$0xff]   ;;  %v432_v7 = vld [vmem:[%s563_s1 + $0x50] sm:$0xff]  }
   0x2   :  { %v427_v2 = vld [vmem:[%s563_s1] sm:$0xff]   ;;  %373 = vmatprep.subr.bf16.mxu0 %v426_v0  ;;  %v430_v5 = vld [vmem:[%s563_s1 + $0x8] sm:$0xff]   ;;  %v433_v8 = vld [vmem:[%s563_s1 + $0x10] sm:$0xff]  }
   0x3   :  { %v428_v3 = vld [vmem:[%s563_s1 + $0x80] sm:$0xff]   ;;  %374 = vmatpush3.bf16.msra.mxu0 %v427_v2  ;;  %v431_v6 = vld [vmem:[%s563_s1 + $0x88] sm:$0xff]   ;;  %v434_v9 = vld [vmem:[%s563_s1 + $0x90] sm:$0xff]  }
   0x4   :  { %405 = vmatpush3.bf16.msra.mxu1 %v428_v3  ;;  %375 = vmatprep.subr.bf16.mxu0 %v429_v4  ;;  %v435_v10 = vld [vmem:[%s563_s1 + $0x58] sm:$0xff]   ;;  %v438_v13 = vld [vmem:[%s563_s1 + $0x60] sm:$0xff]   ;;  %v441_v16 = vld [vmem:[%s563_s1 + $0x68] sm:$0xff]  }
   0x5   :  { %406 = vmatprep.subr.bf16.mxu1 %v454_v1  ;;  %v436_v11 = vld [vmem:[%s563_s1 + $0x18] sm:$0xff]   ;;  %v439_v14 = vld [vmem:[%s563_s1 + $0x20] sm:$0xff]   ;;  %v442_v17 = vld [vmem:[%s563_s1 + $0x28] sm:$0xff]  }
   0x6   :  { %v437_v12 = vld [vmem:[%s563_s1 + $0x98] sm:$0xff]   ;;  %v440_v15 = vld [vmem:[%s563_s1 + $0xa0] sm:$0xff]   ;;  %v443_v18 = vld [vmem:[%s563_s1 + $0xa8] sm:$0xff]  }
   0x7   :  { %376 = vmatpush3.bf16.msra.mxu0 %v430_v5  ;;  %v444_v19 = vld [vmem:[%s563_s1 + $0x70] sm:$0xff]   ;;  %v447_v22 = vld [vmem:[%s563_s1 + $0x78] sm:$0xff]   ;;  %v449_v26 = vld [vmem:[%s564_s0] ss:$12 sps:$4 sm:$0xff]  }
   0x8   :  { %407 = vmatpush3.bf16.msra.mxu1 %v431_v6  ;;  %377 = vmatprep.subr.bf16.mxu0 %v432_v7  ;;  %v445_v20 = vld [vmem:[%s563_s1 + $0x30] sm:$0xff]   ;;  %v448_v24 = vld [vmem:[%s563_s1 + $0x38] sm:$0xff]   ;;  %v336_v30 = vld [vmem:[%s565_s2] ss:$0 sm:$0xff] }
   0x9   :  { %408 = vmatprep.subr.bf16.mxu1 %v454_v1  ;;  %v446_v21 = vld [vmem:[%s563_s1 + $0xb0] sm:$0xff]   ;;  %v452_v25 = vld [vmem:[%s563_s1 + $0xb8] sm:$0xff]  }
   0xa   :  { %v451_v23 = vld [vmem:[%s564_s0 + $0x4] ss:$12 sps:$4 sm:$0xff]   ;;  %v453_v27 = vld [vmem:[%s564_s0 + $0x8] ss:$12 sps:$4 sm:$0xff]  }
   0xb   :  { %378 = vmatpush3.bf16.msra.mxu0 %v433_v8  ;;  %266 = vmatprep.mubr.bf16.mxu0 %v451_v23 }
   0xc   :  { %409 = vmatpush3.bf16.msra.mxu1 %v434_v9  ;;  %379 = vmatprep.subr.bf16.mxu0 %v435_v10 }
   0xd   :  { %410 = vmatprep.subr.bf16.mxu1 %v454_v1 }
   0xf   :  { %380 = vmatpush3.bf16.msra.mxu0 %v436_v11 }
  0x10   :  { %411 = vmatpush3.bf16.msra.mxu1 %v437_v12  ;;  %381 = vmatprep.subr.bf16.mxu0 %v438_v13 }
  0x11   :  { %412 = vmatprep.subr.bf16.mxu1 %v454_v1 }
  0x13   :  { %382 = vmatpush3.bf16.msra.mxu0 %v439_v14 }
  0x14   :  { %413 = vmatpush3.bf16.msra.mxu1 %v440_v15  ;;  %383 = vmatprep.subr.bf16.mxu0 %v441_v16 }
  0x15   :  { %414 = vmatprep.subr.bf16.mxu1 %v454_v1 }
  0x17   :  { %384 = vmatpush3.bf16.msra.mxu0 %v442_v17 }
  0x18   :  { %415 = vmatpush3.bf16.msra.mxu1 %v443_v18  ;;  %385 = vmatprep.subr.bf16.mxu0 %v444_v19 }
  0x19   :  { %416 = vmatprep.subr.bf16.mxu1 %v454_v1 }
  0x1b   :  { %386 = vmatpush3.bf16.msra.mxu0 %v445_v20 }
  0x1c   :  { %417 = vmatpush3.bf16.msra.mxu1 %v446_v21  ;;  %387 = vmatprep.subr.bf16.mxu0 %v447_v22 }
  0x1d   :  { %418 = vmatprep.subr.bf16.mxu1 %v454_v1 }
  0x1f   :  { %388 = vmatpush3.bf16.msra.mxu0 %v448_v24 }
  0x20   :  { %419 = vmatpush3.bf16.msra.mxu1 %v452_v25 }
  0x22   :  { %267 = vmatmul.mubr.bf16.vlgmr.msra.gmra.mrb[0].mxu0 %v449_v26 }
  0x23   :  { %421 = vmatmul.mubr.bf16.vlgmr.msra.gmra.mrb[0].mxu1 %v453_v27 }
  0xf5   :  { %v389_v28 = vpop.f32.mrb[0].mxu0 }
  0xf6   :  { %v390_v29 = vpop.f32.mrb[1].mxu0  ;;  %v309_v31 = vpop.f32.mrb[0].mxu1 }
  0xf7   :  { %v391_v32 = vadd.f32 %v390_v29, %v389_v28  ;;  %v392_v33 = vpop.f32.mrb[2].mxu0  ;;  %v422_v34 = vpop.f32.mrb[1].mxu1 }
  0xf8   :  { %v393_v35 = vpop.f32.mrb[3].mxu0  ;;  %v312_v36 = vpop.f32.mrb[2].mxu1 }
  0xf9   :  { %v269_v37 = vadd.f32 %v391_v32, %v336_v30  ;;  %v394_v38 = vadd.f32 %v393_v35, %v392_v33  ;;  %v423_v39 = vpop.f32.mrb[3].mxu1 }
  0xfb   :  { %v310_v40 = vadd.f32 %v309_v31, %v269_v37  ;;  %v272_v41 = vadd.f32 %v394_v38, %v336_v30 }
  0xfd   :  { %v318_v42 = vmul.f32 0.2, %v310_v40  ;;  %v313_v43 = vadd.f32 %v312_v36, %v272_v41  ;;  %vm316_vm1 = vcmp.gt.f32.partialorder %v310_v40, 0.0 }
  0xff   :  { %vm317_vm2 = vcmp.gt.f32.partialorder %v313_v43, 0.0  ;;  %v319_v44 = vmul.f32 0.2, %v313_v43  ;;  %v320_v45 = vsel %vm316_vm1, %v310_v40, %v318_v42 }
 0x101   :  { %v321_v46 = vsel %vm317_vm2, %v313_v43, %v319_v44 }
 0x102   :  { %v371_v47 = vpack.c.bf16 %v321_v46, %v320_v45 }
 0x104   :  { %372 = vst [vmem:[%s566_s3] sm:$0xff] %v371_v47  }

// kernel: regnet_forward.17
= control target key start
LH: loop header
LB: loop body
LE: loop exit
PB: predicated region body
PF: predicated region fallthrough
CT: control target
= control target key end

     0   :  { %v694_v33 = vmov 0.0   ;;  %vm695_vm0 = vmmov 0   ;;  %s857_s1 = inlined_call_operand.vmem [shape: bf16[640,128], index: 1, kind: input, shape index: {}]   ;;  %s858_s0 = inlined_call_operand.vmem [shape: bf16[16,640], index: 0, kind: input, shape index: {}]   ;;  %s859_s2 = inlined_call_operand.vmem [shape: f32[1,128], index: 2, kind: input, shape index: {}]   ;;  %s860_s3 = inlined_call_operand.vmem [shape: bf16[16,128], index: 3, kind: output, shape index: {}]  }
   0x1   :  { %v647_v0 = vld [vmem:[%s857_s1 + $0x40] sm:$0xff]   ;;  %v651_v4 = vld [vmem:[%s857_s1 + $0x48] sm:$0xff]   ;;  %v655_v8 = vld [vmem:[%s857_s1 + $0x50] sm:$0xff]  }
   0x2   :  { %v648_v1 = vld [vmem:[%s857_s1] sm:$0xff]   ;;  %572 = vmatprep.subr.bf16.mxu0 %v647_v0  ;;  %v652_v5 = vld [vmem:[%s857_s1 + $0x8] sm:$0xff]   ;;  %v656_v9 = vld [vmem:[%s857_s1 + $0x10] sm:$0xff]  }
   0x3   :  { %v649_v2 = vld [vmem:[%s857_s1 + $0xc0] sm:$0xff]   ;;  %573 = vmatpush3.bf16.msra.mxu0 %v648_v1  ;;  %v653_v6 = vld [vmem:[%s857_s1 + $0xc8] sm:$0xff]   ;;  %v657_v10 = vld [vmem:[%s857_s1 + $0xd0] sm:$0xff]  }
   0x4   :  { %v650_v3 = vld [vmem:[%s857_s1 + $0x80] sm:$0xff]   ;;  %594 = vmatprep.subr.bf16.mxu1 %v649_v2  ;;  %574 = vmatprep.subr.bf16.mxu0 %v651_v4  ;;  %v654_v7 = vld [vmem:[%s857_s1 + $0x88] sm:$0xff]   ;;  %v658_v11 = vld [vmem:[%s857_s1 + $0x90] sm:$0xff]  }
   0x5   :  { %595 = vmatpush3.bf16.msra.mxu1 %v650_v3  ;;  %v659_v12 = vld [vmem:[%s857_s1 + $0x58] sm:$0xff]   ;;  %v663_v16 = vld [vmem:[%s857_s1 + $0x60] sm:$0xff]   ;;  %v667_v20 = vld [vmem:[%s857_s1 + $0x68] sm:$0xff]  }
   0x6   :  { %596 = vmatprep.subr.bf16.mxu1 %v653_v6  ;;  %v660_v13 = vld [vmem:[%s857_s1 + $0x18] sm:$0xff]   ;;  %v664_v17 = vld [vmem:[%s857_s1 + $0x20] sm:$0xff]   ;;  %v668_v21 = vld [vmem:[%s857_s1 + $0x28] sm:$0xff]  }
   0x7   :  { %575 = vmatpush3.bf16.msra.mxu0 %v652_v5  ;;  %v661_v14 = vld [vmem:[%s857_s1 + $0xd8] sm:$0xff]   ;;  %v665_v18 = vld [vmem:[%s857_s1 + $0xe0] sm:$0xff]   ;;  %v669_v22 = vld [vmem:[%s857_s1 + $0xe8] sm:$0xff]  }
   0x8   :  { %576 = vmatprep.subr.bf16.mxu0 %v655_v8  ;;  %v662_v15 = vld [vmem:[%s857_s1 + $0x98] sm:$0xff]   ;;  %v666_v19 = vld [vmem:[%s857_s1 + $0xa0] sm:$0xff]   ;;  %v670_v23 = vld [vmem:[%s857_s1 + $0xa8] sm:$0xff]  }
   0x9   :  { %597 = vmatpush3.bf16.msra.mxu1 %v654_v7  ;;  %v671_v24 = vld [vmem:[%s857_s1 + $0x70] sm:$0xff]   ;;  %v675_v28 = vld [vmem:[%s857_s1 + $0x78] sm:$0xff]   ;;  %v684_v36 = vld [vmem:[%s858_s0 + $0xc] ss:$20 sps:$4 sm:$0xff]  }
   0xa   :  { %598 = vmatprep.subr.bf16.mxu1 %v657_v10  ;;  %v672_v25 = vld [vmem:[%s857_s1 + $0x30] sm:$0xff]   ;;  %v676_v29 = vld [vmem:[%s857_s1 + $0x38] sm:$0xff]   ;;  %v685_v37 = vld [vmem:[%s857_s1 + $0x100] sm:$0xff]   ;;  %447 = vmatprep.mubr.bf16.mxu1 %v684_v36 }
   0xb   :  { %577 = vmatpush3.bf16.msra.mxu0 %v656_v9  ;;  %v673_v26 = vld [vmem:[%s857_s1 + $0xf0] sm:$0xff]   ;;  %v677_v30 = vld [vmem:[%s857_s1 + $0xf8] sm:$0xff]   ;;  %v686_v38 = vld [vmem:[%s857_s1 + $0x108] sm:$0xff]  }
   0xc   :  { %578 = vmatprep.subr.bf16.mxu0 %v659_v12  ;;  %v674_v27 = vld [vmem:[%s857_s1 + $0xb0] sm:$0xff]   ;;  %v680_v32 = vld [vmem:[%s858_s0 + $0x4] ss:$20 sps:$4 sm:$0xff]   ;;  %v682_v35 = vld [vmem:[%s858_s0 + $0x8] ss:$20 sps:$4 sm:$0xff]  }
   0xd   :  { %599 = vmatpush3.bf16.msra.mxu1 %v658_v11  ;;  %v678_v31 = vld [vmem:[%s858_s0] ss:$20 sps:$4 sm:$0xff]   ;;  %v681_v34 = vld [vmem:[%s857_s1 + $0xb8] sm:$0xff]   ;;  %406 = vmatprep.mubr.bf16.mxu0 %v680_v32  ;;  %v690_v42 = vld [vmem:[%s857_s1 + $0x128] sm:$0xff]  }
   0xe   :  { %600 = vmatprep.subr.bf16.mxu1 %v661_v14  ;;  %v687_v39 = vld [vmem:[%s857_s1 + $0x110] sm:$0xff]   ;;  %v688_v40 = vld [vmem:[%s857_s1 + $0x118] sm:$0xff]   ;;  %v689_v41 = vld [vmem:[%s857_s1 + $0x120] sm:$0xff]  }
   0xf   :  { %579 = vmatpush3.bf16.msra.mxu0 %v660_v13  ;;  %v691_v43 = vld [vmem:[%s857_s1 + $0x130] sm:$0xff]   ;;  %v692_v44 = vld [vmem:[%s857_s1 + $0x138] sm:$0xff]   ;;  %v517_v47 = vld [vmem:[%s859_s2] ss:$0 sm:$0xff] }
  0x10   :  { %580 = vmatprep.subr.bf16.mxu0 %v663_v16  ;;  %v693_v45 = vld [vmem:[%s858_s0 + $0x10] ss:$20 sps:$4 sm:$0xff]  }
  0x11   :  { %601 = vmatpush3.bf16.msra.mxu1 %v662_v15 }
  0x12   :  { %602 = vmatprep.subr.bf16.mxu1 %v665_v18 }
  0x13   :  { %581 = vmatpush3.bf16.msra.mxu0 %v664_v17 }
  0x14   :  { %582 = vmatprep.subr.bf16.mxu0 %v667_v20 }
  0x15   :  { %603 = vmatpush3.bf16.msra.mxu1 %v666_v19 }
  0x16   :  { %604 = vmatprep.subr.bf16.mxu1 %v669_v22 }
  0x17   :  { %583 = vmatpush3.bf16.msra.mxu0 %v668_v21 }
  0x18   :  { %584 = vmatprep.subr.bf16.mxu0 %v671_v24 }
  0x19   :  { %605 = vmatpush3.bf16.msra.mxu1 %v670_v23 }
  0x1a   :  { %606 = vmatprep.subr.bf16.mxu1 %v673_v26 }
  0x1b   :  { %585 = vmatpush3.bf16.msra.mxu0 %v672_v25 }
  0x1c   :  { %586 = vmatprep.subr.bf16.mxu0 %v675_v28 }
  0x1d   :  { %607 = vmatpush3.bf16.msra.mxu1 %v674_v27 }
  0x1e   :  { %608 = vmatprep.subr.bf16.mxu1 %v677_v30 }
  0x1f   :  { %587 = vmatpush3.bf16.msra.mxu0 %v676_v29 }
  0x20   :  { %625 = vmatprep.subr.bf16.mxu0 %v694_v33 }
  0x21   :  { %609 = vmatpush3.bf16.msra.mxu1 %v681_v34 }
  0x22   :  { %407 = vmatmul.mubr.bf16.vlgmr.msra.gmra.mrb[0].mxu0 %v678_v31 }
  0x23   :  { %641 = vmatprep.mubr.msk.bf16.mxu0 %vm695_vm0, %v694_v33  ;;  %626 = vmatpush3.bf16.msra.mxu0 %v685_v37 }
  0x24   :  { %448 = vmatmul.mubr.bf16.vlgmr.msra.gmra.mrb[0].mxu1 %v682_v35  ;;  %627 = vmatprep.subr.bf16.mxu0 %v694_v33 }
  0x27   :  { %628 = vmatpush3.bf16.msra.mxu0 %v686_v38 }
  0x28   :  { %629 = vmatprep.subr.bf16.mxu0 %v694_v33 }
  0x2b   :  { %630 = vmatpush3.bf16.msra.mxu0 %v687_v39 }
  0x2c   :  { %631 = vmatprep.subr.bf16.mxu0 %v694_v33 }
  0x2f   :  { %632 = vmatpush3.bf16.msra.mxu0 %v688_v40 }
  0x30   :  { %633 = vmatprep.subr.bf16.mxu0 %v694_v33 }
  0x33   :  { %634 = vmatpush3.bf16.msra.mxu0 %v689_v41 }
  0x34   :  { %635 = vmatprep.subr.bf16.mxu0 %v694_v33 }
  0x37   :  { %636 = vmatpush3.bf16.msra.mxu0 %v690_v42 }
  0x38   :  { %637 = vmatprep.subr.bf16.mxu0 %v694_v33 }
  0x3b   :  { %638 = vmatpush3.bf16.msra.mxu0 %v691_v43 }
  0x3c   :  { %639 = vmatprep.subr.bf16.mxu0 %v694_v33 }
  0x3f   :  { %640 = vmatpush3.bf16.msra.mxu0 %v692_v44 }
  0x42   :  { %642 = vmatmul.mubr.bf16.vlgmr.msra.gmra.mrb[4].mxu0 %v693_v45 }
  0xf5   :  { %v588_v46 = vpop.f32.mrb[0].mxu0 }
  0xf6   :  { %v589_v48 = vpop.f32.mrb[1].mxu0 }
  0xf7   :  { %v590_v49 = vadd.f32 %v589_v48, %v588_v46  ;;  %v591_v50 = vpop.f32.mrb[2].mxu0  ;;  %v610_v51 = vpop.f32.mrb[0].mxu1 }
  0xf8   :  { %v592_v52 = vpop.f32.mrb[3].mxu0  ;;  %v611_v55 = vpop.f32.mrb[1].mxu1 }
  0xf9   :  { %v409_v53 = vadd.f32 %v590_v49, %v517_v47  ;;  %v593_v54 = vadd.f32 %v592_v52, %v591_v50  ;;  %v612_v56 = vadd.f32 %v611_v55, %v610_v51  ;;  %v613_v57 = vpop.f32.mrb[2].mxu1 }
  0xfa   :  { %v614_v59 = vpop.f32.mrb[3].mxu1 }
  0xfb   :  { %v412_v58 = vadd.f32 %v593_v54, %v517_v47  ;;  %v615_v60 = vadd.f32 %v614_v59, %v613_v57  ;;  %v450_v61 = vadd.f32 %v612_v56, %v409_v53 }
  0xfd   :  { %v453_v62 = vadd.f32 %v615_v60, %v412_v58 }
 0x115   :  { %v490_v63 = vpop.f32.mrb[4].mxu0 }
 0x116   :  { %v491_v0 = vadd.f32 %v490_v63, %v450_v61  ;;  %v643_v1 = vpop.f32.mrb[5].mxu0 }
 0x117   :  { %v493_v2 = vpop.f32.mrb[6].mxu0 }
 0x118   :  { %v499_v3 = vmul.f32 0.2, %v491_v0  ;;  %v494_v4 = vadd.f32 %v493_v2, %v453_v62  ;;  %v644_v5 = vpop.f32.mrb[7].mxu0  ;;  %vm497_vm1 = vcmp.gt.f32.partialorder %v491_v0, 0.0 }
 0x11a   :  { %vm498_vm2 = vcmp.gt.f32.partialorder %v494_v4, 0.0  ;;  %v500_v6 = vmul.f32 0.2, %v494_v4  ;;  %v501_v7 = vsel %vm497_vm1, %v491_v0, %v499_v3 }
 0x11c   :  { %v502_v8 = vsel %vm498_vm2, %v494_v4, %v500_v6 }
 0x11d   :  { %v570_v9 = vpack.c.bf16 %v502_v8, %v501_v7 }
 0x11f   :  { %571 = vst [vmem:[%s860_s3] sm:$0xff] %v570_v9  }

// kernel: regnet_forward.18
= control target key start
LH: loop header
LB: loop body
LE: loop exit
PB: predicated region body
PF: predicated region fallthrough
CT: control target
= control target key end

     0   :  { %s978_s1 = inlined_call_operand.vmem [shape: bf16[640,128], index: 1, kind: input, shape index: {}]   ;;  %s979_s0 = inlined_call_operand.vmem [shape: bf16[32,640], index: 0, kind: input, shape index: {}]   ;;  %s980_s2 = inlined_call_operand.vmem [shape: f32[1,128], index: 2, kind: input, shape index: {}]   ;;  %s981_s3 = inlined_call_operand.vmem [shape: bf16[32,128], index: 3, kind: output, shape index: {}]  }
   0x1   :  { %v745_v0 = vld [vmem:[%s978_s1 + $0x40] sm:$0xff]   ;;  %v749_v4 = vld [vmem:[%s978_s1 + $0x48] sm:$0xff]   ;;  %v753_v8 = vld [vmem:[%s978_s1 + $0x50] sm:$0xff]  }
   0x2   :  { %v746_v1 = vld [vmem:[%s978_s1] sm:$0xff]   ;;  %659 = vmatprep.subr.bf16.mxu0 %v745_v0  ;;  %v750_v5 = vld [vmem:[%s978_s1 + $0x8] sm:$0xff]   ;;  %v754_v9 = vld [vmem:[%s978_s1 + $0x10] sm:$0xff]  }
   0x3   :  { %v747_v2 = vld [vmem:[%s978_s1 + $0xc0] sm:$0xff]   ;;  %660 = vmatpush3.bf16.msra.mxu0 %v746_v1  ;;  %v751_v6 = vld [vmem:[%s978_s1 + $0xc8] sm:$0xff]   ;;  %v755_v10 = vld [vmem:[%s978_s1 + $0xd0] sm:$0xff]  }
   0x4   :  { %v748_v3 = vld [vmem:[%s978_s1 + $0x80] sm:$0xff]   ;;  %687 = vmatprep.subr.bf16.mxu1 %v747_v2  ;;  %661 = vmatprep.subr.bf16.mxu0 %v749_v4  ;;  %v752_v7 = vld [vmem:[%s978_s1 + $0x88] sm:$0xff]   ;;  %v756_v11 = vld [vmem:[%s978_s1 + $0x90] sm:$0xff]  }
   0x5   :  { %688 = vmatpush3.bf16.msra.mxu1 %v748_v3  ;;  %v757_v12 = vld [vmem:[%s978_s1 + $0x58] sm:$0xff]   ;;  %v761_v16 = vld [vmem:[%s978_s1 + $0x60] sm:$0xff]   ;;  %v765_v20 = vld [vmem:[%s978_s1 + $0x68] sm:$0xff]  }
   0x6   :  { %689 = vmatprep.subr.bf16.mxu1 %v751_v6  ;;  %v758_v13 = vld [vmem:[%s978_s1 + $0x18] sm:$0xff]   ;;  %v762_v17 = vld [vmem:[%s978_s1 + $0x20] sm:$0xff]   ;;  %v766_v21 = vld [vmem:[%s978_s1 + $0x28] sm:$0xff]  }
   0x7   :  { %662 = vmatpush3.bf16.msra.mxu0 %v750_v5  ;;  %v759_v14 = vld [vmem:[%s978_s1 + $0xd8] sm:$0xff]   ;;  %v763_v18 = vld [vmem:[%s978_s1 + $0xe0] sm:$0xff]   ;;  %v767_v22 = vld [vmem:[%s978_s1 + $0xe8] sm:$0xff]  }
   0x8   :  { %663 = vmatprep.subr.bf16.mxu0 %v753_v8  ;;  %v760_v15 = vld [vmem:[%s978_s1 + $0x98] sm:$0xff]   ;;  %v764_v19 = vld [vmem:[%s978_s1 + $0xa0] sm:$0xff]   ;;  %v768_v23 = vld [vmem:[%s978_s1 + $0xa8] sm:$0xff]  }
   0x9   :  { %690 = vmatpush3.bf16.msra.mxu1 %v752_v7  ;;  %v769_v24 = vld [vmem:[%s978_s1 + $0x70] sm:$0xff]   ;;  %v773_v28 = vld [vmem:[%s978_s1 + $0x78] sm:$0xff]   ;;  %v780_v34 = vld [vmem:[%s978_s1 + $0x100] sm:$0xff]  }
   0xa   :  { %691 = vmatprep.subr.bf16.mxu1 %v755_v10  ;;  %v770_v25 = vld [vmem:[%s978_s1 + $0x30] sm:$0xff]   ;;  %v774_v29 = vld [vmem:[%s978_s1 + $0x38] sm:$0xff]   ;;  %v783_v36 = vld [vmem:[%s979_s0 + $0xc] ss:$20 sps:$4 sm:$0xff]  }
   0xb   :  { %664 = vmatpush3.bf16.msra.mxu0 %v754_v9  ;;  %v771_v26 = vld [vmem:[%s978_s1 + $0xf0] sm:$0xff]   ;;  %v775_v30 = vld [vmem:[%s978_s1 + $0xf8] sm:$0xff]   ;;  %v784_v37 = vld [vmem:[%s978_s1 + $0x108] sm:$0xff]   ;;  %487 = vmatprep.mubr.bf16.mxu1 %v783_v36 }
   0xc   :  { %665 = vmatprep.subr.bf16.mxu0 %v757_v12  ;;  %v772_v27 = vld [vmem:[%s978_s1 + $0xb0] sm:$0xff]   ;;  %v778_v32 = vld [vmem:[%s979_s0 + $0x4] ss:$20 sps:$4 sm:$0xff]   ;;  %v781_v35 = vld [vmem:[%s979_s0 + $0x8] ss:$20 sps:$4 sm:$0xff]  }
   0xd   :  { %692 = vmatpush3.bf16.msra.mxu1 %v756_v11  ;;  %v776_v31 = vld [vmem:[%s979_s0] ss:$20 sps:$4 sm:$0xff]   ;;  %v779_v33 = vld [vmem:[%s978_s1 + $0xb8] sm:$0xff]   ;;  %438 = vmatprep.mubr.bf16.mxu0 %v778_v32  ;;  %v794_v43 = vld [vmem:[%s979_s0 + $0x30] ss:$20 sps:$4 sm:$0xff]  }
   0xe   :  { %693 = vmatprep.subr.bf16.mxu1 %v759_v14  ;;  %v785_v38 = vld [vmem:[%s978_s1 + $0x110] sm:$0xff]   ;;  %v788_v39 = vld [vmem:[%s979_s0 + $0x2c] ss:$20 sps:$4 sm:$0xff]   ;;  %v786_v40 = vld [vmem:[%s978_s1 + $0x118] sm:$0xff]  }
   0xf   :  { %666 = vmatpush3.bf16.msra.mxu0 %v758_v13  ;;  %v791_v41 = vld [vmem:[%s979_s0 + $0x28] ss:$20 sps:$4 sm:$0xff]   ;;  %v787_v44 = vld [vmem:[%s978_s1 + $0x120] sm:$0xff]   ;;  %v795_v47 = vld [vmem:[%s978_s1 + $0x130] sm:$0xff]  }
  0x10   :  { %667 = vmatprep.subr.bf16.mxu0 %v761_v16  ;;  %v792_v42 = vld [vmem:[%s979_s0 + $0x34] ss:$20 sps:$4 sm:$0xff]   ;;  %v797_v45 = vld [vmem:[%s979_s0 + $0x10] ss:$20 sps:$4 sm:$0xff]   ;;  %v796_v48 = vld [vmem:[%s978_s1 + $0x138] sm:$0xff]  }
  0x11   :  { %694 = vmatpush3.bf16.msra.mxu1 %v760_v15  ;;  %v790_v46 = vld [vmem:[%s978_s1 + $0x128] sm:$0xff]   ;;  %v589_v51 = vld [vmem:[%s980_s2] ss:$0 sm:$0xff] }
  0x12   :  { %695 = vmatprep.subr.bf16.mxu1 %v763_v18  ;;  %v798_v49 = vld [vmem:[%s979_s0 + $0x38] ss:$20 sps:$4 sm:$0xff]  }
  0x13   :  { %668 = vmatpush3.bf16.msra.mxu0 %v762_v17 }
  0x14   :  { %669 = vmatprep.subr.bf16.mxu0 %v765_v20 }
  0x15   :  { %696 = vmatpush3.bf16.msra.mxu1 %v764_v19 }
  0x16   :  { %697 = vmatprep.subr.bf16.mxu1 %v767_v22 }
  0x17   :  { %670 = vmatpush3.bf16.msra.mxu0 %v766_v21 }
  0x18   :  { %671 = vmatprep.subr.bf16.mxu0 %v769_v24 }
  0x19   :  { %698 = vmatpush3.bf16.msra.mxu1 %v768_v23 }
  0x1a   :  { %699 = vmatprep.subr.bf16.mxu1 %v771_v26 }
  0x1b   :  { %672 = vmatpush3.bf16.msra.mxu0 %v770_v25 }
  0x1c   :  { %673 = vmatprep.subr.bf16.mxu0 %v773_v28 }
  0x1d   :  { %700 = vmatpush3.bf16.msra.mxu1 %v772_v27 }
  0x1e   :  { %701 = vmatprep.subr.bf16.mxu1 %v775_v30 }
  0x1f   :  { %674 = vmatpush3.bf16.msra.mxu0 %v774_v29 }
  0x20   :  { %725 = vmatprep.subr.bf16.mxu0 %v780_v34 }
  0x21   :  { %702 = vmatpush3.bf16.msra.mxu1 %v779_v33 }
  0x22   :  { %439 = vmatmul.mubr.bf16.vlgmr.msra.gmra.mrb[0].mxu0 %v776_v31 }
  0x23   :  { %726 = vmatpush3.bf16.msra.mxu0 %v780_v34  ;;  %446 = vmatprep.mubr.bf16.mxu0 %v788_v39 }
  0x24   :  { %488 = vmatmul.mubr.bf16.vlgmr.msra.gmra.mrb[0].mxu1 %v781_v35  ;;  %727 = vmatprep.subr.bf16.mxu0 %v784_v37 }
  0x25   :  { %495 = vmatprep.mubr.bf16.mxu1 %v792_v42 }
  0x27   :  { %728 = vmatpush3.bf16.msra.mxu0 %v784_v37 }
  0x28   :  { %729 = vmatprep.subr.bf16.mxu0 %v785_v38 }
  0x2a   :  { %447 = vmatmul.mubr.bf16.gmra.mrb[4].mxu0 %v791_v41 }
  0x2b   :  { %730 = vmatpush3.bf16.msra.mxu0 %v785_v38  ;;  %741 = vmatprep.mubr.bf16.mxu0 %v797_v45 }
  0x2c   :  { %731 = vmatprep.subr.bf16.mxu0 %v786_v40  ;;  %496 = vmatmul.mubr.bf16.gmra.mrb[4].mxu1 %v794_v43 }
  0x2f   :  { %732 = vmatpush3.bf16.msra.mxu0 %v786_v40 }
  0x30   :  { %733 = vmatprep.subr.bf16.mxu0 %v787_v44 }
  0x33   :  { %734 = vmatpush3.bf16.msra.mxu0 %v787_v44 }
  0x34   :  { %735 = vmatprep.subr.bf16.mxu0 %v790_v46 }
  0x37   :  { %736 = vmatpush3.bf16.msra.mxu0 %v790_v46 }
  0x38   :  { %737 = vmatprep.subr.bf16.mxu0 %v795_v47 }
  0x3b   :  { %738 = vmatpush3.bf16.msra.mxu0 %v795_v47 }
  0x3c   :  { %739 = vmatprep.subr.bf16.mxu0 %v796_v48 }
  0x3f   :  { %740 = vmatpush3.bf16.msra.mxu0 %v796_v48 }
  0x42   :  { %742 = vmatmul.mubr.bf16.vlgmr.msra.gmra.mrb[8].mxu0 %v798_v49 }
  0xf5   :  { %v675_v50 = vpop.f32.mrb[0].mxu0 }
  0xf6   :  { %v676_v52 = vpop.f32.mrb[1].mxu0 }
  0xf7   :  { %v677_v53 = vadd.f32 %v676_v52, %v675_v50  ;;  %v678_v54 = vpop.f32.mrb[2].mxu0  ;;  %v703_v55 = vpop.f32.mrb[0].mxu1 }
  0xf8   :  { %v679_v56 = vpop.f32.mrb[3].mxu0  ;;  %v704_v59 = vpop.f32.mrb[1].mxu1 }
  0xf9   :  { %v441_v57 = vadd.f32 %v677_v53, %v589_v51  ;;  %v680_v58 = vadd.f32 %v679_v56, %v678_v54  ;;  %v705_v60 = vadd.f32 %v704_v59, %v703_v55  ;;  %v706_v61 = vpop.f32.mrb[2].mxu1 }
  0xfa   :  { %v707_v63 = vpop.f32.mrb[3].mxu1 }
  0xfb   :  { %v444_v62 = vadd.f32 %v680_v58, %v589_v51  ;;  %v708_v0 = vadd.f32 %v707_v63, %v706_v61  ;;  %v490_v1 = vadd.f32 %v705_v60, %v441_v57 }
  0xfd   :  { %v681_v2 = vpop.f32.mrb[4].mxu0  ;;  %v493_v4 = vadd.f32 %v708_v0, %v444_v62 }
  0xfe   :  { %v682_v3 = vpop.f32.mrb[5].mxu0 }
  0xff   :  { %v683_v5 = vadd.f32 %v682_v3, %v681_v2  ;;  %v684_v6 = vpop.f32.mrb[6].mxu0  ;;  %v709_v7 = vpop.f32.mrb[4].mxu1 }
 0x100   :  { %v685_v8 = vpop.f32.mrb[7].mxu0  ;;  %v710_v11 = vpop.f32.mrb[5].mxu1 }
 0x101   :  { %v449_v9 = vadd.f32 %v683_v5, %v589_v51  ;;  %v686_v10 = vadd.f32 %v685_v8, %v684_v6  ;;  %v711_v12 = vadd.f32 %v710_v11, %v709_v7  ;;  %v712_v13 = vpop.f32.mrb[6].mxu1 }
 0x102   :  { %v713_v15 = vpop.f32.mrb[7].mxu1 }
 0x103   :  { %v452_v14 = vadd.f32 %v686_v10, %v589_v51  ;;  %v714_v16 = vadd.f32 %v713_v15, %v712_v13  ;;  %v498_v17 = vadd.f32 %v711_v12, %v449_v9 }
 0x105   :  { %v501_v18 = vadd.f32 %v714_v16, %v452_v14 }
 0x115   :  { %v743_v19 = vpop.f32.mrb[8].mxu0 }
 0x116   :  { %v547_v20 = vadd.f32 %v743_v19, %v498_v17  ;;  %v538_v21 = vpop.f32.mrb[9].mxu0 }
 0x117   :  { %v539_v22 = vadd.f32 %v538_v21, %v490_v1  ;;  %v744_v23 = vpop.f32.mrb[10].mxu0 }
 0x118   :  { %v559_v24 = vmul.f32 0.2, %v547_v20  ;;  %v550_v25 = vadd.f32 %v744_v23, %v501_v18  ;;  %v541_v26 = vpop.f32.mrb[11].mxu0  ;;  %vm555_vm0 = vcmp.gt.f32.partialorder %v547_v20, 0.0 }
 0x119   :  { %v557_v27 = vmul.f32 0.2, %v539_v22  ;;  %v542_v28 = vadd.f32 %v541_v26, %v493_v4  ;;  %vm553_vm1 = vcmp.gt.f32.partialorder %v539_v22, 0.0 }
 0x11a   :  { %vm556_vm2 = vcmp.gt.f32.partialorder %v550_v25, 0.0  ;;  %v560_v29 = vmul.f32 0.2, %v550_v25  ;;  %v563_v31 = vsel %vm555_vm0, %v547_v20, %v559_v24 }
 0x11b   :  { %vm554_vm3 = vcmp.gt.f32.partialorder %v542_v28, 0.0  ;;  %v558_v30 = vmul.f32 0.2, %v542_v28  ;;  %v561_v33 = vsel %vm553_vm1, %v539_v22, %v557_v27 }
 0x11c   :  { %v564_v32 = vsel %vm556_vm2, %v550_v25, %v560_v29 }
 0x11d   :  { %v656_v34 = vpack.c.bf16 %v564_v32, %v563_v31  ;;  %v562_v35 = vsel %vm554_vm3, %v542_v28, %v558_v30 }
 0x11e   :  { %v651_v36 = vpack.c.bf16 %v562_v35, %v561_v33 }
 0x11f   :  { %658 = vst [vmem:[%s981_s3 + $0x8] sm:$0xff] %v656_v34  }
 0x120   :  { %652 = vst [vmem:[%s981_s3] sm:$0xff] %v651_v36  }

// kernel: regnet_forward.19
= control target key start
LH: loop header
LB: loop body
LE: loop exit
PB: predicated region body
PF: predicated region fallthrough
CT: control target
= control target key end

     0   :  { %s1405_s1 = inlined_call_operand.vmem [shape: bf16[512,128], index: 1, kind: input, shape index: {}]   ;;  %s1406_s0 = inlined_call_operand.vmem [shape: bf16[128,512], index: 0, kind: input, shape index: {}]   ;;  %s1407_s2 = inlined_call_operand.vmem [shape: f32[1,128], index: 2, kind: input, shape index: {}]   ;;  %s1408_s3 = inlined_call_operand.vmem [shape: bf16[128,128], index: 3, kind: output, shape index: {}]  }
   0x1   :  { %v1068_v0 = vld [vmem:[%s1405_s1 + $0x40] sm:$0xff]   ;;  %v1072_v4 = vld [vmem:[%s1405_s1 + $0x48] sm:$0xff]   ;;  %v1076_v8 = vld [vmem:[%s1405_s1 + $0x50] sm:$0xff]  }
   0x2   :  { %v1069_v1 = vld [vmem:[%s1405_s1 + $0xc0] sm:$0xff]   ;;  %940 = vmatprep.subr.bf16.mxu0 %v1068_v0  ;;  %v1073_v5 = vld [vmem:[%s1405_s1 + $0xc8] sm:$0xff]   ;;  %v1077_v9 = vld [vmem:[%s1405_s1 + $0xd0] sm:$0xff]  }
   0x3   :  { %v1070_v2 = vld [vmem:[%s1405_s1] sm:$0xff]   ;;  %1004 = vmatprep.subr.bf16.mxu1 %v1069_v1  ;;  %v1074_v6 = vld [vmem:[%s1405_s1 + $0x8] sm:$0xff]   ;;  %v1078_v10 = vld [vmem:[%s1405_s1 + $0x10] sm:$0xff]  }
   0x4   :  { %v1071_v3 = vld [vmem:[%s1405_s1 + $0x80] sm:$0xff]   ;;  %941 = vmatpush3.bf16.msra.mxu0 %v1070_v2  ;;  %v1075_v7 = vld [vmem:[%s1405_s1 + $0x88] sm:$0xff]   ;;  %v1079_v11 = vld [vmem:[%s1405_s1 + $0x90] sm:$0xff]  }
   0x5   :  { %1005 = vmatpush3.bf16.msra.mxu1 %v1071_v3  ;;  %942 = vmatprep.subr.bf16.mxu0 %v1072_v4  ;;  %v1080_v12 = vld [vmem:[%s1405_s1 + $0x58] sm:$0xff]   ;;  %v1084_v16 = vld [vmem:[%s1405_s1 + $0x60] sm:$0xff]   ;;  %v1088_v20 = vld [vmem:[%s1405_s1 + $0x68] sm:$0xff]  }
   0x6   :  { %1006 = vmatprep.subr.bf16.mxu1 %v1073_v5  ;;  %v1081_v13 = vld [vmem:[%s1405_s1 + $0xd8] sm:$0xff]   ;;  %v1085_v17 = vld [vmem:[%s1405_s1 + $0xe0] sm:$0xff]   ;;  %v1089_v21 = vld [vmem:[%s1405_s1 + $0xe8] sm:$0xff]  }
   0x7   :  { %v1082_v14 = vld [vmem:[%s1405_s1 + $0x18] sm:$0xff]   ;;  %v1086_v18 = vld [vmem:[%s1405_s1 + $0x20] sm:$0xff]   ;;  %v1090_v22 = vld [vmem:[%s1405_s1 + $0x28] sm:$0xff]  }
   0x8   :  { %943 = vmatpush3.bf16.msra.mxu0 %v1074_v6  ;;  %v1083_v15 = vld [vmem:[%s1405_s1 + $0x98] sm:$0xff]   ;;  %v1087_v19 = vld [vmem:[%s1405_s1 + $0xa0] sm:$0xff]   ;;  %v1091_v23 = vld [vmem:[%s1405_s1 + $0xa8] sm:$0xff]  }
   0x9   :  { %1007 = vmatpush3.bf16.msra.mxu1 %v1075_v7  ;;  %944 = vmatprep.subr.bf16.mxu0 %v1076_v8  ;;  %v1092_v24 = vld [vmem:[%s1405_s1 + $0x70] sm:$0xff]   ;;  %v1096_v28 = vld [vmem:[%s1405_s1 + $0x78] sm:$0xff]   ;;  %v1363_v2 = vld [vmem:[%s1407_s2] ss:$0 sm:$0xff] }
   0xa   :  { %1008 = vmatprep.subr.bf16.mxu1 %v1077_v9  ;;  %v1093_v25 = vld [vmem:[%s1405_s1 + $0xf0] sm:$0xff]   ;;  %v1097_v29 = vld [vmem:[%s1405_s1 + $0xf8] sm:$0xff]  }
   0xb   :  { %v1094_v26 = vld [vmem:[%s1405_s1 + $0x30] sm:$0xff]   ;;  %v1098_v30 = vld [vmem:[%s1405_s1 + $0x38] sm:$0xff]  }
   0xc   :  { %945 = vmatpush3.bf16.msra.mxu0 %v1078_v10  ;;  %v1095_v27 = vld [vmem:[%s1405_s1 + $0xb0] sm:$0xff]   ;;  %v1099_v31 = vld [vmem:[%s1405_s1 + $0xb8] sm:$0xff]  }
   0xd   :  { %1009 = vmatpush3.bf16.msra.mxu1 %v1079_v11  ;;  %946 = vmatprep.subr.bf16.mxu0 %v1080_v12  ;;  %v1100_v32 = vld [vmem:[%s1406_s0] ss:$16 sps:$4 sm:$0xff]   ;;  %v1102_v33 = vld [vmem:[%s1406_s0 + $0x4] ss:$16 sps:$4 sm:$0xff]   ;;  %v1103_v34 = vld [vmem:[%s1406_s0 + $0x8] ss:$16 sps:$4 sm:$0xff]  }
   0xe   :  { %1010 = vmatprep.subr.bf16.mxu1 %v1081_v13  ;;  %v1105_v35 = vld [vmem:[%s1406_s0 + $0xc] ss:$16 sps:$4 sm:$0xff]   ;;  %502 = vmatprep.mubr.bf16.mxu0 %v1102_v33  ;;  %v1106_v36 = vld [vmem:[%s1406_s0 + $0x24] ss:$16 sps:$4 sm:$0xff]   ;;  %v1110_v38 = vld [vmem:[%s1406_s0 + $0x20] ss:$16 sps:$4 sm:$0xff]  }
   0xf   :  { %599 = vmatprep.mubr.bf16.mxu1 %v1105_v35  ;;  %v1108_v37 = vld [vmem:[%s1406_s0 + $0x2c] ss:$16 sps:$4 sm:$0xff]   ;;  %v1111_v39 = vld [vmem:[%s1406_s0 + $0x28] ss:$16 sps:$4 sm:$0xff]   ;;  %v1112_v40 = vld [vmem:[%s1406_s0 + $0x44] ss:$16 sps:$4 sm:$0xff]  }
  0x10   :  { %947 = vmatpush3.bf16.msra.mxu0 %v1082_v14  ;;  %v1114_v41 = vld [vmem:[%s1406_s0 + $0x4c] ss:$16 sps:$4 sm:$0xff]   ;;  %v1116_v42 = vld [vmem:[%s1406_s0 + $0x40] ss:$16 sps:$4 sm:$0xff]   ;;  %v1117_v43 = vld [vmem:[%s1406_s0 + $0x48] ss:$16 sps:$4 sm:$0xff]  }
  0x11   :  { %1011 = vmatpush3.bf16.msra.mxu1 %v1083_v15  ;;  %948 = vmatprep.subr.bf16.mxu0 %v1084_v16  ;;  %v1118_v44 = vld [vmem:[%s1406_s0 + $0x64] ss:$16 sps:$4 sm:$0xff]   ;;  %v1120_v45 = vld [vmem:[%s1406_s0 + $0x6c] ss:$16 sps:$4 sm:$0xff]   ;;  %v1122_v46 = vld [vmem:[%s1406_s0 + $0x60] ss:$16 sps:$4 sm:$0xff]  }
  0x12   :  { %1012 = vmatprep.subr.bf16.mxu1 %v1085_v17  ;;  %v1123_v47 = vld [vmem:[%s1406_s0 + $0x68] ss:$16 sps:$4 sm:$0xff]   ;;  %v1124_v48 = vld [vmem:[%s1406_s0 + $0x84] ss:$16 sps:$4 sm:$0xff]   ;;  %v1126_v49 = vld [vmem:[%s1406_s0 + $0x8c] ss:$16 sps:$4 sm:$0xff]  }
  0x13   :  { %v1128_v50 = vld [vmem:[%s1406_s0 + $0x80] ss:$16 sps:$4 sm:$0xff]   ;;  %v1129_v51 = vld [vmem:[%s1406_s0 + $0x88] ss:$16 sps:$4 sm:$0xff]   ;;  %v1130_v52 = vld [vmem:[%s1406_s0 + $0xa4] ss:$16 sps:$4 sm:$0xff]  }
  0x14   :  { %949 = vmatpush3.bf16.msra.mxu0 %v1086_v18  ;;  %v1132_v53 = vld [vmem:[%s1406_s0 + $0xac] ss:$16 sps:$4 sm:$0xff]   ;;  %v1134_v54 = vld [vmem:[%s1406_s0 + $0xa0] ss:$16 sps:$4 sm:$0xff]   ;;  %v1135_v55 = vld [vmem:[%s1406_s0 + $0xa8] ss:$16 sps:$4 sm:$0xff]  }
  0x15   :  { %1013 = vmatpush3.bf16.msra.mxu1 %v1087_v19  ;;  %950 = vmatprep.subr.bf16.mxu0 %v1088_v20  ;;  %v1136_v56 = vld [vmem:[%s1406_s0 + $0xc4] ss:$16 sps:$4 sm:$0xff]   ;;  %v1138_v57 = vld [vmem:[%s1406_s0 + $0xcc] ss:$16 sps:$4 sm:$0xff]   ;;  %v1140_v58 = vld [vmem:[%s1406_s0 + $0xc0] ss:$16 sps:$4 sm:$0xff]  }
  0x16   :  { %1014 = vmatprep.subr.bf16.mxu1 %v1089_v21  ;;  %v1141_v59 = vld [vmem:[%s1406_s0 + $0xc8] ss:$16 sps:$4 sm:$0xff]   ;;  %v1142_v60 = vld [vmem:[%s1406_s0 + $0xe4] ss:$16 sps:$4 sm:$0xff]   ;;  %v1144_v61 = vld [vmem:[%s1406_s0 + $0xec] ss:$16 sps:$4 sm:$0xff]  }
  0x17   :  { %v1146_v62 = vld [vmem:[%s1406_s0 + $0xe0] ss:$16 sps:$4 sm:$0xff]   ;;  %v1147_v63 = vld [vmem:[%s1406_s0 + $0xe8] ss:$16 sps:$4 sm:$0xff]  }
  0x18   :  { %951 = vmatpush3.bf16.msra.mxu0 %v1090_v22 }
  0x19   :  { %1015 = vmatpush3.bf16.msra.mxu1 %v1091_v23  ;;  %952 = vmatprep.subr.bf16.mxu0 %v1092_v24 }
  0x1a   :  { %1016 = vmatprep.subr.bf16.mxu1 %v1093_v25 }
  0x1c   :  { %953 = vmatpush3.bf16.msra.mxu0 %v1094_v26 }
  0x1d   :  { %1017 = vmatpush3.bf16.msra.mxu1 %v1095_v27  ;;  %954 = vmatprep.subr.bf16.mxu0 %v1096_v28 }
  0x1e   :  { %1018 = vmatprep.subr.bf16.mxu1 %v1097_v29 }
  0x20   :  { %955 = vmatpush3.bf16.msra.mxu0 %v1098_v30 }
  0x21   :  { %1019 = vmatpush3.bf16.msra.mxu1 %v1099_v31 }
  0x23   :  { %503 = vmatmul.mubr.bf16.vlgmr.msra.gmra.mrb[0].mxu0 %v1100_v32 }
  0x24   :  { %600 = vmatmul.mubr.bf16.vlgmr.msra.gmra.mrb[0].mxu1 %v1103_v34  ;;  %510 = vmatprep.mubr.bf16.mxu0 %v1106_v36 }
  0x25   :  { %607 = vmatprep.mubr.bf16.mxu1 %v1108_v37 }
  0x2b   :  { %511 = vmatmul.mubr.bf16.gmra.mrb[4].mxu0 %v1110_v38 }
  0x2c   :  { %608 = vmatmul.mubr.bf16.gmra.mrb[4].mxu1 %v1111_v39  ;;  %518 = vmatprep.mubr.bf16.mxu0 %v1112_v40 }
  0x2d   :  { %615 = vmatprep.mubr.bf16.mxu1 %v1114_v41 }
  0x33   :  { %519 = vmatmul.mubr.bf16.gmra.mrb[8].mxu0 %v1116_v42 }
  0x34   :  { %616 = vmatmul.mubr.bf16.gmra.mrb[8].mxu1 %v1117_v43  ;;  %526 = vmatprep.mubr.bf16.mxu0 %v1118_v44 }
  0x35   :  { %623 = vmatprep.mubr.bf16.mxu1 %v1120_v45 }
  0x3b   :  { %527 = vmatmul.mubr.bf16.gmra.mrb[12].mxu0 %v1122_v46 }
  0x3c   :  { %624 = vmatmul.mubr.bf16.gmra.mrb[12].mxu1 %v1123_v47  ;;  %534 = vmatprep.mubr.bf16.mxu0 %v1124_v48 }
  0x3d   :  { %631 = vmatprep.mubr.bf16.mxu1 %v1126_v49 }
  0x43   :  { %535 = vmatmul.mubr.bf16.gmra.mrb[16].mxu0 %v1128_v50 }
  0x44   :  { %632 = vmatmul.mubr.bf16.gmra.mrb[16].mxu1 %v1129_v51  ;;  %542 = vmatprep.mubr.bf16.mxu0 %v1130_v52 }
  0x45   :  { %639 = vmatprep.mubr.bf16.mxu1 %v1132_v53 }
  0x4b   :  { %543 = vmatmul.mubr.bf16.gmra.mrb[20].mxu0 %v1134_v54 }
  0x4c   :  { %640 = vmatmul.mubr.bf16.gmra.mrb[20].mxu1 %v1135_v55  ;;  %550 = vmatprep.mubr.bf16.mxu0 %v1136_v56 }
  0x4d   :  { %647 = vmatprep.mubr.bf16.mxu1 %v1138_v57 }
  0x53   :  { %551 = vmatmul.mubr.bf16.gmra.mrb[24].mxu0 %v1140_v58 }
  0x54   :  { %648 = vmatmul.mubr.bf16.gmra.mrb[24].mxu1 %v1141_v59  ;;  %558 = vmatprep.mubr.bf16.mxu0 %v1142_v60 }
  0x55   :  { %655 = vmatprep.mubr.bf16.mxu1 %v1144_v61 }
  0x5b   :  { %559 = vmatmul.mubr.bf16.gmra.mrb[28].mxu0 %v1146_v62 }
  0x5c   :  { %656 = vmatmul.mubr.bf16.gmra.mrb[28].mxu1 %v1147_v63 }
  0xf6   :  { %v956_v0 = vpop.f32.mrb[0].mxu0 }
  0xf7   :  { %v1020_v1 = vpop.f32.mrb[0].mxu1  ;;  %v957_v3 = vpop.f32.mrb[1].mxu0 }
  0xf8   :  { %v958_v4 = vadd.f32 %v957_v3, %v956_v0  ;;  %v1021_v5 = vpop.f32.mrb[1].mxu1  ;;  %v959_v6 = vpop.f32.mrb[2].mxu0 }
  0xf9   :  { %v1022_v7 = vadd.f32 %v1021_v5, %v1020_v1  ;;  %v1023_v8 = vpop.f32.mrb[2].mxu1  ;;  %v960_v9 = vpop.f32.mrb[3].mxu0 }
  0xfa   :  { %v505_v10 = vadd.f32 %v958_v4, %v1363_v2  ;;  %v961_v11 = vadd.f32 %v960_v9, %v959_v6  ;;  %v1024_v12 = vpop.f32.mrb[3].mxu1 }
  0xfb   :  { %v1025_v13 = vadd.f32 %v1024_v12, %v1023_v8 }
  0xfc   :  { %v602_v14 = vadd.f32 %v1022_v7, %v505_v10  ;;  %v508_v15 = vadd.f32 %v961_v11, %v1363_v2 }
  0xfe   :  { %v680_v16 = vmul.f32 0.2, %v602_v14  ;;  %v605_v17 = vadd.f32 %v1025_v13, %v508_v15  ;;  %v962_v18 = vpop.f32.mrb[4].mxu0  ;;  %vm664_vm0 = vcmp.gt.f32.partialorder %v602_v14, 0.0 }
  0xff   :  { %v1026_v19 = vpop.f32.mrb[4].mxu1  ;;  %v963_v20 = vpop.f32.mrb[5].mxu0 }
 0x100   :  { %vm665_vm1 = vcmp.gt.f32.partialorder %v605_v17, 0.0  ;;  %v681_v21 = vmul.f32 0.2, %v605_v17  ;;  %v964_v22 = vadd.f32 %v963_v20, %v962_v18  ;;  %v1027_v23 = vpop.f32.mrb[5].mxu1  ;;  %v965_v24 = vpop.f32.mrb[6].mxu0  ;;  %v696_v28 = vsel %vm664_vm0, %v602_v14, %v680_v16 }
 0x101   :  { %v1028_v25 = vadd.f32 %v1027_v23, %v1026_v19  ;;  %v1029_v26 = vpop.f32.mrb[6].mxu1  ;;  %v966_v27 = vpop.f32.mrb[7].mxu0 }
 0x102   :  { %v697_v29 = vsel %vm665_vm1, %v605_v17, %v681_v21  ;;  %v513_v30 = vadd.f32 %v964_v22, %v1363_v2  ;;  %v967_v31 = vadd.f32 %v966_v27, %v965_v24  ;;  %v1030_v32 = vpop.f32.mrb[7].mxu1 }
 0x103   :  { %v896_v33 = vpack.c.bf16 %v697_v29, %v696_v28  ;;  %v1031_v34 = vadd.f32 %v1030_v32, %v1029_v26 }
 0x104   :  { %v610_v35 = vadd.f32 %v1028_v25, %v513_v30  ;;  %v516_v36 = vadd.f32 %v967_v31, %v1363_v2 }
 0x105   :  { %897 = vst [vmem:[%s1408_s3] sm:$0xff] %v896_v33  }
 0x106   :  { %v682_v37 = vmul.f32 0.2, %v610_v35  ;;  %v613_v38 = vadd.f32 %v1031_v34, %v516_v36  ;;  %v968_v39 = vpop.f32.mrb[8].mxu0  ;;  %vm666_vm2 = vcmp.gt.f32.partialorder %v610_v35, 0.0 }
 0x107   :  { %v1032_v40 = vpop.f32.mrb[8].mxu1  ;;  %v969_v41 = vpop.f32.mrb[9].mxu0 }
 0x108   :  { %vm667_vm3 = vcmp.gt.f32.partialorder %v613_v38, 0.0  ;;  %v683_v42 = vmul.f32 0.2, %v613_v38  ;;  %v970_v43 = vadd.f32 %v969_v41, %v968_v39  ;;  %v1033_v44 = vpop.f32.mrb[9].mxu1  ;;  %v971_v45 = vpop.f32.mrb[10].mxu0  ;;  %v698_v49 = vsel %vm666_vm2, %v610_v35, %v682_v37 }
 0x109   :  { %v1034_v46 = vadd.f32 %v1033_v44, %v1032_v40  ;;  %v1035_v47 = vpop.f32.mrb[10].mxu1  ;;  %v972_v48 = vpop.f32.mrb[11].mxu0 }
 0x10a   :  { %v699_v50 = vsel %vm667_vm3, %v613_v38, %v683_v42  ;;  %v521_v51 = vadd.f32 %v970_v43, %v1363_v2  ;;  %v973_v52 = vadd.f32 %v972_v48, %v971_v45  ;;  %v1036_v53 = vpop.f32.mrb[11].mxu1 }
 0x10b   :  { %v901_v54 = vpack.c.bf16 %v699_v50, %v698_v49  ;;  %v1037_v55 = vadd.f32 %v1036_v53, %v1035_v47 }
 0x10c   :  { %v618_v56 = vadd.f32 %v1034_v46, %v521_v51  ;;  %v524_v57 = vadd.f32 %v973_v52, %v1363_v2 }
 0x10d   :  { %933 = vst [vmem:[%s1408_s3 + $0x8] sm:$0xff] %v901_v54  }
 0x10e   :  { %v684_v58 = vmul.f32 0.2, %v618_v56  ;;  %v621_v59 = vadd.f32 %v1037_v55, %v524_v57  ;;  %v974_v60 = vpop.f32.mrb[12].mxu0  ;;  %vm668_vm4 = vcmp.gt.f32.partialorder %v618_v56, 0.0 }
 0x10f   :  { %v1038_v61 = vpop.f32.mrb[12].mxu1  ;;  %v975_v62 = vpop.f32.mrb[13].mxu0 }
 0x110   :  { %vm669_vm5 = vcmp.gt.f32.partialorder %v621_v59, 0.0  ;;  %v685_v63 = vmul.f32 0.2, %v621_v59  ;;  %v976_v0 = vadd.f32 %v975_v62, %v974_v60  ;;  %v1039_v1 = vpop.f32.mrb[13].mxu1  ;;  %v977_v3 = vpop.f32.mrb[14].mxu0  ;;  %v700_v7 = vsel %vm668_vm4, %v618_v56, %v684_v58 }
 0x111   :  { %v1040_v4 = vadd.f32 %v1039_v1, %v1038_v61  ;;  %v1041_v5 = vpop.f32.mrb[14].mxu1  ;;  %v978_v6 = vpop.f32.mrb[15].mxu0 }
 0x112   :  { %v701_v8 = vsel %vm669_vm5, %v621_v59, %v685_v63  ;;  %v529_v9 = vadd.f32 %v976_v0, %v1363_v2  ;;  %v979_v10 = vadd.f32 %v978_v6, %v977_v3  ;;  %v1042_v11 = vpop.f32.mrb[15].mxu1 }
 0x113   :  { %v906_v12 = vpack.c.bf16 %v701_v8, %v700_v7  ;;  %v1043_v13 = vadd.f32 %v1042_v11, %v1041_v5 }
 0x114   :  { %v626_v14 = vadd.f32 %v1040_v4, %v529_v9  ;;  %v532_v15 = vadd.f32 %v979_v10, %v1363_v2 }
 0x115   :  { %934 = vst [vmem:[%s1408_s3 + $0x10] sm:$0xff] %v906_v12  }
 0x116   :  { %v686_v16 = vmul.f32 0.2, %v626_v14  ;;  %v629_v17 = vadd.f32 %v1043_v13, %v532_v15  ;;  %v980_v18 = vpop.f32.mrb[16].mxu0  ;;  %vm670_vm6 = vcmp.gt.f32.partialorder %v626_v14, 0.0 }
 0x117   :  { %v1044_v19 = vpop.f32.mrb[16].mxu1  ;;  %v981_v20 = vpop.f32.mrb[17].mxu0 }
 0x118   :  { %vm671_vm7 = vcmp.gt.f32.partialorder %v629_v17, 0.0  ;;  %v687_v21 = vmul.f32 0.2, %v629_v17  ;;  %v982_v22 = vadd.f32 %v981_v20, %v980_v18  ;;  %v1045_v23 = vpop.f32.mrb[17].mxu1  ;;  %v983_v24 = vpop.f32.mrb[18].mxu0  ;;  %v702_v28 = vsel %vm670_vm6, %v626_v14, %v686_v16 }
 0x119   :  { %v1046_v25 = vadd.f32 %v1045_v23, %v1044_v19  ;;  %v1047_v26 = vpop.f32.mrb[18].mxu1  ;;  %v984_v27 = vpop.f32.mrb[19].mxu0 }
 0x11a   :  { %v703_v29 = vsel %vm671_vm7, %v629_v17, %v687_v21  ;;  %v537_v30 = vadd.f32 %v982_v22, %v1363_v2  ;;  %v985_v31 = vadd.f32 %v984_v27, %v983_v24  ;;  %v1048_v32 = vpop.f32.mrb[19].mxu1 }
 0x11b   :  { %v911_v33 = vpack.c.bf16 %v703_v29, %v702_v28  ;;  %v1049_v34 = vadd.f32 %v1048_v32, %v1047_v26 }
 0x11c   :  { %v634_v35 = vadd.f32 %v1046_v25, %v537_v30  ;;  %v540_v36 = vadd.f32 %v985_v31, %v1363_v2 }
 0x11d   :  { %935 = vst [vmem:[%s1408_s3 + $0x18] sm:$0xff] %v911_v33  }
 0x11e   :  { %v688_v37 = vmul.f32 0.2, %v634_v35  ;;  %v637_v38 = vadd.f32 %v1049_v34, %v540_v36  ;;  %v986_v39 = vpop.f32.mrb[20].mxu0  ;;  %vm672_vm8 = vcmp.gt.f32.partialorder %v634_v35, 0.0 }
 0x11f   :  { %v1050_v40 = vpop.f32.mrb[20].mxu1  ;;  %v987_v41 = vpop.f32.mrb[21].mxu0 }
 0x120   :  { %vm673_vm9 = vcmp.gt.f32.partialorder %v637_v38, 0.0  ;;  %v689_v42 = vmul.f32 0.2, %v637_v38  ;;  %v988_v43 = vadd.f32 %v987_v41, %v986_v39  ;;  %v1051_v44 = vpop.f32.mrb[21].mxu1  ;;  %v989_v45 = vpop.f32.mrb[22].mxu0  ;;  %v704_v49 = vsel %vm672_vm8, %v634_v35, %v688_v37 }
 0x121   :  { %v1052_v46 = vadd.f32 %v1051_v44, %v1050_v40  ;;  %v1053_v47 = vpop.f32.mrb[22].mxu1  ;;  %v990_v48 = vpop.f32.mrb[23].mxu0 }
 0x122   :  { %v705_v50 = vsel %vm673_vm9, %v637_v38, %v689_v42  ;;  %v545_v51 = vadd.f32 %v988_v43, %v1363_v2  ;;  %v991_v52 = vadd.f32 %v990_v48, %v989_v45  ;;  %v1054_v53 = vpop.f32.mrb[23].mxu1 }
 0x123   :  { %v916_v54 = vpack.c.bf16 %v705_v50, %v704_v49  ;;  %v1055_v55 = vadd.f32 %v1054_v53, %v1053_v47 }
 0x124   :  { %v642_v56 = vadd.f32 %v1052_v46, %v545_v51  ;;  %v548_v57 = vadd.f32 %v991_v52, %v1363_v2 }
 0x125   :  { %936 = vst [vmem:[%s1408_s3 + $0x20] sm:$0xff] %v916_v54  }
 0x126   :  { %v690_v58 = vmul.f32 0.2, %v642_v56  ;;  %v645_v59 = vadd.f32 %v1055_v55, %v548_v57  ;;  %v992_v60 = vpop.f32.mrb[24].mxu0  ;;  %vm674_vm10 = vcmp.gt.f32.partialorder %v642_v56, 0.0 }
 0x127   :  { %v1056_v61 = vpop.f32.mrb[24].mxu1  ;;  %v993_v62 = vpop.f32.mrb[25].mxu0 }
 0x128   :  { %vm675_vm11 = vcmp.gt.f32.partialorder %v645_v59, 0.0  ;;  %v691_v63 = vmul.f32 0.2, %v645_v59  ;;  %v994_v0 = vadd.f32 %v993_v62, %v992_v60  ;;  %v1057_v1 = vpop.f32.mrb[25].mxu1  ;;  %v995_v3 = vpop.f32.mrb[26].mxu0  ;;  %v706_v7 = vsel %vm674_vm10, %v642_v56, %v690_v58 }
 0x129   :  { %v1058_v4 = vadd.f32 %v1057_v1, %v1056_v61  ;;  %v1059_v5 = vpop.f32.mrb[26].mxu1  ;;  %v996_v6 = vpop.f32.mrb[27].mxu0 }
 0x12a   :  { %v707_v8 = vsel %vm675_vm11, %v645_v59, %v691_v63  ;;  %v553_v9 = vadd.f32 %v994_v0, %v1363_v2  ;;  %v997_v10 = vadd.f32 %v996_v6, %v995_v3  ;;  %v1060_v11 = vpop.f32.mrb[27].mxu1 }
 0x12b   :  { %v921_v12 = vpack.c.bf16 %v707_v8, %v706_v7  ;;  %v1061_v13 = vadd.f32 %v1060_v11, %v1059_v5 }
 0x12c   :  { %v650_v14 = vadd.f32 %v1058_v4, %v553_v9  ;;  %v556_v15 = vadd.f32 %v997_v10, %v1363_v2 }
 0x12d   :  { %937 = vst [vmem:[%s1408_s3 + $0x28] sm:$0xff] %v921_v12  }
 0x12e   :  { %v692_v16 = vmul.f32 0.2, %v650_v14  ;;  %v653_v17 = vadd.f32 %v1061_v13, %v556_v15  ;;  %v998_v18 = vpop.f32.mrb[28].mxu0  ;;  %vm676_vm12 = vcmp.gt.f32.partialorder %v650_v14, 0.0 }
 0x12f   :  { %v1062_v19 = vpop.f32.mrb[28].mxu1  ;;  %v999_v20 = vpop.f32.mrb[29].mxu0 }
 0x130   :  { %vm677_vm13 = vcmp.gt.f32.partialorder %v653_v17, 0.0  ;;  %v693_v21 = vmul.f32 0.2, %v653_v17  ;;  %v1000_v22 = vadd.f32 %v999_v20, %v998_v18  ;;  %v1063_v23 = vpop.f32.mrb[29].mxu1  ;;  %v1001_v24 = vpop.f32.mrb[30].mxu0  ;;  %v708_v28 = vsel %vm676_vm12, %v650_v14, %v692_v16 }
 0x131   :  { %v1064_v25 = vadd.f32 %v1063_v23, %v1062_v19  ;;  %v1065_v26 = vpop.f32.mrb[30].mxu1  ;;  %v1002_v27 = vpop.f32.mrb[31].mxu0 }
 0x132   :  { %v709_v29 = vsel %vm677_vm13, %v653_v17, %v693_v21  ;;  %v561_v30 = vadd.f32 %v1000_v22, %v1363_v2  ;;  %v1003_v31 = vadd.f32 %v1002_v27, %v1001_v24  ;;  %v1066_v32 = vpop.f32.mrb[31].mxu1 }
 0x133   :  { %v926_v33 = vpack.c.bf16 %v709_v29, %v708_v28  ;;  %v1067_v34 = vadd.f32 %v1066_v32, %v1065_v26 }
 0x134   :  { %v658_v35 = vadd.f32 %v1064_v25, %v561_v30  ;;  %v564_v36 = vadd.f32 %v1003_v31, %v1363_v2 }
 0x135   :  { %938 = vst [vmem:[%s1408_s3 + $0x30] sm:$0xff] %v926_v33  }
 0x136   :  { %v694_v37 = vmul.f32 0.2, %v658_v35  ;;  %v661_v38 = vadd.f32 %v1067_v34, %v564_v36  ;;  %vm678_vm14 = vcmp.gt.f32.partialorder %v658_v35, 0.0 }
 0x138   :  { %vm679_vm15 = vcmp.gt.f32.partialorder %v661_v38, 0.0  ;;  %v695_v39 = vmul.f32 0.2, %v661_v38  ;;  %v710_v40 = vsel %vm678_vm14, %v658_v35, %v694_v37 }
 0x13a   :  { %v711_v41 = vsel %vm679_vm15, %v661_v38, %v695_v39 }
 0x13b   :  { %v931_v42 = vpack.c.bf16 %v711_v41, %v710_v40 }
 0x13d   :  { %939 = vst [vmem:[%s1408_s3 + $0x38] sm:$0xff] %v931_v42  }

// kernel: regnet_forward.20
= control target key start
LH: loop header
LB: loop body
LE: loop exit
PB: predicated region body
PF: predicated region fallthrough
CT: control target
= control target key end

     0   :  { %s1217_s1 = inlined_call_operand.vmem [shape: bf16[384,128], index: 1, kind: input, shape index: {}]   ;;  %s1218_s0 = inlined_call_operand.vmem [shape: bf16[128,384], index: 0, kind: input, shape index: {}]   ;;  %s1219_s2 = inlined_call_operand.vmem [shape: f32[1,128], index: 2, kind: input, shape index: {}]   ;;  %s1220_s3 = inlined_call_operand.vmem [shape: bf16[128,128], index: 3, kind: output, shape index: {}]  }
   0x1   :  { %v940_v0 = vld [vmem:[%s1217_s1 + $0x40] sm:$0xff]   ;;  %v942_v2 = vld [vmem:[%s1217_s1 + $0x48] sm:$0xff]   ;;  %v945_v5 = vld [vmem:[%s1217_s1 + $0x50] sm:$0xff]  }
   0x2   :  { %v941_v1 = vld [vmem:[%s1217_s1] sm:$0xff]   ;;  %828 = vmatprep.subr.bf16.mxu0 %v940_v0  ;;  %v944_v4 = vld [vmem:[%s1217_s1 + $0x8] sm:$0xff]   ;;  %v947_v7 = vld [vmem:[%s1217_s1 + $0x10] sm:$0xff]  }
   0x3   :  { %829 = vmatpush3.bf16.msra.mxu0 %v941_v1  ;;  %v943_v3 = vld [vmem:[%s1217_s1 + $0x80] sm:$0xff]   ;;  %v946_v6 = vld [vmem:[%s1217_s1 + $0x88] sm:$0xff]   ;;  %v948_v8 = vld [vmem:[%s1217_s1 + $0x58] sm:$0xff]  }
   0x4   :  { %830 = vmatprep.subr.bf16.mxu0 %v942_v2  ;;  %908 = vmatprep.subr.bf16.mxu1 %v943_v3  ;;  %v949_v9 = vld [vmem:[%s1217_s1 + $0x90] sm:$0xff]   ;;  %v950_v10 = vld [vmem:[%s1217_s1 + $0x18] sm:$0xff]   ;;  %v951_v11 = vld [vmem:[%s1217_s1 + $0x60] sm:$0xff]  }
   0x5   :  { %909 = vmatpush3.bf16.msra.mxu1 %v943_v3  ;;  %v952_v12 = vld [vmem:[%s1217_s1 + $0x98] sm:$0xff]   ;;  %v953_v13 = vld [vmem:[%s1217_s1 + $0x20] sm:$0xff]   ;;  %v954_v15 = vld [vmem:[%s1217_s1 + $0x68] sm:$0xff]  }
   0x6   :  { %910 = vmatprep.subr.bf16.mxu1 %v946_v6  ;;  %v955_v14 = vld [vmem:[%s1217_s1 + $0xa0] sm:$0xff]   ;;  %v956_v16 = vld [vmem:[%s1217_s1 + $0x28] sm:$0xff]   ;;  %v957_v18 = vld [vmem:[%s1217_s1 + $0x70] sm:$0xff]  }
   0x7   :  { %831 = vmatpush3.bf16.msra.mxu0 %v944_v4  ;;  %v958_v17 = vld [vmem:[%s1217_s1 + $0xa8] sm:$0xff]   ;;  %v959_v19 = vld [vmem:[%s1217_s1 + $0x30] sm:$0xff]   ;;  %v960_v20 = vld [vmem:[%s1217_s1 + $0x78] sm:$0xff]  }
   0x8   :  { %832 = vmatprep.subr.bf16.mxu0 %v945_v5  ;;  %v961_v21 = vld [vmem:[%s1217_s1 + $0xb0] sm:$0xff]   ;;  %v962_v23 = vld [vmem:[%s1217_s1 + $0x38] sm:$0xff]   ;;  %v963_v26 = vld [vmem:[%s1218_s0] ss:$12 sps:$4 sm:$0xff]  }
   0x9   :  { %911 = vmatpush3.bf16.msra.mxu1 %v946_v6  ;;  %v965_v22 = vld [vmem:[%s1218_s0 + $0x4] ss:$12 sps:$4 sm:$0xff]   ;;  %v967_v24 = vld [vmem:[%s1218_s0 + $0x8] ss:$12 sps:$4 sm:$0xff]   ;;  %v966_v25 = vld [vmem:[%s1217_s1 + $0xb8] sm:$0xff]  }
   0xa   :  { %912 = vmatprep.subr.bf16.mxu1 %v949_v9  ;;  %406 = vmatprep.mubr.bf16.mxu0 %v965_v22  ;;  %v969_v27 = vld [vmem:[%s1218_s0 + $0x1c] ss:$12 sps:$4 sm:$0xff]   ;;  %v968_v28 = vld [vmem:[%s1218_s0 + $0x20] ss:$12 sps:$4 sm:$0xff]   ;;  %v975_v29 = vld [vmem:[%s1218_s0 + $0x38] ss:$12 sps:$4 sm:$0xff]  }
   0xb   :  { %833 = vmatpush3.bf16.msra.mxu0 %v947_v7  ;;  %924 = vmatprep.mubr.bf16.mxu1 %v967_v24  ;;  %v971_v30 = vld [vmem:[%s1218_s0 + $0x18] ss:$12 sps:$4 sm:$0xff]   ;;  %v972_v31 = vld [vmem:[%s1218_s0 + $0x34] ss:$12 sps:$4 sm:$0xff]   ;;  %v976_v32 = vld [vmem:[%s1218_s0 + $0x50] ss:$12 sps:$4 sm:$0xff]  }
   0xc   :  { %834 = vmatprep.subr.bf16.mxu0 %v948_v8  ;;  %v983_v33 = vld [vmem:[%s1218_s0 + $0x68] ss:$12 sps:$4 sm:$0xff]   ;;  %v974_v34 = vld [vmem:[%s1218_s0 + $0x30] ss:$12 sps:$4 sm:$0xff]   ;;  %v977_v35 = vld [vmem:[%s1218_s0 + $0x4c] ss:$12 sps:$4 sm:$0xff]  }
   0xd   :  { %913 = vmatpush3.bf16.msra.mxu1 %v949_v9  ;;  %v984_v36 = vld [vmem:[%s1218_s0 + $0x80] ss:$12 sps:$4 sm:$0xff]   ;;  %v991_v37 = vld [vmem:[%s1218_s0 + $0x98] ss:$12 sps:$4 sm:$0xff]   ;;  %v979_v38 = vld [vmem:[%s1218_s0 + $0x48] ss:$12 sps:$4 sm:$0xff]  }
   0xe   :  { %914 = vmatprep.subr.bf16.mxu1 %v952_v12  ;;  %v980_v39 = vld [vmem:[%s1218_s0 + $0x64] ss:$12 sps:$4 sm:$0xff]   ;;  %v982_v41 = vld [vmem:[%s1218_s0 + $0x60] ss:$12 sps:$4 sm:$0xff]   ;;  %v985_v42 = vld [vmem:[%s1218_s0 + $0x7c] ss:$12 sps:$4 sm:$0xff]  }
   0xf   :  { %835 = vmatpush3.bf16.msra.mxu0 %v950_v10  ;;  %v992_v40 = vld [vmem:[%s1218_s0 + $0xb0] ss:$12 sps:$4 sm:$0xff]   ;;  %v987_v43 = vld [vmem:[%s1218_s0 + $0x78] ss:$12 sps:$4 sm:$0xff]   ;;  %v988_v44 = vld [vmem:[%s1218_s0 + $0x94] ss:$12 sps:$4 sm:$0xff]  }
  0x10   :  { %836 = vmatprep.subr.bf16.mxu0 %v951_v11  ;;  %v990_v45 = vld [vmem:[%s1218_s0 + $0x90] ss:$12 sps:$4 sm:$0xff]   ;;  %v993_v46 = vld [vmem:[%s1218_s0 + $0xac] ss:$12 sps:$4 sm:$0xff]   ;;  %v995_v47 = vld [vmem:[%s1218_s0 + $0xa8] ss:$12 sps:$4 sm:$0xff]  }
  0x11   :  { %915 = vmatpush3.bf16.msra.mxu1 %v952_v12  ;;  %v1163_v50 = vld [vmem:[%s1219_s2] ss:$0 sm:$0xff] }
  0x12   :  { %916 = vmatprep.subr.bf16.mxu1 %v955_v14 }
  0x13   :  { %837 = vmatpush3.bf16.msra.mxu0 %v953_v13 }
  0x14   :  { %838 = vmatprep.subr.bf16.mxu0 %v954_v15 }
  0x15   :  { %917 = vmatpush3.bf16.msra.mxu1 %v955_v14 }
  0x16   :  { %918 = vmatprep.subr.bf16.mxu1 %v958_v17 }
  0x17   :  { %839 = vmatpush3.bf16.msra.mxu0 %v956_v16 }
  0x18   :  { %840 = vmatprep.subr.bf16.mxu0 %v957_v18 }
  0x19   :  { %919 = vmatpush3.bf16.msra.mxu1 %v958_v17 }
  0x1a   :  { %920 = vmatprep.subr.bf16.mxu1 %v961_v21 }
  0x1b   :  { %841 = vmatpush3.bf16.msra.mxu0 %v959_v19 }
  0x1c   :  { %842 = vmatprep.subr.bf16.mxu0 %v960_v20 }
  0x1d   :  { %921 = vmatpush3.bf16.msra.mxu1 %v961_v21 }
  0x1e   :  { %922 = vmatprep.subr.bf16.mxu1 %v966_v25 }
  0x1f   :  { %843 = vmatpush3.bf16.msra.mxu0 %v962_v23 }
  0x21   :  { %923 = vmatpush3.bf16.msra.mxu1 %v966_v25 }
  0x22   :  { %407 = vmatmul.mubr.bf16.vlgmr.msra.gmra.mrb[0].mxu0 %v963_v26 }
  0x23   :  { %414 = vmatprep.mubr.bf16.mxu0 %v969_v27 }
  0x24   :  { %925 = vmatmul.mubr.bf16.vlgmr.msra.gmra.mrb[0].mxu1 %v968_v28 }
  0x25   :  { %928 = vmatprep.mubr.bf16.mxu1 %v975_v29 }
  0x2a   :  { %415 = vmatmul.mubr.bf16.gmra.mrb[4].mxu0 %v971_v30 }
  0x2b   :  { %422 = vmatprep.mubr.bf16.mxu0 %v972_v31 }
  0x2c   :  { %929 = vmatmul.mubr.bf16.gmra.mrb[4].mxu1 %v976_v32 }
  0x2d   :  { %932 = vmatprep.mubr.bf16.mxu1 %v983_v33 }
  0x32   :  { %423 = vmatmul.mubr.bf16.gmra.mrb[8].mxu0 %v974_v34 }
  0x33   :  { %430 = vmatprep.mubr.bf16.mxu0 %v977_v35 }
  0x34   :  { %933 = vmatmul.mubr.bf16.gmra.mrb[8].mxu1 %v984_v36 }
  0x35   :  { %936 = vmatprep.mubr.bf16.mxu1 %v991_v37 }
  0x3a   :  { %431 = vmatmul.mubr.bf16.gmra.mrb[12].mxu0 %v979_v38 }
  0x3b   :  { %438 = vmatprep.mubr.bf16.mxu0 %v980_v39 }
  0x3c   :  { %937 = vmatmul.mubr.bf16.gmra.mrb[12].mxu1 %v992_v40 }
  0x42   :  { %439 = vmatmul.mubr.bf16.gmra.mrb[16].mxu0 %v982_v41 }
  0x43   :  { %446 = vmatprep.mubr.bf16.mxu0 %v985_v42 }
  0x4a   :  { %447 = vmatmul.mubr.bf16.gmra.mrb[20].mxu0 %v987_v43 }
  0x4b   :  { %454 = vmatprep.mubr.bf16.mxu0 %v988_v44 }
  0x52   :  { %455 = vmatmul.mubr.bf16.gmra.mrb[24].mxu0 %v990_v45 }
  0x53   :  { %462 = vmatprep.mubr.bf16.mxu0 %v993_v46 }
  0x5a   :  { %463 = vmatmul.mubr.bf16.gmra.mrb[28].mxu0 %v995_v47 }
  0xf5   :  { %v844_v48 = vpop.f32.mrb[0].mxu0 }
  0xf6   :  { %v845_v49 = vpop.f32.mrb[1].mxu0 }
  0xf7   :  { %v846_v51 = vadd.f32 %v845_v49, %v844_v48  ;;  %v847_v52 = vpop.f32.mrb[2].mxu0  ;;  %v926_v54 = vpop.f32.mrb[0].mxu1 }
  0xf8   :  { %v848_v53 = vpop.f32.mrb[3].mxu0  ;;  %v505_v57 = vpop.f32.mrb[1].mxu1 }
  0xf9   :  { %v849_v55 = vadd.f32 %v848_v53, %v847_v52  ;;  %v409_v56 = vadd.f32 %v846_v51, %v1163_v50  ;;  %v927_v58 = vpop.f32.mrb[2].mxu1 }
  0xfa   :  { %v508_v61 = vpop.f32.mrb[3].mxu1 }
  0xfb   :  { %v506_v59 = vadd.f32 %v505_v57, %v409_v56  ;;  %v412_v60 = vadd.f32 %v849_v55, %v1163_v50 }
  0xfd   :  { %v584_v62 = vmul.f32 0.2, %v506_v59  ;;  %v509_v63 = vadd.f32 %v508_v61, %v412_v60  ;;  %v850_v0 = vpop.f32.mrb[4].mxu0  ;;  %vm568_vm0 = vcmp.gt.f32.partialorder %v506_v59, 0.0 }
  0xfe   :  { %v851_v1 = vpop.f32.mrb[5].mxu0 }
  0xff   :  { %vm569_vm1 = vcmp.gt.f32.partialorder %v509_v63, 0.0  ;;  %v585_v2 = vmul.f32 0.2, %v509_v63  ;;  %v852_v3 = vadd.f32 %v851_v1, %v850_v0  ;;  %v853_v4 = vpop.f32.mrb[6].mxu0  ;;  %v930_v6 = vpop.f32.mrb[4].mxu1  ;;  %v600_v7 = vsel %vm568_vm0, %v506_v59, %v584_v62 }
 0x100   :  { %v854_v5 = vpop.f32.mrb[7].mxu0  ;;  %v521_v11 = vpop.f32.mrb[5].mxu1 }
 0x101   :  { %v601_v8 = vsel %vm569_vm1, %v509_v63, %v585_v2  ;;  %v417_v9 = vadd.f32 %v852_v3, %v1163_v50  ;;  %v855_v10 = vadd.f32 %v854_v5, %v853_v4  ;;  %v931_v13 = vpop.f32.mrb[6].mxu1 }
 0x102   :  { %v784_v12 = vpack.c.bf16 %v601_v8, %v600_v7  ;;  %v524_v16 = vpop.f32.mrb[7].mxu1 }
 0x103   :  { %v514_v14 = vadd.f32 %v926_v54, %v417_v9  ;;  %v420_v15 = vadd.f32 %v855_v10, %v1163_v50 }
 0x104   :  { %785 = vst [vmem:[%s1220_s3] sm:$0xff] %v784_v12  }
 0x105   :  { %v586_v17 = vmul.f32 0.2, %v514_v14  ;;  %v517_v18 = vadd.f32 %v927_v58, %v420_v15  ;;  %v856_v19 = vpop.f32.mrb[8].mxu0  ;;  %vm570_vm2 = vcmp.gt.f32.partialorder %v514_v14, 0.0 }
 0x106   :  { %v857_v20 = vpop.f32.mrb[9].mxu0 }
 0x107   :  { %vm571_vm3 = vcmp.gt.f32.partialorder %v517_v18, 0.0  ;;  %v587_v21 = vmul.f32 0.2, %v517_v18  ;;  %v858_v22 = vadd.f32 %v857_v20, %v856_v19  ;;  %v859_v23 = vpop.f32.mrb[10].mxu0  ;;  %v1172_v25 = vpop.f32.mrb[8].mxu1  ;;  %v602_v26 = vsel %vm570_vm2, %v514_v14, %v586_v17 }
 0x108   :  { %v860_v24 = vpop.f32.mrb[11].mxu0  ;;  %v537_v30 = vpop.f32.mrb[9].mxu1 }
 0x109   :  { %v603_v27 = vsel %vm571_vm3, %v517_v18, %v587_v21  ;;  %v861_v28 = vadd.f32 %v860_v24, %v859_v23  ;;  %v425_v29 = vadd.f32 %v858_v22, %v1163_v50  ;;  %v1175_v32 = vpop.f32.mrb[10].mxu1 }
 0x10a   :  { %v789_v31 = vpack.c.bf16 %v603_v27, %v602_v26  ;;  %v540_v35 = vpop.f32.mrb[11].mxu1 }
 0x10b   :  { %v522_v33 = vadd.f32 %v521_v11, %v425_v29  ;;  %v428_v34 = vadd.f32 %v861_v28, %v1163_v50 }
 0x10c   :  { %821 = vst [vmem:[%s1220_s3 + $0x8] sm:$0xff] %v789_v31  }
 0x10d   :  { %v588_v36 = vmul.f32 0.2, %v522_v33  ;;  %v525_v37 = vadd.f32 %v524_v16, %v428_v34  ;;  %v862_v38 = vpop.f32.mrb[12].mxu0  ;;  %vm572_vm4 = vcmp.gt.f32.partialorder %v522_v33, 0.0 }
 0x10e   :  { %v863_v39 = vpop.f32.mrb[13].mxu0 }
 0x10f   :  { %vm573_vm5 = vcmp.gt.f32.partialorder %v525_v37, 0.0  ;;  %v589_v40 = vmul.f32 0.2, %v525_v37  ;;  %v864_v41 = vadd.f32 %v863_v39, %v862_v38  ;;  %v865_v42 = vpop.f32.mrb[14].mxu0  ;;  %v1181_v44 = vpop.f32.mrb[12].mxu1  ;;  %v604_v45 = vsel %vm572_vm4, %v522_v33, %v588_v36 }
 0x110   :  { %v866_v43 = vpop.f32.mrb[15].mxu0  ;;  %v553_v49 = vpop.f32.mrb[13].mxu1 }
 0x111   :  { %v605_v46 = vsel %vm573_vm5, %v525_v37, %v589_v40  ;;  %v433_v47 = vadd.f32 %v864_v41, %v1163_v50  ;;  %v867_v48 = vadd.f32 %v866_v43, %v865_v42  ;;  %v1184_v52 = vpop.f32.mrb[14].mxu1 }
 0x112   :  { %v794_v51 = vpack.c.bf16 %v605_v46, %v604_v45  ;;  %v556_v55 = vpop.f32.mrb[15].mxu1 }
 0x113   :  { %v530_v53 = vadd.f32 %v930_v6, %v433_v47  ;;  %v436_v54 = vadd.f32 %v867_v48, %v1163_v50 }
 0x114   :  { %822 = vst [vmem:[%s1220_s3 + $0x10] sm:$0xff] %v794_v51  }
 0x115   :  { %v590_v56 = vmul.f32 0.2, %v530_v53  ;;  %v533_v57 = vadd.f32 %v931_v13, %v436_v54  ;;  %v868_v58 = vpop.f32.mrb[16].mxu0  ;;  %vm574_vm6 = vcmp.gt.f32.partialorder %v530_v53, 0.0 }
 0x116   :  { %v869_v59 = vpop.f32.mrb[17].mxu0 }
 0x117   :  { %vm575_vm7 = vcmp.gt.f32.partialorder %v533_v57, 0.0  ;;  %v591_v60 = vmul.f32 0.2, %v533_v57  ;;  %v870_v61 = vadd.f32 %v869_v59, %v868_v58  ;;  %v871_v62 = vpop.f32.mrb[18].mxu0  ;;  %v606_v0 = vsel %vm574_vm6, %v530_v53, %v590_v56 }
 0x118   :  { %v872_v63 = vpop.f32.mrb[19].mxu0 }
 0x119   :  { %v607_v1 = vsel %vm575_vm7, %v533_v57, %v591_v60  ;;  %v873_v2 = vadd.f32 %v872_v63, %v871_v62  ;;  %v441_v3 = vadd.f32 %v870_v61, %v1163_v50 }
 0x11a   :  { %v799_v4 = vpack.c.bf16 %v607_v1, %v606_v0 }
 0x11b   :  { %v538_v5 = vadd.f32 %v537_v30, %v441_v3  ;;  %v444_v6 = vadd.f32 %v873_v2, %v1163_v50 }
 0x11c   :  { %823 = vst [vmem:[%s1220_s3 + $0x18] sm:$0xff] %v799_v4  }
 0x11d   :  { %v592_v7 = vmul.f32 0.2, %v538_v5  ;;  %v541_v8 = vadd.f32 %v540_v35, %v444_v6  ;;  %v874_v9 = vpop.f32.mrb[20].mxu0  ;;  %vm576_vm8 = vcmp.gt.f32.partialorder %v538_v5, 0.0 }
 0x11e   :  { %v875_v10 = vpop.f32.mrb[21].mxu0 }
 0x11f   :  { %vm577_vm9 = vcmp.gt.f32.partialorder %v541_v8, 0.0  ;;  %v593_v11 = vmul.f32 0.2, %v541_v8  ;;  %v876_v12 = vadd.f32 %v875_v10, %v874_v9  ;;  %v877_v13 = vpop.f32.mrb[22].mxu0  ;;  %v608_v15 = vsel %vm576_vm8, %v538_v5, %v592_v7 }
 0x120   :  { %v878_v14 = vpop.f32.mrb[23].mxu0 }
 0x121   :  { %v609_v16 = vsel %vm577_vm9, %v541_v8, %v593_v11  ;;  %v449_v17 = vadd.f32 %v876_v12, %v1163_v50  ;;  %v879_v18 = vadd.f32 %v878_v14, %v877_v13 }
 0x122   :  { %v804_v19 = vpack.c.bf16 %v609_v16, %v608_v15 }
 0x123   :  { %v546_v20 = vadd.f32 %v1172_v25, %v449_v17  ;;  %v452_v21 = vadd.f32 %v879_v18, %v1163_v50 }
 0x124   :  { %824 = vst [vmem:[%s1220_s3 + $0x20] sm:$0xff] %v804_v19  }
 0x125   :  { %v594_v22 = vmul.f32 0.2, %v546_v20  ;;  %v549_v23 = vadd.f32 %v1175_v32, %v452_v21  ;;  %v880_v24 = vpop.f32.mrb[24].mxu0  ;;  %vm578_vm10 = vcmp.gt.f32.partialorder %v546_v20, 0.0 }
 0x126   :  { %v881_v26 = vpop.f32.mrb[25].mxu0 }
 0x127   :  { %vm579_vm11 = vcmp.gt.f32.partialorder %v549_v23, 0.0  ;;  %v595_v27 = vmul.f32 0.2, %v549_v23  ;;  %v882_v28 = vadd.f32 %v881_v26, %v880_v24  ;;  %v883_v29 = vpop.f32.mrb[26].mxu0  ;;  %v610_v31 = vsel %vm578_vm10, %v546_v20, %v594_v22 }
 0x128   :  { %v884_v30 = vpop.f32.mrb[27].mxu0 }
 0x129   :  { %v611_v33 = vsel %vm579_vm11, %v549_v23, %v595_v27  ;;  %v885_v25 = vadd.f32 %v884_v30, %v883_v29  ;;  %v457_v34 = vadd.f32 %v882_v28, %v1163_v50 }
 0x12a   :  { %v809_v35 = vpack.c.bf16 %v611_v33, %v610_v31 }
 0x12b   :  { %v554_v36 = vadd.f32 %v553_v49, %v457_v34  ;;  %v460_v37 = vadd.f32 %v885_v25, %v1163_v50 }
 0x12c   :  { %825 = vst [vmem:[%s1220_s3 + $0x28] sm:$0xff] %v809_v35  }
 0x12d   :  { %v596_v32 = vmul.f32 0.2, %v554_v36  ;;  %v557_v38 = vadd.f32 %v556_v55, %v460_v37  ;;  %v886_v39 = vpop.f32.mrb[28].mxu0  ;;  %vm580_vm12 = vcmp.gt.f32.partialorder %v554_v36, 0.0 }
 0x12e   :  { %v887_v40 = vpop.f32.mrb[29].mxu0 }
 0x12f   :  { %vm581_vm13 = vcmp.gt.f32.partialorder %v557_v38, 0.0  ;;  %v597_v41 = vmul.f32 0.2, %v557_v38  ;;  %v888_v42 = vadd.f32 %v887_v40, %v886_v39  ;;  %v889_v43 = vpop.f32.mrb[30].mxu0  ;;  %v612_v46 = vsel %vm580_vm12, %v554_v36, %v596_v32 }
 0x130   :  { %v890_v45 = vpop.f32.mrb[31].mxu0 }
 0x131   :  { %v613_v47 = vsel %vm581_vm13, %v557_v38, %v597_v41  ;;  %v465_v48 = vadd.f32 %v888_v42, %v1163_v50  ;;  %v891_v49 = vadd.f32 %v890_v45, %v889_v43 }
 0x132   :  { %v814_v51 = vpack.c.bf16 %v613_v47, %v612_v46 }
 0x133   :  { %v562_v53 = vadd.f32 %v1181_v44, %v465_v48  ;;  %v468_v54 = vadd.f32 %v891_v49, %v1163_v50 }
 0x134   :  { %826 = vst [vmem:[%s1220_s3 + $0x30] sm:$0xff] %v814_v51  }
 0x135   :  { %v598_v55 = vmul.f32 0.2, %v562_v53  ;;  %v565_v56 = vadd.f32 %v1184_v52, %v468_v54  ;;  %vm582_vm14 = vcmp.gt.f32.partialorder %v562_v53, 0.0 }
 0x137   :  { %vm583_vm15 = vcmp.gt.f32.partialorder %v565_v56, 0.0  ;;  %v599_v57 = vmul.f32 0.2, %v565_v56  ;;  %v614_v58 = vsel %vm582_vm14, %v562_v53, %v598_v55 }
 0x139   :  { %v615_v59 = vsel %vm583_vm15, %v565_v56, %v599_v57 }
 0x13a   :  { %v819_v60 = vpack.c.bf16 %v615_v59, %v614_v58 }
 0x13c   :  { %827 = vst [vmem:[%s1220_s3 + $0x38] sm:$0xff] %v819_v60  }

// kernel: regnet_forward.21
= control target key start
LH: loop header
LB: loop body
LE: loop exit
PB: predicated region body
PF: predicated region fallthrough
CT: control target
= control target key end

     0   :  { %s868_s1 = inlined_call_operand.vmem [shape: bf16[256,128], index: 1, kind: input, shape index: {}]   ;;  %s869_s0 = inlined_call_operand.vmem [shape: bf16[128,256], index: 0, kind: input, shape index: {}]   ;;  %s870_s2 = inlined_call_operand.vmem [shape: f32[1,128], index: 2, kind: input, shape index: {}]   ;;  %s871_s3 = inlined_call_operand.vmem [shape: bf16[128,128], index: 3, kind: output, shape index: {}]  }
   0x1   :  { %v667_v0 = vld [vmem:[%s868_s1 + $0x40] sm:$0xff]   ;;  %v669_v2 = vld [vmem:[%s868_s1 + $0x48] sm:$0xff]   ;;  %v671_v4 = vld [vmem:[%s868_s1 + $0x50] sm:$0xff]  }
   0x2   :  { %v668_v1 = vld [vmem:[%s868_s1] sm:$0xff]   ;;  %587 = vmatprep.subr.bf16.mxu0 %v667_v0  ;;  %651 = vmatprep.subr.bf16.mxu1 %v667_v0  ;;  %v670_v3 = vld [vmem:[%s868_s1 + $0x8] sm:$0xff]   ;;  %v672_v5 = vld [vmem:[%s868_s1 + $0x10] sm:$0xff]  }
   0x3   :  { %588 = vmatpush3.bf16.msra.mxu0 %v668_v1  ;;  %659 = vmatpush3.bf16.msra.mxu1 %v668_v1  ;;  %v673_v6 = vld [vmem:[%s868_s1 + $0x58] sm:$0xff]   ;;  %v675_v8 = vld [vmem:[%s868_s1 + $0x60] sm:$0xff]   ;;  %v677_v10 = vld [vmem:[%s868_s1 + $0x68] sm:$0xff]  }
   0x4   :  { %589 = vmatprep.subr.bf16.mxu0 %v669_v2  ;;  %652 = vmatprep.subr.bf16.mxu1 %v669_v2  ;;  %v674_v7 = vld [vmem:[%s868_s1 + $0x18] sm:$0xff]   ;;  %v676_v9 = vld [vmem:[%s868_s1 + $0x20] sm:$0xff]   ;;  %v678_v13 = vld [vmem:[%s868_s1 + $0x28] sm:$0xff]  }
   0x5   :  { %v685_v11 = vld [vmem:[%s869_s0 + $0x4] ss:$8 sps:$4 sm:$0xff]   ;;  %v679_v14 = vld [vmem:[%s868_s1 + $0x70] sm:$0xff]   ;;  %v681_v16 = vld [vmem:[%s868_s1 + $0x78] sm:$0xff]  }
   0x6   :  { %v688_v12 = vld [vmem:[%s869_s0 + $0x44] ss:$8 sps:$4 sm:$0xff]   ;;  %278 = vmatprep.mubr.bf16.mxu0 %v685_v11  ;;  %v680_v15 = vld [vmem:[%s868_s1 + $0x30] sm:$0xff]   ;;  %v682_v17 = vld [vmem:[%s868_s1 + $0x38] sm:$0xff]  }
   0x7   :  { %590 = vmatpush3.bf16.msra.mxu0 %v670_v3  ;;  %660 = vmatpush3.bf16.msra.mxu1 %v670_v3  ;;  %v683_v18 = vld [vmem:[%s869_s0] ss:$8 sps:$4 sm:$0xff]   ;;  %v689_v20 = vld [vmem:[%s869_s0 + $0x14] ss:$8 sps:$4 sm:$0xff]   ;;  %v693_v22 = vld [vmem:[%s869_s0 + $0x10] ss:$8 sps:$4 sm:$0xff]  }
   0x8   :  { %591 = vmatprep.subr.bf16.mxu0 %v671_v4  ;;  %653 = vmatprep.subr.bf16.mxu1 %v671_v4  ;;  %v686_v19 = vld [vmem:[%s869_s0 + $0x40] ss:$8 sps:$4 sm:$0xff]   ;;  %v691_v21 = vld [vmem:[%s869_s0 + $0x54] ss:$8 sps:$4 sm:$0xff]   ;;  %v694_v23 = vld [vmem:[%s869_s0 + $0x50] ss:$8 sps:$4 sm:$0xff]  }
   0x9   :  { %310 = vmatprep.mubr.bf16.mxu1 %v688_v12  ;;  %v695_v24 = vld [vmem:[%s869_s0 + $0x24] ss:$8 sps:$4 sm:$0xff]   ;;  %v699_v26 = vld [vmem:[%s869_s0 + $0x20] ss:$8 sps:$4 sm:$0xff]   ;;  %v701_v28 = vld [vmem:[%s869_s0 + $0x34] ss:$8 sps:$4 sm:$0xff]  }
   0xa   :  { %v697_v25 = vld [vmem:[%s869_s0 + $0x64] ss:$8 sps:$4 sm:$0xff]   ;;  %v700_v27 = vld [vmem:[%s869_s0 + $0x60] ss:$8 sps:$4 sm:$0xff]   ;;  %v703_v29 = vld [vmem:[%s869_s0 + $0x74] ss:$8 sps:$4 sm:$0xff]  }
   0xb   :  { %592 = vmatpush3.bf16.msra.mxu0 %v672_v5  ;;  %661 = vmatpush3.bf16.msra.mxu1 %v672_v5  ;;  %v705_v30 = vld [vmem:[%s869_s0 + $0x30] ss:$8 sps:$4 sm:$0xff]   ;;  %v826_v34 = vld [vmem:[%s870_s2] ss:$0 sm:$0xff] }
   0xc   :  { %593 = vmatprep.subr.bf16.mxu0 %v673_v6  ;;  %654 = vmatprep.subr.bf16.mxu1 %v673_v6  ;;  %v706_v31 = vld [vmem:[%s869_s0 + $0x70] ss:$8 sps:$4 sm:$0xff]  }
   0xf   :  { %594 = vmatpush3.bf16.msra.mxu0 %v674_v7  ;;  %662 = vmatpush3.bf16.msra.mxu1 %v674_v7 }
  0x10   :  { %595 = vmatprep.subr.bf16.mxu0 %v675_v8  ;;  %655 = vmatprep.subr.bf16.mxu1 %v675_v8 }
  0x13   :  { %596 = vmatpush3.bf16.msra.mxu0 %v676_v9  ;;  %663 = vmatpush3.bf16.msra.mxu1 %v676_v9 }
  0x14   :  { %597 = vmatprep.subr.bf16.mxu0 %v677_v10  ;;  %656 = vmatprep.subr.bf16.mxu1 %v677_v10 }
  0x17   :  { %598 = vmatpush3.bf16.msra.mxu0 %v678_v13  ;;  %664 = vmatpush3.bf16.msra.mxu1 %v678_v13 }
  0x18   :  { %599 = vmatprep.subr.bf16.mxu0 %v679_v14  ;;  %657 = vmatprep.subr.bf16.mxu1 %v679_v14 }
  0x1b   :  { %600 = vmatpush3.bf16.msra.mxu0 %v680_v15  ;;  %665 = vmatpush3.bf16.msra.mxu1 %v680_v15 }
  0x1c   :  { %601 = vmatprep.subr.bf16.mxu0 %v681_v16  ;;  %658 = vmatprep.subr.bf16.mxu1 %v681_v16 }
  0x1f   :  { %602 = vmatpush3.bf16.msra.mxu0 %v682_v17  ;;  %666 = vmatpush3.bf16.msra.mxu1 %v682_v17 }
  0x22   :  { %279 = vmatmul.mubr.bf16.vlgmr.msra.gmra.mrb[0].mxu0 %v683_v18  ;;  %311 = vmatmul.mubr.bf16.vlgmr.msra.gmra.mrb[0].mxu1 %v686_v19 }
  0x23   :  { %286 = vmatprep.mubr.bf16.mxu0 %v689_v20  ;;  %318 = vmatprep.mubr.bf16.mxu1 %v691_v21 }
  0x2a   :  { %287 = vmatmul.mubr.bf16.gmra.mrb[4].mxu0 %v693_v22  ;;  %319 = vmatmul.mubr.bf16.gmra.mrb[4].mxu1 %v694_v23 }
  0x2b   :  { %294 = vmatprep.mubr.bf16.mxu0 %v695_v24  ;;  %326 = vmatprep.mubr.bf16.mxu1 %v697_v25 }
  0x32   :  { %295 = vmatmul.mubr.bf16.gmra.mrb[8].mxu0 %v699_v26  ;;  %327 = vmatmul.mubr.bf16.gmra.mrb[8].mxu1 %v700_v27 }
  0x33   :  { %302 = vmatprep.mubr.bf16.mxu0 %v701_v28  ;;  %334 = vmatprep.mubr.bf16.mxu1 %v703_v29 }
  0x3a   :  { %303 = vmatmul.mubr.bf16.gmra.mrb[12].mxu0 %v705_v30  ;;  %335 = vmatmul.mubr.bf16.gmra.mrb[12].mxu1 %v706_v31 }
  0xf5   :  { %v603_v32 = vpop.f32.mrb[0].mxu0  ;;  %v627_v33 = vpop.f32.mrb[0].mxu1 }
  0xf6   :  { %v604_v35 = vpop.f32.mrb[1].mxu0  ;;  %v628_v36 = vpop.f32.mrb[1].mxu1 }
  0xf7   :  { %v605_v37 = vadd.f32 %v604_v35, %v603_v32  ;;  %v629_v38 = vadd.f32 %v628_v36, %v627_v33  ;;  %v606_v39 = vpop.f32.mrb[2].mxu0  ;;  %v630_v40 = vpop.f32.mrb[2].mxu1 }
  0xf8   :  { %v607_v41 = vpop.f32.mrb[3].mxu0  ;;  %v631_v42 = vpop.f32.mrb[3].mxu1 }
  0xf9   :  { %v281_v43 = vadd.f32 %v605_v37, %v826_v34  ;;  %v313_v44 = vadd.f32 %v629_v38, %v826_v34  ;;  %v608_v45 = vadd.f32 %v607_v41, %v606_v39  ;;  %v632_v46 = vadd.f32 %v631_v42, %v630_v40 }
  0xfb   :  { %v359_v47 = vmul.f32 0.2, %v281_v43  ;;  %v367_v48 = vmul.f32 0.2, %v313_v44  ;;  %vm343_vm0 = vcmp.gt.f32.partialorder %v281_v43, 0.0  ;;  %vm351_vm1 = vcmp.gt.f32.partialorder %v313_v44, 0.0 }
  0xfc   :  { %v284_v49 = vadd.f32 %v608_v45, %v826_v34  ;;  %v316_v50 = vadd.f32 %v632_v46, %v826_v34 }
  0xfd   :  { %v609_v51 = vpop.f32.mrb[4].mxu0  ;;  %v633_v52 = vpop.f32.mrb[4].mxu1  ;;  %v375_v55 = vsel %vm343_vm0, %v281_v43, %v359_v47  ;;  %v383_v56 = vsel %vm351_vm1, %v313_v44, %v367_v48 }
  0xfe   :  { %vm344_vm2 = vcmp.gt.f32.partialorder %v284_v49, 0.0  ;;  %v360_v53 = vmul.f32 0.2, %v284_v49  ;;  %vm352_vm3 = vcmp.gt.f32.partialorder %v316_v50, 0.0  ;;  %v368_v54 = vmul.f32 0.2, %v316_v50 }
  0xff   :  { %v610_v57 = vpop.f32.mrb[5].mxu0  ;;  %v634_v58 = vpop.f32.mrb[5].mxu1 }
 0x100   :  { %v376_v59 = vsel %vm344_vm2, %v284_v49, %v360_v53  ;;  %v384_v60 = vsel %vm352_vm3, %v316_v50, %v368_v54  ;;  %v611_v61 = vadd.f32 %v610_v57, %v609_v51  ;;  %v635_v62 = vadd.f32 %v634_v58, %v633_v52  ;;  %v612_v63 = vpop.f32.mrb[6].mxu0  ;;  %v636_v0 = vpop.f32.mrb[6].mxu1 }
 0x101   :  { %v543_v1 = vpack.c.bf16 %v376_v59, %v375_v55  ;;  %v563_v2 = vpack.c.bf16 %v384_v60, %v383_v56  ;;  %v613_v3 = vpop.f32.mrb[7].mxu0  ;;  %v637_v4 = vpop.f32.mrb[7].mxu1 }
 0x102   :  { %v289_v5 = vadd.f32 %v611_v61, %v826_v34  ;;  %v321_v6 = vadd.f32 %v635_v62, %v826_v34  ;;  %v614_v7 = vadd.f32 %v613_v3, %v612_v63  ;;  %v638_v8 = vadd.f32 %v637_v4, %v636_v0 }
 0x103   :  { %544 = vst [vmem:[%s871_s3] sm:$0xff] %v543_v1   ;;  %583 = vst [vmem:[%s871_s3 + $0x20] sm:$0xff] %v563_v2  }
 0x104   :  { %v361_v9 = vmul.f32 0.2, %v289_v5  ;;  %v369_v10 = vmul.f32 0.2, %v321_v6  ;;  %v292_v11 = vadd.f32 %v614_v7, %v826_v34  ;;  %v324_v12 = vadd.f32 %v638_v8, %v826_v34 }
 0x105   :  { %v615_v13 = vpop.f32.mrb[8].mxu0  ;;  %v639_v14 = vpop.f32.mrb[8].mxu1  ;;  %vm345_vm4 = vcmp.gt.f32.partialorder %v289_v5, 0.0  ;;  %vm353_vm5 = vcmp.gt.f32.partialorder %v321_v6, 0.0 }
 0x106   :  { %v616_v15 = vpop.f32.mrb[9].mxu0  ;;  %v640_v16 = vpop.f32.mrb[9].mxu1  ;;  %vm346_vm6 = vcmp.gt.f32.partialorder %v292_v11, 0.0  ;;  %v362_v17 = vmul.f32 0.2, %v292_v11  ;;  %vm354_vm7 = vcmp.gt.f32.partialorder %v324_v12, 0.0  ;;  %v377_v23 = vsel %vm345_vm4, %v289_v5, %v361_v9 }
 0x107   :  { %v370_v18 = vmul.f32 0.2, %v324_v12  ;;  %v617_v19 = vadd.f32 %v616_v15, %v615_v13  ;;  %v641_v20 = vadd.f32 %v640_v16, %v639_v14  ;;  %v618_v21 = vpop.f32.mrb[10].mxu0  ;;  %v642_v22 = vpop.f32.mrb[10].mxu1  ;;  %v385_v24 = vsel %vm353_vm5, %v321_v6, %v369_v10 }
 0x108   :  { %v378_v25 = vsel %vm346_vm6, %v292_v11, %v362_v17  ;;  %v619_v27 = vpop.f32.mrb[11].mxu0  ;;  %v643_v28 = vpop.f32.mrb[11].mxu1 }
 0x109   :  { %v386_v26 = vsel %vm354_vm7, %v324_v12, %v370_v18  ;;  %v548_v29 = vpack.c.bf16 %v378_v25, %v377_v23  ;;  %v297_v31 = vadd.f32 %v617_v19, %v826_v34  ;;  %v329_v32 = vadd.f32 %v641_v20, %v826_v34 }
 0x10a   :  { %v568_v30 = vpack.c.bf16 %v386_v26, %v385_v24  ;;  %v620_v33 = vadd.f32 %v619_v27, %v618_v21  ;;  %v644_v35 = vadd.f32 %v643_v28, %v642_v22 }
 0x10b   :  { %580 = vst [vmem:[%s871_s3 + $0x8] sm:$0xff] %v548_v29   ;;  %v363_v36 = vmul.f32 0.2, %v297_v31  ;;  %v371_v37 = vmul.f32 0.2, %v329_v32  ;;  %vm347_vm8 = vcmp.gt.f32.partialorder %v297_v31, 0.0 }
 0x10c   :  { %584 = vst [vmem:[%s871_s3 + $0x28] sm:$0xff] %v568_v30   ;;  %v300_v38 = vadd.f32 %v620_v33, %v826_v34  ;;  %v332_v39 = vadd.f32 %v644_v35, %v826_v34  ;;  %vm355_vm9 = vcmp.gt.f32.partialorder %v329_v32, 0.0 }
 0x10d   :  { %v621_v40 = vpop.f32.mrb[12].mxu0  ;;  %v645_v41 = vpop.f32.mrb[12].mxu1  ;;  %v379_v50 = vsel %vm347_vm8, %v297_v31, %v363_v36  ;;  %v387_v51 = vsel %vm355_vm9, %v329_v32, %v371_v37 }
 0x10e   :  { %v622_v42 = vpop.f32.mrb[13].mxu0  ;;  %v646_v43 = vpop.f32.mrb[13].mxu1  ;;  %vm348_vm10 = vcmp.gt.f32.partialorder %v300_v38, 0.0  ;;  %v364_v44 = vmul.f32 0.2, %v300_v38  ;;  %vm356_vm11 = vcmp.gt.f32.partialorder %v332_v39, 0.0 }
 0x10f   :  { %v372_v45 = vmul.f32 0.2, %v332_v39  ;;  %v623_v46 = vadd.f32 %v622_v42, %v621_v40  ;;  %v647_v47 = vadd.f32 %v646_v43, %v645_v41  ;;  %v624_v48 = vpop.f32.mrb[14].mxu0  ;;  %v648_v49 = vpop.f32.mrb[14].mxu1 }
 0x110   :  { %v380_v52 = vsel %vm348_vm10, %v300_v38, %v364_v44  ;;  %v625_v54 = vpop.f32.mrb[15].mxu0  ;;  %v649_v55 = vpop.f32.mrb[15].mxu1 }
 0x111   :  { %v388_v53 = vsel %vm356_vm11, %v332_v39, %v372_v45  ;;  %v553_v56 = vpack.c.bf16 %v380_v52, %v379_v50  ;;  %v305_v58 = vadd.f32 %v623_v46, %v826_v34  ;;  %v337_v59 = vadd.f32 %v647_v47, %v826_v34 }
 0x112   :  { %v573_v57 = vpack.c.bf16 %v388_v53, %v387_v51  ;;  %v626_v60 = vadd.f32 %v625_v54, %v624_v48  ;;  %v650_v61 = vadd.f32 %v649_v55, %v648_v49 }
 0x113   :  { %581 = vst [vmem:[%s871_s3 + $0x10] sm:$0xff] %v553_v56   ;;  %v365_v62 = vmul.f32 0.2, %v305_v58  ;;  %v373_v63 = vmul.f32 0.2, %v337_v59  ;;  %vm349_vm12 = vcmp.gt.f32.partialorder %v305_v58, 0.0 }
 0x114   :  { %585 = vst [vmem:[%s871_s3 + $0x30] sm:$0xff] %v573_v57   ;;  %v308_v0 = vadd.f32 %v626_v60, %v826_v34  ;;  %v340_v1 = vadd.f32 %v650_v61, %v826_v34  ;;  %vm357_vm13 = vcmp.gt.f32.partialorder %v337_v59, 0.0 }
 0x115   :  { %v381_v4 = vsel %vm349_vm12, %v305_v58, %v365_v62  ;;  %v389_v5 = vsel %vm357_vm13, %v337_v59, %v373_v63 }
 0x116   :  { %vm350_vm14 = vcmp.gt.f32.partialorder %v308_v0, 0.0  ;;  %v366_v2 = vmul.f32 0.2, %v308_v0  ;;  %vm358_vm15 = vcmp.gt.f32.partialorder %v340_v1, 0.0  ;;  %v374_v3 = vmul.f32 0.2, %v340_v1 }
 0x118   :  { %v382_v6 = vsel %vm350_vm14, %v308_v0, %v366_v2  ;;  %v390_v7 = vsel %vm358_vm15, %v340_v1, %v374_v3 }
 0x119   :  { %v558_v8 = vpack.c.bf16 %v382_v6, %v381_v4  ;;  %v578_v9 = vpack.c.bf16 %v390_v7, %v389_v5 }
 0x11b   :  { %582 = vst [vmem:[%s871_s3 + $0x18] sm:$0xff] %v558_v8   ;;  %586 = vst [vmem:[%s871_s3 + $0x38] sm:$0xff] %v578_v9  }

// kernel: regnet_forward.22
= control target key start
LH: loop header
LB: loop body
LE: loop exit
PB: predicated region body
PF: predicated region fallthrough
CT: control target
= control target key end

     0   :  { %s660_s1 = inlined_call_operand.vmem [shape: f32[256,128], index: 1, kind: input, shape index: {}]   ;;  %s661_s0 = inlined_call_operand.vmem [shape: f32[128,256], index: 0, kind: input, shape index: {}]   ;;  %s662_s2 = inlined_call_operand.vmem [shape: f32[1,128], index: 2, kind: input, shape index: {}]   ;;  %s663_s3 = inlined_call_operand.vmem [shape: f32[128,128], index: 3, kind: output, shape index: {}]  }
   0x1   :  { %v62_v0 = vld [vmem:[%s660_s1 + $0x80] sm:$0xff]  ;;  %v63_v1 = vld [vmem:[%s660_s1 + $0x88] sm:$0xff]  ;;  %v64_v5 = vld [vmem:[%s660_s1 + $0x90] sm:$0xff] }
   0x2   :  { %v46_v2 = vld [vmem:[%s660_s1] sm:$0xff]  ;;  %v331_v3 = vpack.c.bf16 %v63_v1, %v62_v0  ;;  %v47_v4 = vld [vmem:[%s660_s1 + $0x8] sm:$0xff]  ;;  %v65_v6 = vld [vmem:[%s660_s1 + $0x98] sm:$0xff] }
   0x3   :  { %v333_v7 = vpack.c.bf16 %v47_v4, %v46_v2  ;;  %v335_v8 = vpack.c.bf16 %v65_v6, %v64_v5  ;;  %v48_v9 = vld [vmem:[%s660_s1 + $0x10] sm:$0xff]  ;;  %v49_v10 = vld [vmem:[%s660_s1 + $0x18] sm:$0xff]  ;;  %v66_v11 = vld [vmem:[%s660_s1 + $0xa0] sm:$0xff] }
   0x4   :  { %332 = vmatprep.subr.bf16.mxu0 %v331_v3  ;;  %363 = vmatprep.subr.bf16.mxu1 %v331_v3  ;;  %v67_v12 = vld [vmem:[%s660_s1 + $0xa8] sm:$0xff]  ;;  %v337_v13 = vpack.c.bf16 %v49_v10, %v48_v9  ;;  %v50_v15 = vld [vmem:[%s660_s1 + $0x20] sm:$0xff]  ;;  %v68_v17 = vld [vmem:[%s660_s1 + $0xb0] sm:$0xff] }
   0x5   :  { %334 = vmatpush3.bf16.msra.mxu0 %v333_v7  ;;  %371 = vmatpush3.bf16.msra.mxu1 %v333_v7  ;;  %v339_v14 = vpack.c.bf16 %v67_v12, %v66_v11  ;;  %v51_v16 = vld [vmem:[%s660_s1 + $0x28] sm:$0xff]  ;;  %v69_v18 = vld [vmem:[%s660_s1 + $0xb8] sm:$0xff]  ;;  %v52_v21 = vld [vmem:[%s660_s1 + $0x30] sm:$0xff] }
   0x6   :  { %336 = vmatprep.subr.bf16.mxu0 %v335_v8  ;;  %364 = vmatprep.subr.bf16.mxu1 %v335_v8  ;;  %v341_v19 = vpack.c.bf16 %v51_v16, %v50_v15  ;;  %v343_v20 = vpack.c.bf16 %v69_v18, %v68_v17  ;;  %v53_v22 = vld [vmem:[%s660_s1 + $0x38] sm:$0xff]  ;;  %v70_v23 = vld [vmem:[%s660_s1 + $0xc0] sm:$0xff]  ;;  %v71_v24 = vld [vmem:[%s660_s1 + $0xc8] sm:$0xff] }
   0x7   :  { %v15_v25 = vld [vmem:[%s661_s0 + $0x8] sm:$0xff]  ;;  %v345_v27 = vpack.c.bf16 %v53_v22, %v52_v21  ;;  %v347_v28 = vpack.c.bf16 %v71_v24, %v70_v23  ;;  %v54_v29 = vld [vmem:[%s660_s1 + $0x40] sm:$0xff]  ;;  %v72_v31 = vld [vmem:[%s660_s1 + $0xd0] sm:$0xff] }
   0x8   :  { %149 = vmatprep.mubr.f32.mxu0 %v15_v25  ;;  %v31_v26 = vld [vmem:[%s661_s0 + $0x88] sm:$0xff]  ;;  %v73_v32 = vld [vmem:[%s660_s1 + $0xd8] sm:$0xff]  ;;  %v56_v35 = vld [vmem:[%s660_s1 + $0x50] sm:$0xff] }
   0x9   :  { %338 = vmatpush3.bf16.msra.mxu0 %v337_v13  ;;  %372 = vmatpush3.bf16.msra.mxu1 %v337_v13  ;;  %v55_v30 = vld [vmem:[%s660_s1 + $0x48] sm:$0xff]  ;;  %v351_v34 = vpack.c.bf16 %v73_v32, %v72_v31  ;;  %v57_v36 = vld [vmem:[%s660_s1 + $0x58] sm:$0xff]  ;;  %v74_v37 = vld [vmem:[%s660_s1 + $0xe0] sm:$0xff] }
   0xa   :  { %340 = vmatprep.subr.bf16.mxu0 %v339_v14  ;;  %365 = vmatprep.subr.bf16.mxu1 %v339_v14  ;;  %v349_v33 = vpack.c.bf16 %v55_v30, %v54_v29  ;;  %v75_v38 = vld [vmem:[%s660_s1 + $0xe8] sm:$0xff]  ;;  %v353_v39 = vpack.c.bf16 %v57_v36, %v56_v35  ;;  %v58_v41 = vld [vmem:[%s660_s1 + $0x60] sm:$0xff]  ;;  %v76_v43 = vld [vmem:[%s660_s1 + $0xf0] sm:$0xff] }
   0xb   :  { %189 = vmatprep.mubr.f32.mxu1 %v31_v26  ;;  %v355_v40 = vpack.c.bf16 %v75_v38, %v74_v37  ;;  %v59_v42 = vld [vmem:[%s660_s1 + $0x68] sm:$0xff]  ;;  %v77_v44 = vld [vmem:[%s660_s1 + $0xf8] sm:$0xff]  ;;  %v60_v47 = vld [vmem:[%s660_s1 + $0x70] sm:$0xff] }
   0xc   :  { %v357_v45 = vpack.c.bf16 %v59_v42, %v58_v41  ;;  %v359_v46 = vpack.c.bf16 %v77_v44, %v76_v43  ;;  %v61_v48 = vld [vmem:[%s660_s1 + $0x78] sm:$0xff]  ;;  %v14_v50 = vld [vmem:[%s661_s0] sm:$0xff]  ;;  %v16_v54 = vld [vmem:[%s661_s0 + $0x10] sm:$0xff] }
   0xd   :  { %342 = vmatpush3.bf16.msra.mxu0 %v341_v19  ;;  %373 = vmatpush3.bf16.msra.mxu1 %v341_v19  ;;  %v361_v49 = vpack.c.bf16 %v61_v48, %v60_v47  ;;  %v30_v51 = vld [vmem:[%s661_s0 + $0x80] sm:$0xff]  ;;  %v17_v52 = vld [vmem:[%s661_s0 + $0x18] sm:$0xff]  ;;  %v32_v55 = vld [vmem:[%s661_s0 + $0x90] sm:$0xff] }
   0xe   :  { %344 = vmatprep.subr.bf16.mxu0 %v343_v20  ;;  %366 = vmatprep.subr.bf16.mxu1 %v343_v20  ;;  %v33_v53 = vld [vmem:[%s661_s0 + $0x98] sm:$0xff]  ;;  %v19_v56 = vld [vmem:[%s661_s0 + $0x28] sm:$0xff]  ;;  %v18_v58 = vld [vmem:[%s661_s0 + $0x20] sm:$0xff] }
   0xf   :  { %v35_v57 = vld [vmem:[%s661_s0 + $0xa8] sm:$0xff]  ;;  %v34_v59 = vld [vmem:[%s661_s0 + $0xa0] sm:$0xff]  ;;  %v21_v60 = vld [vmem:[%s661_s0 + $0x38] sm:$0xff] }
  0x10   :  { %v37_v61 = vld [vmem:[%s661_s0 + $0xb8] sm:$0xff]  ;;  %v20_v62 = vld [vmem:[%s661_s0 + $0x30] sm:$0xff]  ;;  %v23_v0 = vld [vmem:[%s661_s0 + $0x48] sm:$0xff] }
  0x11   :  { %346 = vmatpush3.bf16.msra.mxu0 %v345_v27  ;;  %374 = vmatpush3.bf16.msra.mxu1 %v345_v27  ;;  %v36_v63 = vld [vmem:[%s661_s0 + $0xb0] sm:$0xff]  ;;  %v39_v1 = vld [vmem:[%s661_s0 + $0xc8] sm:$0xff]  ;;  %v22_v2 = vld [vmem:[%s661_s0 + $0x40] sm:$0xff] }
  0x12   :  { %348 = vmatprep.subr.bf16.mxu0 %v347_v28  ;;  %367 = vmatprep.subr.bf16.mxu1 %v347_v28  ;;  %v38_v3 = vld [vmem:[%s661_s0 + $0xc0] sm:$0xff]  ;;  %v25_v4 = vld [vmem:[%s661_s0 + $0x58] sm:$0xff]  ;;  %v24_v6 = vld [vmem:[%s661_s0 + $0x50] sm:$0xff] }
  0x13   :  { %v41_v5 = vld [vmem:[%s661_s0 + $0xd8] sm:$0xff]  ;;  %v40_v7 = vld [vmem:[%s661_s0 + $0xd0] sm:$0xff]  ;;  %v27_v8 = vld [vmem:[%s661_s0 + $0x68] sm:$0xff] }
  0x14   :  { %v43_v9 = vld [vmem:[%s661_s0 + $0xe8] sm:$0xff]  ;;  %v26_v10 = vld [vmem:[%s661_s0 + $0x60] sm:$0xff]  ;;  %v29_v12 = vld [vmem:[%s661_s0 + $0x78] sm:$0xff] }
  0x15   :  { %350 = vmatpush3.bf16.msra.mxu0 %v349_v33  ;;  %375 = vmatpush3.bf16.msra.mxu1 %v349_v33  ;;  %v42_v11 = vld [vmem:[%s661_s0 + $0xe0] sm:$0xff]  ;;  %v45_v13 = vld [vmem:[%s661_s0 + $0xf8] sm:$0xff]  ;;  %v28_v14 = vld [vmem:[%s661_s0 + $0x70] sm:$0xff] }
  0x16   :  { %352 = vmatprep.subr.bf16.mxu0 %v351_v34  ;;  %368 = vmatprep.subr.bf16.mxu1 %v351_v34  ;;  %v44_v15 = vld [vmem:[%s661_s0 + $0xf0] sm:$0xff]  ;;  %v594_v18 = vld [vmem:[%s662_s2] ss:$0 sm:$0xff] }
  0x19   :  { %354 = vmatpush3.bf16.msra.mxu0 %v353_v39  ;;  %376 = vmatpush3.bf16.msra.mxu1 %v353_v39 }
  0x1a   :  { %356 = vmatprep.subr.bf16.mxu0 %v355_v40  ;;  %369 = vmatprep.subr.bf16.mxu1 %v355_v40 }
  0x1d   :  { %358 = vmatpush3.bf16.msra.mxu0 %v357_v45  ;;  %377 = vmatpush3.bf16.msra.mxu1 %v357_v45 }
  0x1e   :  { %360 = vmatprep.subr.bf16.mxu0 %v359_v46  ;;  %370 = vmatprep.subr.bf16.mxu1 %v359_v46 }
  0x21   :  { %362 = vmatpush3.bf16.msra.mxu0 %v361_v49  ;;  %378 = vmatpush3.bf16.msra.mxu1 %v361_v49 }
  0x24   :  { %150 = vmatmul.mubr.f32.vlgmr.msra.gmra.mrb[0].mxu0 %v14_v50  ;;  %190 = vmatmul.mubr.f32.vlgmr.msra.gmra.mrb[0].mxu1 %v30_v51 }
  0x25   :  { %154 = vmatprep.mubr.f32.mxu0 %v17_v52  ;;  %194 = vmatprep.mubr.f32.mxu1 %v33_v53 }
  0x28   :  { %155 = vmatmul.mubr.f32.gmra.mrb[2].mxu0 %v16_v54  ;;  %195 = vmatmul.mubr.f32.gmra.mrb[2].mxu1 %v32_v55 }
  0x29   :  { %159 = vmatprep.mubr.f32.mxu0 %v19_v56  ;;  %199 = vmatprep.mubr.f32.mxu1 %v35_v57 }
  0x2c   :  { %160 = vmatmul.mubr.f32.gmra.mrb[4].mxu0 %v18_v58  ;;  %200 = vmatmul.mubr.f32.gmra.mrb[4].mxu1 %v34_v59 }
  0x2d   :  { %164 = vmatprep.mubr.f32.mxu0 %v21_v60  ;;  %204 = vmatprep.mubr.f32.mxu1 %v37_v61 }
  0x30   :  { %165 = vmatmul.mubr.f32.gmra.mrb[6].mxu0 %v20_v62  ;;  %205 = vmatmul.mubr.f32.gmra.mrb[6].mxu1 %v36_v63 }
  0x31   :  { %169 = vmatprep.mubr.f32.mxu0 %v23_v0  ;;  %209 = vmatprep.mubr.f32.mxu1 %v39_v1 }
  0x34   :  { %170 = vmatmul.mubr.f32.gmra.mrb[8].mxu0 %v22_v2  ;;  %210 = vmatmul.mubr.f32.gmra.mrb[8].mxu1 %v38_v3 }
  0x35   :  { %174 = vmatprep.mubr.f32.mxu0 %v25_v4  ;;  %214 = vmatprep.mubr.f32.mxu1 %v41_v5 }
  0x38   :  { %175 = vmatmul.mubr.f32.gmra.mrb[10].mxu0 %v24_v6  ;;  %215 = vmatmul.mubr.f32.gmra.mrb[10].mxu1 %v40_v7 }
  0x39   :  { %179 = vmatprep.mubr.f32.mxu0 %v27_v8  ;;  %219 = vmatprep.mubr.f32.mxu1 %v43_v9 }
  0x3c   :  { %180 = vmatmul.mubr.f32.gmra.mrb[12].mxu0 %v26_v10  ;;  %220 = vmatmul.mubr.f32.gmra.mrb[12].mxu1 %v42_v11 }
  0x3d   :  { %184 = vmatprep.mubr.f32.mxu0 %v29_v12  ;;  %224 = vmatprep.mubr.f32.mxu1 %v45_v13 }
  0x40   :  { %185 = vmatmul.mubr.f32.gmra.mrb[14].mxu0 %v28_v14  ;;  %225 = vmatmul.mubr.f32.gmra.mrb[14].mxu1 %v44_v15 }
  0xf7   :  { %v283_v16 = vpop.f32.mrb[0].mxu0  ;;  %v307_v17 = vpop.f32.mrb[0].mxu1 }
  0xf8   :  { %v284_v19 = vpop.f32.mrb[1].mxu0  ;;  %v308_v20 = vpop.f32.mrb[1].mxu1 }
  0xf9   :  { %v285_v21 = vadd.f32 %v284_v19, %v283_v16  ;;  %v309_v22 = vadd.f32 %v308_v20, %v307_v17 }
  0xfb   :  { %v152_v23 = vadd.f32 %v285_v21, %v594_v18  ;;  %v192_v24 = vadd.f32 %v309_v22, %v594_v18  ;;  %v286_v25 = vpop.f32.mrb[2].mxu0  ;;  %v310_v26 = vpop.f32.mrb[2].mxu1 }
  0xfc   :  { %v287_v27 = vpop.f32.mrb[3].mxu0  ;;  %v311_v28 = vpop.f32.mrb[3].mxu1 }
  0xfd   :  { %230 = vst [vmem:[%s663_s3] sm:$0xff] %v152_v23  ;;  %238 = vst [vmem:[%s663_s3 + $0x40] sm:$0xff] %v192_v24  ;;  %v288_v29 = vadd.f32 %v287_v27, %v286_v25  ;;  %v312_v30 = vadd.f32 %v311_v28, %v310_v26 }
  0xff   :  { %v157_v31 = vadd.f32 %v288_v29, %v594_v18  ;;  %v197_v32 = vadd.f32 %v312_v30, %v594_v18  ;;  %v289_v33 = vpop.f32.mrb[4].mxu0  ;;  %v313_v34 = vpop.f32.mrb[4].mxu1 }
 0x100   :  { %v290_v35 = vpop.f32.mrb[5].mxu0  ;;  %v314_v36 = vpop.f32.mrb[5].mxu1 }
 0x101   :  { %231 = vst [vmem:[%s663_s3 + $0x8] sm:$0xff] %v157_v31  ;;  %239 = vst [vmem:[%s663_s3 + $0x48] sm:$0xff] %v197_v32  ;;  %v291_v37 = vadd.f32 %v290_v35, %v289_v33  ;;  %v315_v38 = vadd.f32 %v314_v36, %v313_v34 }
 0x103   :  { %v162_v39 = vadd.f32 %v291_v37, %v594_v18  ;;  %v202_v40 = vadd.f32 %v315_v38, %v594_v18  ;;  %v292_v41 = vpop.f32.mrb[6].mxu0  ;;  %v316_v42 = vpop.f32.mrb[6].mxu1 }
 0x104   :  { %v293_v43 = vpop.f32.mrb[7].mxu0  ;;  %v317_v44 = vpop.f32.mrb[7].mxu1 }
 0x105   :  { %232 = vst [vmem:[%s663_s3 + $0x10] sm:$0xff] %v162_v39  ;;  %240 = vst [vmem:[%s663_s3 + $0x50] sm:$0xff] %v202_v40  ;;  %v294_v45 = vadd.f32 %v293_v43, %v292_v41  ;;  %v318_v46 = vadd.f32 %v317_v44, %v316_v42 }
 0x107   :  { %v167_v47 = vadd.f32 %v294_v45, %v594_v18  ;;  %v207_v48 = vadd.f32 %v318_v46, %v594_v18  ;;  %v295_v49 = vpop.f32.mrb[8].mxu0  ;;  %v319_v50 = vpop.f32.mrb[8].mxu1 }
 0x108   :  { %v296_v51 = vpop.f32.mrb[9].mxu0  ;;  %v320_v52 = vpop.f32.mrb[9].mxu1 }
 0x109   :  { %233 = vst [vmem:[%s663_s3 + $0x18] sm:$0xff] %v167_v47  ;;  %241 = vst [vmem:[%s663_s3 + $0x58] sm:$0xff] %v207_v48  ;;  %v297_v53 = vadd.f32 %v296_v51, %v295_v49  ;;  %v321_v54 = vadd.f32 %v320_v52, %v319_v50 }
 0x10b   :  { %v172_v55 = vadd.f32 %v297_v53, %v594_v18  ;;  %v212_v56 = vadd.f32 %v321_v54, %v594_v18  ;;  %v298_v57 = vpop.f32.mrb[10].mxu0  ;;  %v322_v58 = vpop.f32.mrb[10].mxu1 }
 0x10c   :  { %v299_v59 = vpop.f32.mrb[11].mxu0  ;;  %v323_v60 = vpop.f32.mrb[11].mxu1 }
 0x10d   :  { %234 = vst [vmem:[%s663_s3 + $0x20] sm:$0xff] %v172_v55  ;;  %242 = vst [vmem:[%s663_s3 + $0x60] sm:$0xff] %v212_v56  ;;  %v300_v61 = vadd.f32 %v299_v59, %v298_v57  ;;  %v324_v62 = vadd.f32 %v323_v60, %v322_v58 }
 0x10f   :  { %v177_v63 = vadd.f32 %v300_v61, %v594_v18  ;;  %v217_v0 = vadd.f32 %v324_v62, %v594_v18  ;;  %v301_v1 = vpop.f32.mrb[12].mxu0  ;;  %v325_v2 = vpop.f32.mrb[12].mxu1 }
 0x110   :  { %v302_v3 = vpop.f32.mrb[13].mxu0  ;;  %v326_v4 = vpop.f32.mrb[13].mxu1 }
 0x111   :  { %235 = vst [vmem:[%s663_s3 + $0x28] sm:$0xff] %v177_v63  ;;  %243 = vst [vmem:[%s663_s3 + $0x68] sm:$0xff] %v217_v0  ;;  %v303_v5 = vadd.f32 %v302_v3, %v301_v1  ;;  %v327_v6 = vadd.f32 %v326_v4, %v325_v2 }
 0x113   :  { %v182_v7 = vadd.f32 %v303_v5, %v594_v18  ;;  %v222_v8 = vadd.f32 %v327_v6, %v594_v18  ;;  %v304_v9 = vpop.f32.mrb[14].mxu0  ;;  %v328_v10 = vpop.f32.mrb[14].mxu1 }
 0x114   :  { %v305_v11 = vpop.f32.mrb[15].mxu0  ;;  %v329_v12 = vpop.f32.mrb[15].mxu1 }
 0x115   :  { %236 = vst [vmem:[%s663_s3 + $0x30] sm:$0xff] %v182_v7  ;;  %244 = vst [vmem:[%s663_s3 + $0x70] sm:$0xff] %v222_v8  ;;  %v306_v13 = vadd.f32 %v305_v11, %v304_v9  ;;  %v330_v14 = vadd.f32 %v329_v12, %v328_v10 }
 0x117   :  { %v187_v15 = vadd.f32 %v306_v13, %v594_v18  ;;  %v227_v16 = vadd.f32 %v330_v14, %v594_v18 }
 0x119   :  { %237 = vst [vmem:[%s663_s3 + $0x38] sm:$0xff] %v187_v15  ;;  %245 = vst [vmem:[%s663_s3 + $0x78] sm:$0xff] %v227_v16 }

// kernel: regnet_forward.23
= control target key start
LH: loop header
LB: loop body
LE: loop exit
PB: predicated region body
PF: predicated region fallthrough
CT: control target
= control target key end

     0   :  { %9 = vsyncpa [#allocation5], 0  ;;  %s2708_s0 = inlined_call_operand.vmem [shape: f32[2,32,16], index: 0, kind: input, shape index: {}]   ;;  %s2709_s1 = inlined_call_operand.vmem [shape: f32[2,16,16], index: 1, kind: input, shape index: {}]   ;;  %s2710_s2 = inlined_call_operand.hbm [shape: f32[2,32,16], index: 2, kind: output, shape index: {0}]   ;;  %s2711_s3 = inlined_call_operand.hbm [shape: f32[2,16,16], index: 3, kind: output, shape index: {1}]  }
   0x1   :  { %11 = vsyncpa [#allocation5 + $0x1], 0 }
   0x2   :  { %12 = vsyncpa [#allocation7], 0 }
   0x3   :  { %14 = vsyncpa [#allocation7 + $0x1], 0  ;;  %s2305_s12 = smov 0   ;;  %s2307_s13 = smov 0  }
   0x4   :  { %s2309_s14 = smov 0   ;;  %s2311_s15 = smov 0  }
   0x5 LB: > { %s2326_s16 = sadd.s32 4294967295, %s2247_s15   ;;  %s1775_s17 = sadd.s32 4294967294, %s2247_s15   ;;  %s2247_s15 = sphi %s2311_s15, %s2717_s15   ;;  %s2243_s14 = sphi %s2309_s14, %s2716_s14   ;;  %s2239_s13 = sphi %s2307_s13, %s2715_s13   ;;  %s2235_s12 = sphi %s2305_s12, %s2714_s12  }
   0x6   : > { %s2330_s18 = sadd.s32 1, %s2247_s15   ;;  %s79_s19 = sadd.s32 1, %s2243_s14 }
   0x7   : > { %s76_s20 = ssub.s32 %s2247_s15, %s2330_s18  ;;  %p89_p0 = scmp.ne.s32.totalorder %s2243_s14, %s2239_s13 }
   0x8   : > { %p77_p1 = scmp.eq.s32.totalorder %s76_s20, 0  ;;  %p90_p2 = scmp.eq.s32.totalorder %s2326_s16, 1 }
   0x9   : > { %p95_p3 = scmp.ne.s32.totalorder %s2239_s13, %s2235_s12  ;;  %p96_p4 = scmp.eq.s32.totalorder %s1775_s17, 1 }
   0xa   : > { %s2341_s21 = scalar_select %p77_p1, %s2243_s14, %s79_s19  }
   0xb   : > { %p2343_p5 = por %p90_p2, %p89_p0  ;;  %p2347_p6 = por %p96_p4, %p95_p3 }
   0xc   : > { %p1778_p7 = scmp.ge.s32.totalorder %s2247_s15, 1  ;;  %p156_p8 = scmp.lt.s32.totalorder %s2247_s15, 3 }
   0xe   : > { %p157_p9 = pnand %p1778_p7, %p156_p8 }
   0xf   : > { %s2354_s24 = sand.u32 (!%p157_p9), 1, %s2239_s13   ;;  %p190_p10 = scmp.lt.s32.totalorder (!%p157_p9), %s2326_s16, 1  ;;  %v200_v0 = vlaneseq (!%p157_p9)  ;;  %vm216_vm0 = vcmask (!%p157_p9), 130048  }
  0x10   : > { %160 = sbr.rel (%p157_p9) target bundleno = 2143 (0x85f), region = 28  ;;  %s1779_s25 = sshll.u32 (!%p157_p9), %s2354_s24, 5 }
  0x11   : > { %s1780_s26 = sshll.u32 (!%p157_p9), %s2354_s24, 4  ;;  %v2359_v1 = vshrl.u32 (!%p157_p9), %v200_v0, 7  ;;  %v206_v2 = vand.u32 (!%p157_p9), 127, %v200_v0  ;;  %s2382_s9 = scalar_lea.vmem (!%p157_p9), [#allocation4], %s1779_s25 }
  0x12   : > { %s2384_s10 = scalar_lea.vmem (!%p157_p9), [#allocation6], %s1780_s26  ;;  %s2386_s11 = smov (!%p157_p9), 0  }
  0x13   : > { %v202_v3 = vadd.s32 (!%p157_p9), 8, %v2359_v1  ;;  %v2364_v4 = vcvt.s32.f32 (!%p157_p9), %v2359_v1  ;;  %v2366_v5 = vcvt.s32.f32 (!%p157_p9), %v206_v2 }
  0x15   : > { %v2376_v6 = vcvt.s32.f32 (!%p157_p9), %v202_v3 }
  0x17   : > { %s191_s27 = scalar_select %p190_p10, %s2326_s16, 1 }
  0x19   : > { %s1838_s28 = sshll.u32 %s191_s27, 5  ;;  %s1839_s29 = sshll.u32 %s191_s27, 4 }
  0x1a   : > { %s194_s5 = scalar_lea.vmem %s2708_s0, %s1838_s28  ;;  %s2374_s8 = scalar_lea.vmem %s2709_s1, %s1839_s29 }
  0x1b   : > { %v208_v7 = vld [vmem:[%s194_s5] sm:$0xff]  ;;  %v209_v8 = vld [vmem:[%s194_s5 + $0x8] sm:$0xff]  ;;  %v210_v9 = vld [vmem:[%s194_s5 + $0x10] sm:$0xff] }
  0x1c   : > { %v212_v10 = vmul.f32 0.0078125, %v208_v7  ;;  %v213_v11 = vmul.f32 0.0078125, %v209_v8  ;;  %v214_v12 = vmul.f32 0.0078125, %v210_v9  ;;  %v211_v13 = vld [vmem:[%s194_s5 + $0x18] sm:$0xff] }
  0x1d   : > { %v215_v14 = vmul.f32 0.0078125, %v211_v13 }
  0x1e   : > { %217 = vst.msk [vmem:[#allocation2] sm:$0xff] %vm216_vm0, %v212_v10  ;;  %218 = vst.msk [vmem:[#allocation2 + $0x8] sm:$0xff] %vm216_vm0, %v213_v11 }
  0x1f   : > { %219 = vst.msk [vmem:[#allocation2 + $0x10] sm:$0xff] %vm216_vm0, %v214_v12  ;;  %220 = vst.msk [vmem:[#allocation2 + $0x18] sm:$0xff] %vm216_vm0, %v215_v14 }
  0x20 LB: >> { %v2394_v17 = vsub.s32 0, %v2359_v1  ;;  %s236_s17 = scvt.s32.f32 %s2251_s11  ;;  %s231_s19 = scalar_lea.vmem [#allocation2], %s2251_s11  ;;  %vm385_vm1 = vcmask 122880   ;;  %s2251_s11 = sphi %s2386_s11, %s226_s11  }
  0x21   : >> { %s384_s20 = scalar_lea.vmem [#allocation3], %s2251_s11  ;;  %s226_s11 = sadd.s32 1, %s2251_s11  }
  0x22   : >> { %v237_v21 = vstv %s236_s17  ;;  %p223_p11 = scmp.ge.s32.totalorder %s226_s11, 16  }
  0x23   : > { %s2417_s25 = smov (%p223_p11), 0  }
  0x25   : >> { %v227_v15 = vld [vmem:[#allocation2] sm:$0xff]  ;;  %v228_v34 = vld [vmem:[#allocation2 + $0x8] sm:$0xff] }
  0x26   : >> { %v229_v16 = vld [vmem:[#allocation2 + $0x10] sm:$0xff]  ;;  %1892 = vmatprep.mubr.msk.f32.mxu0 %vm216_vm0, %v227_v15  ;;  %v232_v19 = vld [vmem:[%s231_s19] sm:$0x1]  ;;  %v230_v35 = vld [vmem:[#allocation2 + $0x18] sm:$0xff] }
  0x27   : >> { %1895 = vmatprep.mubr.msk.f32.mxu1 %vm216_vm0, %v229_v16  ;;  %v1785_v18 = vld [vmem:[%s231_s19 + $0x10] sm:$0x1]  ;;  %v238_v22 = vadd.f32 %v237_v21, %v232_v19 }
  0x28   : >> { %v239_v20 = vadd.f32 %v1785_v18, %v2366_v5 }
  0x29   : >> { %v243_v24 = vrot.slane %v238_v22, %v2394_v17 }
  0x2a   : >> { %v255_v23 = vrot.slane %v239_v20, %v2394_v17 }
  0x2b   : >> { %v245_v36 = vsub.f32 %v243_v24, %v2376_v6  ;;  %v244_v37 = vsub.f32 %v243_v24, %v2364_v4 }
  0x2c   : >> { %v256_v25 = vsub.f32 %v255_v23, %v2364_v4  ;;  %v257_v26 = vsub.f32 %v255_v23, %v2376_v6 }
  0x2d   : >> { %v247_v38 = vand.u32 2147483647, %v245_v36  ;;  %v246_v39 = vand.u32 2147483647, %v244_v37 }
  0x2e   : >> { %v258_v27 = vand.u32 2147483647, %v256_v25  ;;  %v259_v28 = vand.u32 2147483647, %v257_v26 }
  0x2f   : >> { %v249_v40 = vsub.f32 1.0, %v247_v38  ;;  %v248_v41 = vsub.f32 1.0, %v246_v39 }
  0x30   : >> { %v260_v29 = vsub.f32 1.0, %v258_v27  ;;  %v261_v30 = vsub.f32 1.0, %v259_v28 }
  0x31   : >> { %v251_v42 = vmax.f32 %v249_v40, 0.0  ;;  %v250_v43 = vmax.f32 %v248_v41, 0.0 }
  0x32   : >> { %v262_v31 = vmax.f32 %v260_v29, 0.0  ;;  %v263_v32 = vmax.f32 %v261_v30, 0.0 }
  0x34   : >> { %v1965_v33 = vpack.c.bf16 %v263_v32, %v262_v31 }
  0x36   : >> { %1966 = vmatprep.subr.bf16.mxu0 %v1965_v33  ;;  %1997 = vmatprep.subr.bf16.mxu1 %v1965_v33 }
  0x37   : >> { %1968 = vmatpush3.bf16.msra.mxu0 %v1965_v33  ;;  %1998 = vmatpush3.bf16.msra.mxu1 %v1965_v33 }
  0x3a   : >> { %1893 = vmatmul.mubr.msk.f32.vlgmr.msra.gmra.mrb[0].mxu0 %vm216_vm0, %v228_v34  ;;  %1896 = vmatmul.mubr.msk.f32.vlgmr.msra.gmra.mrb[0].mxu1 %vm216_vm0, %v230_v35 }
 0x10d   : >> { %v1894_v44 = vpop.f32.mrb[0].mxu0  ;;  %v1897_v45 = vpop.f32.mrb[0].mxu1 }
 0x10e   : >> { %v362_v46 = vmul.f32 %v1894_v44, %v251_v42  ;;  %v373_v47 = vmul.f32 %v1897_v45, %v251_v42  ;;  %v342_v48 = vpop.f32.mrb[1].mxu0  ;;  %v352_v49 = vpop.f32.mrb[1].mxu1 }
 0x10f   : >> { %v361_v50 = vmul.f32 %v342_v48, %v250_v43  ;;  %v372_v51 = vmul.f32 %v352_v49, %v250_v43 }
 0x110   : >> { %v364_v52 = vsel %vm216_vm0, %v362_v46, 0.0  ;;  %v375_v53 = vsel %vm216_vm0, %v373_v47, 0.0 }
 0x111   : >> { %v363_v54 = vsel %vm216_vm0, %v361_v50, 0.0  ;;  %v374_v55 = vsel %vm216_vm0, %v372_v51, 0.0 }
 0x112   : >> { %v365_v56 = vadd.f32 %v364_v52, %v363_v54  ;;  %v376_v57 = vadd.f32 %v375_v53, %v374_v55 }
 0x114   : >> { %v366_v58 = vrot.slane %v365_v56, 4  ;;  %v377_v59 = vrot.slane %v376_v57, 4 }
 0x116   : >> { %v367_v60 = vadd.f32 %v366_v58, %v365_v56  ;;  %v378_v61 = vadd.f32 %v377_v59, %v376_v57 }
 0x118   : >> { %v368_v62 = vrot.slane %v367_v60, 2  ;;  %v379_v63 = vrot.slane %v378_v61, 2 }
 0x11a   : >> { %v369_v0 = vadd.f32 %v368_v62, %v367_v60  ;;  %v380_v2 = vadd.f32 %v379_v63, %v378_v61 }
 0x11c   : >> { %v370_v3 = vrot.slane %v369_v0, 1  ;;  %v381_v7 = vrot.slane %v380_v2, 1  ;;  %225 = sbr.rel (!%p223_p11) target bundleno = 32 (0x20), region = 170 }
 0x11e   : >> { %v371_v8 = vadd.f32 %v370_v3, %v369_v0  ;;  %v382_v9 = vadd.f32 %v381_v7, %v380_v2 }
 0x120   : >> { %v383_v10 = vadd.f32 %v371_v8, %v232_v19  ;;  %v387_v11 = vadd.f32 %v1785_v18, %v382_v9 }
 0x122   : >> { %386 = vst.msk [vmem:[%s384_s20] sm:$0x1] %vm385_vm1, %v383_v10  ;;  %1790 = vst.msk [vmem:[%s384_s20 + $0x10] sm:$0x1] %vm385_vm1, %v387_v11 }
 0x123 LB: >> { %s400_s26 = scalar_lea.vmem [#allocation3], %s2255_s25  ;;  %s405_s27 = scvt.s32.f32 %s2255_s25  ;;  %s2255_s25 = sphi %s2417_s25, %s395_s25  }
 0x124   : >> { %s553_s28 = scalar_lea.vmem [#allocation2], %s2255_s25  ;;  %s395_s25 = sadd.s32 1, %s2255_s25  }
 0x125   : >> { %v406_v29 = vstv %s405_s27  ;;  %p392_p12 = scmp.ge.s32.totalorder %s395_s25, 16  }
 0x126   : > { %s2445_s29 = smov (%p392_p12), 0  }
 0x129   : >> { %v396_v12 = vld [vmem:[#allocation3] sm:$0xff]  ;;  %v398_v13 = vld [vmem:[#allocation3 + $0x10] sm:$0xff]  ;;  %v397_v26 = vld [vmem:[#allocation3 + $0x8] sm:$0xff] }
 0x12a   : >> { %1902 = vmatprep.mubr.msk.f32.mxu0 %vm216_vm0, %v396_v12  ;;  %1905 = vmatprep.mubr.msk.f32.mxu1 %vm216_vm0, %v398_v13  ;;  %v1791_v14 = vld [vmem:[%s400_s26 + $0x10] sm:$0x1]  ;;  %v399_v27 = vld [vmem:[#allocation3 + $0x18] sm:$0xff]  ;;  %v401_v28 = vld [vmem:[%s400_s26] sm:$0x1] }
 0x12b   : >> { %v408_v15 = vadd.f32 %v1791_v14, %v2366_v5  ;;  %v407_v30 = vadd.f32 %v406_v29, %v401_v28 }
 0x12d   : >> { %v424_v16 = vrot.slane %v408_v15, %v2394_v17  ;;  %v412_v31 = vrot.slane %v407_v30, %v2394_v17 }
 0x12f   : >> { %v425_v1 = vsub.f32 %v424_v16, %v2364_v4  ;;  %v426_v18 = vsub.f32 %v424_v16, %v2376_v6  ;;  %v414_v32 = vsub.f32 %v412_v31, %v2376_v6  ;;  %v413_v33 = vsub.f32 %v412_v31, %v2364_v4 }
 0x131   : >> { %v427_v19 = vand.u32 2147483647, %v425_v1  ;;  %v428_v20 = vand.u32 2147483647, %v426_v18  ;;  %v416_v34 = vand.u32 2147483647, %v414_v32 }
 0x132   : >> { %v415_v35 = vand.u32 2147483647, %v413_v33 }
 0x133   : >> { %v429_v21 = vsub.f32 1.0, %v427_v19  ;;  %v430_v22 = vsub.f32 1.0, %v428_v20  ;;  %v418_v36 = vsub.f32 1.0, %v416_v34 }
 0x134   : >> { %v417_v37 = vsub.f32 1.0, %v415_v35 }
 0x135   : >> { %v431_v23 = vmax.f32 %v429_v21, 0.0  ;;  %v432_v24 = vmax.f32 %v430_v22, 0.0  ;;  %v420_v38 = vmax.f32 %v418_v36, 0.0 }
 0x136   : >> { %v419_v39 = vmax.f32 %v417_v37, 0.0 }
 0x137   : >> { %v1969_v25 = vpack.c.bf16 %v432_v24, %v431_v23 }
 0x139   : >> { %1970 = vmatprep.subr.bf16.mxu0 %v1969_v25  ;;  %1999 = vmatprep.subr.bf16.mxu1 %v1969_v25 }
 0x13a   : >> { %1972 = vmatpush3.bf16.msra.mxu0 %v1969_v25  ;;  %2000 = vmatpush3.bf16.msra.mxu1 %v1969_v25 }
 0x13d   : >> { %1903 = vmatmul.mubr.msk.f32.vlgmr.msra.gmra.mrb[0].mxu0 %vm216_vm0, %v397_v26  ;;  %1906 = vmatmul.mubr.msk.f32.vlgmr.msra.gmra.mrb[0].mxu1 %vm216_vm0, %v399_v27 }
 0x210   : >> { %v1904_v40 = vpop.f32.mrb[0].mxu0  ;;  %v1907_v41 = vpop.f32.mrb[0].mxu1 }
 0x211   : >> { %v531_v42 = vmul.f32 %v1904_v40, %v420_v38  ;;  %v542_v43 = vmul.f32 %v1907_v41, %v420_v38  ;;  %v511_v44 = vpop.f32.mrb[1].mxu0  ;;  %v521_v45 = vpop.f32.mrb[1].mxu1 }
 0x212   : >> { %v530_v46 = vmul.f32 %v511_v44, %v419_v39  ;;  %v541_v47 = vmul.f32 %v521_v45, %v419_v39 }
 0x213   : >> { %v533_v48 = vsel %vm216_vm0, %v531_v42, 0.0  ;;  %v544_v49 = vsel %vm216_vm0, %v542_v43, 0.0 }
 0x214   : >> { %v532_v50 = vsel %vm216_vm0, %v530_v46, 0.0  ;;  %v543_v51 = vsel %vm216_vm0, %v541_v47, 0.0 }
 0x215   : >> { %v534_v52 = vadd.f32 %v533_v48, %v532_v50  ;;  %v545_v53 = vadd.f32 %v544_v49, %v543_v51 }
 0x217   : >> { %v535_v54 = vrot.slane %v534_v52, 4  ;;  %v546_v55 = vrot.slane %v545_v53, 4 }
 0x219   : >> { %v536_v56 = vadd.f32 %v535_v54, %v534_v52  ;;  %v547_v57 = vadd.f32 %v546_v55, %v545_v53 }
 0x21b   : >> { %v537_v58 = vrot.slane %v536_v56, 2  ;;  %v548_v59 = vrot.slane %v547_v57, 2 }
 0x21d   : >> { %v538_v60 = vadd.f32 %v537_v58, %v536_v56  ;;  %v549_v61 = vadd.f32 %v548_v59, %v547_v57 }
 0x21f   : >> { %v539_v62 = vrot.slane %v538_v60, 1  ;;  %v550_v63 = vrot.slane %v549_v61, 1  ;;  %394 = sbr.rel (!%p392_p12) target bundleno = 291 (0x123), region = 181 }
 0x221   : >> { %v540_v0 = vadd.f32 %v539_v62, %v538_v60  ;;  %v551_v2 = vadd.f32 %v550_v63, %v549_v61 }
 0x223   : >> { %v552_v3 = vadd.f32 %v540_v0, %v401_v28  ;;  %v556_v7 = vadd.f32 %v1791_v14, %v551_v2 }
 0x225   : >> { %555 = vst.msk [vmem:[%s553_s28] sm:$0x1] %vm385_vm1, %v552_v3  ;;  %1796 = vst.msk [vmem:[%s553_s28 + $0x10] sm:$0x1] %vm385_vm1, %v556_v7 }
 0x226 LB: >> { %s569_s30 = scalar_lea.vmem [#allocation2], %s2259_s29  ;;  %s574_s4 = scvt.s32.f32 %s2259_s29  ;;  %s2259_s29 = sphi %s2445_s29, %s564_s29  }
 0x227   : >> { %s722_s5 = scalar_lea.vmem [#allocation3], %s2259_s29  ;;  %s564_s29 = sadd.s32 1, %s2259_s29  }
 0x228   : >> { %v575_v25 = vstv %s574_s4  ;;  %p561_p13 = scmp.ge.s32.totalorder %s564_s29, 16  }
 0x229   : > { %s2473_s6 = smov (%p561_p13), 0  }
 0x22c   : >> { %v565_v8 = vld [vmem:[#allocation2] sm:$0xff]  ;;  %v567_v9 = vld [vmem:[#allocation2 + $0x10] sm:$0xff]  ;;  %v566_v22 = vld [vmem:[#allocation2 + $0x8] sm:$0xff] }
 0x22d   : >> { %1912 = vmatprep.mubr.msk.f32.mxu0 %vm216_vm0, %v565_v8  ;;  %1915 = vmatprep.mubr.msk.f32.mxu1 %vm216_vm0, %v567_v9  ;;  %v1797_v10 = vld [vmem:[%s569_s30 + $0x10] sm:$0x1]  ;;  %v568_v23 = vld [vmem:[#allocation2 + $0x18] sm:$0xff]  ;;  %v570_v24 = vld [vmem:[%s569_s30] sm:$0x1] }
 0x22e   : >> { %v577_v11 = vadd.f32 %v1797_v10, %v2366_v5  ;;  %v576_v26 = vadd.f32 %v575_v25, %v570_v24 }
 0x230   : >> { %v593_v12 = vrot.slane %v577_v11, %v2394_v17  ;;  %v581_v27 = vrot.slane %v576_v26, %v2394_v17 }
 0x232   : >> { %v594_v13 = vsub.f32 %v593_v12, %v2364_v4  ;;  %v595_v14 = vsub.f32 %v593_v12, %v2376_v6  ;;  %v583_v28 = vsub.f32 %v581_v27, %v2376_v6  ;;  %v582_v29 = vsub.f32 %v581_v27, %v2364_v4 }
 0x234   : >> { %v596_v15 = vand.u32 2147483647, %v594_v13  ;;  %v597_v16 = vand.u32 2147483647, %v595_v14  ;;  %v585_v30 = vand.u32 2147483647, %v583_v28 }
 0x235   : >> { %v584_v31 = vand.u32 2147483647, %v582_v29 }
 0x236   : >> { %v598_v1 = vsub.f32 1.0, %v596_v15  ;;  %v599_v18 = vsub.f32 1.0, %v597_v16  ;;  %v587_v32 = vsub.f32 1.0, %v585_v30 }
 0x237   : >> { %v586_v33 = vsub.f32 1.0, %v584_v31 }
 0x238   : >> { %v600_v19 = vmax.f32 %v598_v1, 0.0  ;;  %v601_v20 = vmax.f32 %v599_v18, 0.0  ;;  %v589_v34 = vmax.f32 %v587_v32, 0.0 }
 0x239   : >> { %v588_v35 = vmax.f32 %v586_v33, 0.0 }
 0x23a   : >> { %v1973_v21 = vpack.c.bf16 %v601_v20, %v600_v19 }
 0x23c   : >> { %1974 = vmatprep.subr.bf16.mxu0 %v1973_v21  ;;  %2001 = vmatprep.subr.bf16.mxu1 %v1973_v21 }
 0x23d   : >> { %1976 = vmatpush3.bf16.msra.mxu0 %v1973_v21  ;;  %2002 = vmatpush3.bf16.msra.mxu1 %v1973_v21 }
 0x240   : >> { %1913 = vmatmul.mubr.msk.f32.vlgmr.msra.gmra.mrb[0].mxu0 %vm216_vm0, %v566_v22  ;;  %1916 = vmatmul.mubr.msk.f32.vlgmr.msra.gmra.mrb[0].mxu1 %vm216_vm0, %v568_v23 }
 0x313   : >> { %v1914_v36 = vpop.f32.mrb[0].mxu0  ;;  %v1917_v37 = vpop.f32.mrb[0].mxu1 }
 0x314   : >> { %v700_v38 = vmul.f32 %v1914_v36, %v589_v34  ;;  %v711_v39 = vmul.f32 %v1917_v37, %v589_v34  ;;  %v680_v40 = vpop.f32.mrb[1].mxu0  ;;  %v690_v41 = vpop.f32.mrb[1].mxu1 }
 0x315   : >> { %v699_v42 = vmul.f32 %v680_v40, %v588_v35  ;;  %v710_v43 = vmul.f32 %v690_v41, %v588_v35 }
 0x316   : >> { %v702_v44 = vsel %vm216_vm0, %v700_v38, 0.0  ;;  %v713_v45 = vsel %vm216_vm0, %v711_v39, 0.0 }
 0x317   : >> { %v701_v46 = vsel %vm216_vm0, %v699_v42, 0.0  ;;  %v712_v47 = vsel %vm216_vm0, %v710_v43, 0.0 }
 0x318   : >> { %v703_v48 = vadd.f32 %v702_v44, %v701_v46  ;;  %v714_v49 = vadd.f32 %v713_v45, %v712_v47 }
 0x31a   : >> { %v704_v50 = vrot.slane %v703_v48, 4  ;;  %v715_v51 = vrot.slane %v714_v49, 4 }
 0x31c   : >> { %v705_v52 = vadd.f32 %v704_v50, %v703_v48  ;;  %v716_v53 = vadd.f32 %v715_v51, %v714_v49 }
 0x31e   : >> { %v706_v54 = vrot.slane %v705_v52, 2  ;;  %v717_v55 = vrot.slane %v716_v53, 2 }
 0x320   : >> { %v707_v56 = vadd.f32 %v706_v54, %v705_v52  ;;  %v718_v57 = vadd.f32 %v717_v55, %v716_v53 }
 0x322   : >> { %v708_v58 = vrot.slane %v707_v56, 1  ;;  %v719_v59 = vrot.slane %v718_v57, 1  ;;  %563 = sbr.rel (!%p561_p13) target bundleno = 550 (0x226), region = 192 }
 0x324   : >> { %v709_v60 = vadd.f32 %v708_v58, %v707_v56  ;;  %v720_v61 = vadd.f32 %v719_v59, %v718_v57 }
 0x326   : >> { %v721_v62 = vadd.f32 %v709_v60, %v570_v24  ;;  %v725_v63 = vadd.f32 %v1797_v10, %v720_v61 }
 0x328   : >> { %724 = vst.msk [vmem:[%s722_s5] sm:$0x1] %vm385_vm1, %v721_v62  ;;  %1802 = vst.msk [vmem:[%s722_s5 + $0x10] sm:$0x1] %vm385_vm1, %v725_v63 }
 0x329 LB: >> { %s738_s7 = scalar_lea.vmem [#allocation3], %s2263_s6  ;;  %s743_s11 = scvt.s32.f32 %s2263_s6  ;;  %s2263_s6 = sphi %s2473_s6, %s733_s6  }
 0x32a   : >> { %s891_s17 = scalar_lea.vmem [#allocation2], %s2263_s6  ;;  %s733_s6 = sadd.s32 1, %s2263_s6  }
 0x32b   : >> { %v744_v21 = vstv %s743_s11  ;;  %p730_p0 = scmp.ge.s32.totalorder %s733_s6, 16  }
 0x32c   : > { %s2501_s19 = smov (%p730_p0), 0  }
 0x32f   : >> { %v734_v0 = vld [vmem:[#allocation3] sm:$0xff]  ;;  %v736_v2 = vld [vmem:[#allocation3 + $0x10] sm:$0xff]  ;;  %v735_v18 = vld [vmem:[#allocation3 + $0x8] sm:$0xff] }
 0x330   : >> { %1922 = vmatprep.mubr.msk.f32.mxu0 %vm216_vm0, %v734_v0  ;;  %1925 = vmatprep.mubr.msk.f32.mxu1 %vm216_vm0, %v736_v2  ;;  %v1803_v3 = vld [vmem:[%s738_s7 + $0x10] sm:$0x1]  ;;  %v737_v19 = vld [vmem:[#allocation3 + $0x18] sm:$0xff]  ;;  %v739_v20 = vld [vmem:[%s738_s7] sm:$0x1] }
 0x331   : >> { %v746_v7 = vadd.f32 %v1803_v3, %v2366_v5  ;;  %v745_v22 = vadd.f32 %v744_v21, %v739_v20 }
 0x333   : >> { %v762_v8 = vrot.slane %v746_v7, %v2394_v17  ;;  %v750_v23 = vrot.slane %v745_v22, %v2394_v17 }
 0x335   : >> { %v763_v9 = vsub.f32 %v762_v8, %v2364_v4  ;;  %v764_v10 = vsub.f32 %v762_v8, %v2376_v6  ;;  %v752_v24 = vsub.f32 %v750_v23, %v2376_v6  ;;  %v751_v25 = vsub.f32 %v750_v23, %v2364_v4 }
 0x337   : >> { %v765_v11 = vand.u32 2147483647, %v763_v9  ;;  %v766_v12 = vand.u32 2147483647, %v764_v10  ;;  %v754_v26 = vand.u32 2147483647, %v752_v24 }
 0x338   : >> { %v753_v27 = vand.u32 2147483647, %v751_v25 }
 0x339   : >> { %v767_v13 = vsub.f32 1.0, %v765_v11  ;;  %v768_v14 = vsub.f32 1.0, %v766_v12  ;;  %v756_v28 = vsub.f32 1.0, %v754_v26 }
 0x33a   : >> { %v755_v29 = vsub.f32 1.0, %v753_v27 }
 0x33b   : >> { %v769_v15 = vmax.f32 %v767_v13, 0.0  ;;  %v770_v16 = vmax.f32 %v768_v14, 0.0  ;;  %v758_v30 = vmax.f32 %v756_v28, 0.0 }
 0x33c   : >> { %v757_v31 = vmax.f32 %v755_v29, 0.0 }
 0x33d   : >> { %v1977_v1 = vpack.c.bf16 %v770_v16, %v769_v15 }
 0x33f   : >> { %1978 = vmatprep.subr.bf16.mxu0 %v1977_v1  ;;  %2003 = vmatprep.subr.bf16.mxu1 %v1977_v1 }
 0x340   : >> { %1980 = vmatpush3.bf16.msra.mxu0 %v1977_v1  ;;  %2004 = vmatpush3.bf16.msra.mxu1 %v1977_v1 }
 0x343   : >> { %1923 = vmatmul.mubr.msk.f32.vlgmr.msra.gmra.mrb[0].mxu0 %vm216_vm0, %v735_v18  ;;  %1926 = vmatmul.mubr.msk.f32.vlgmr.msra.gmra.mrb[0].mxu1 %vm216_vm0, %v737_v19 }
 0x416   : >> { %v1924_v32 = vpop.f32.mrb[0].mxu0  ;;  %v1927_v33 = vpop.f32.mrb[0].mxu1 }
 0x417   : >> { %v869_v34 = vmul.f32 %v1924_v32, %v758_v30  ;;  %v880_v35 = vmul.f32 %v1927_v33, %v758_v30  ;;  %v849_v36 = vpop.f32.mrb[1].mxu0  ;;  %v859_v37 = vpop.f32.mrb[1].mxu1 }
 0x418   : >> { %v868_v38 = vmul.f32 %v849_v36, %v757_v31  ;;  %v879_v39 = vmul.f32 %v859_v37, %v757_v31 }
 0x419   : >> { %v871_v40 = vsel %vm216_vm0, %v869_v34, 0.0  ;;  %v882_v41 = vsel %vm216_vm0, %v880_v35, 0.0 }
 0x41a   : >> { %v870_v42 = vsel %vm216_vm0, %v868_v38, 0.0  ;;  %v881_v43 = vsel %vm216_vm0, %v879_v39, 0.0 }
 0x41b   : >> { %v872_v44 = vadd.f32 %v871_v40, %v870_v42  ;;  %v883_v45 = vadd.f32 %v882_v41, %v881_v43 }
 0x41d   : >> { %v873_v46 = vrot.slane %v872_v44, 4  ;;  %v884_v47 = vrot.slane %v883_v45, 4 }
 0x41f   : >> { %v874_v48 = vadd.f32 %v873_v46, %v872_v44  ;;  %v885_v49 = vadd.f32 %v884_v47, %v883_v45 }
 0x421   : >> { %v875_v50 = vrot.slane %v874_v48, 2  ;;  %v886_v51 = vrot.slane %v885_v49, 2 }
 0x423   : >> { %v876_v52 = vadd.f32 %v875_v50, %v874_v48  ;;  %v887_v53 = vadd.f32 %v886_v51, %v885_v49 }
 0x425   : >> { %v877_v54 = vrot.slane %v876_v52, 1  ;;  %v888_v55 = vrot.slane %v887_v53, 1  ;;  %732 = sbr.rel (!%p730_p0) target bundleno = 809 (0x329), region = 203 }
 0x427   : >> { %v878_v56 = vadd.f32 %v877_v54, %v876_v52  ;;  %v889_v57 = vadd.f32 %v888_v55, %v887_v53 }
 0x429   : >> { %v890_v58 = vadd.f32 %v878_v56, %v739_v20  ;;  %v894_v59 = vadd.f32 %v1803_v3, %v889_v57 }
 0x42b   : >> { %893 = vst.msk [vmem:[%s891_s17] sm:$0x1] %vm385_vm1, %v890_v58  ;;  %1808 = vst.msk [vmem:[%s891_s17 + $0x10] sm:$0x1] %vm385_vm1, %v894_v59 }
 0x42c LB: >> { %s907_s20 = scalar_lea.vmem [#allocation2], %s2267_s19  ;;  %s912_s25 = scvt.s32.f32 %s2267_s19  ;;  %s2267_s19 = sphi %s2501_s19, %s902_s19  }
 0x42d   : >> { %s1060_s26 = scalar_lea.vmem [#allocation3], %s2267_s19  ;;  %s902_s19 = sadd.s32 1, %s2267_s19  }
 0x42e   : >> { %v913_v1 = vstv %s912_s25  ;;  %p899_p1 = scmp.ge.s32.totalorder %s902_s19, 16  }
 0x42f   : > { %s2529_s27 = smov (%p899_p1), 0  }
 0x432   : >> { %v903_v60 = vld [vmem:[#allocation2] sm:$0xff]  ;;  %v905_v61 = vld [vmem:[#allocation2 + $0x10] sm:$0xff]  ;;  %v904_v14 = vld [vmem:[#allocation2 + $0x8] sm:$0xff] }
 0x433   : >> { %1932 = vmatprep.mubr.msk.f32.mxu0 %vm216_vm0, %v903_v60  ;;  %1935 = vmatprep.mubr.msk.f32.mxu1 %vm216_vm0, %v905_v61  ;;  %v1809_v62 = vld [vmem:[%s907_s20 + $0x10] sm:$0x1]  ;;  %v906_v15 = vld [vmem:[#allocation2 + $0x18] sm:$0xff]  ;;  %v908_v16 = vld [vmem:[%s907_s20] sm:$0x1] }
 0x434   : >> { %v915_v63 = vadd.f32 %v1809_v62, %v2366_v5  ;;  %v914_v18 = vadd.f32 %v913_v1, %v908_v16 }
 0x436   : >> { %v931_v0 = vrot.slane %v915_v63, %v2394_v17  ;;  %v919_v19 = vrot.slane %v914_v18, %v2394_v17 }
 0x438   : >> { %v932_v2 = vsub.f32 %v931_v0, %v2364_v4  ;;  %v933_v3 = vsub.f32 %v931_v0, %v2376_v6  ;;  %v921_v20 = vsub.f32 %v919_v19, %v2376_v6  ;;  %v920_v21 = vsub.f32 %v919_v19, %v2364_v4 }
 0x43a   : >> { %v934_v7 = vand.u32 2147483647, %v932_v2  ;;  %v935_v8 = vand.u32 2147483647, %v933_v3  ;;  %v923_v22 = vand.u32 2147483647, %v921_v20 }
 0x43b   : >> { %v922_v23 = vand.u32 2147483647, %v920_v21 }
 0x43c   : >> { %v936_v9 = vsub.f32 1.0, %v934_v7  ;;  %v937_v10 = vsub.f32 1.0, %v935_v8  ;;  %v925_v24 = vsub.f32 1.0, %v923_v22 }
 0x43d   : >> { %v924_v25 = vsub.f32 1.0, %v922_v23 }
 0x43e   : >> { %v938_v11 = vmax.f32 %v936_v9, 0.0  ;;  %v939_v12 = vmax.f32 %v937_v10, 0.0  ;;  %v927_v26 = vmax.f32 %v925_v24, 0.0 }
 0x43f   : >> { %v926_v27 = vmax.f32 %v924_v25, 0.0 }
 0x440   : >> { %v1981_v13 = vpack.c.bf16 %v939_v12, %v938_v11 }
 0x442   : >> { %1982 = vmatprep.subr.bf16.mxu0 %v1981_v13  ;;  %2005 = vmatprep.subr.bf16.mxu1 %v1981_v13 }
 0x443   : >> { %1984 = vmatpush3.bf16.msra.mxu0 %v1981_v13  ;;  %2006 = vmatpush3.bf16.msra.mxu1 %v1981_v13 }
 0x446   : >> { %1933 = vmatmul.mubr.msk.f32.vlgmr.msra.gmra.mrb[0].mxu0 %vm216_vm0, %v904_v14  ;;  %1936 = vmatmul.mubr.msk.f32.vlgmr.msra.gmra.mrb[0].mxu1 %vm216_vm0, %v906_v15 }
 0x519   : >> { %v1934_v28 = vpop.f32.mrb[0].mxu0  ;;  %v1937_v29 = vpop.f32.mrb[0].mxu1 }
 0x51a   : >> { %v1038_v30 = vmul.f32 %v1934_v28, %v927_v26  ;;  %v1049_v31 = vmul.f32 %v1937_v29, %v927_v26  ;;  %v1018_v32 = vpop.f32.mrb[1].mxu0  ;;  %v1028_v33 = vpop.f32.mrb[1].mxu1 }
 0x51b   : >> { %v1037_v34 = vmul.f32 %v1018_v32, %v926_v27  ;;  %v1048_v35 = vmul.f32 %v1028_v33, %v926_v27 }
 0x51c   : >> { %v1040_v36 = vsel %vm216_vm0, %v1038_v30, 0.0  ;;  %v1051_v37 = vsel %vm216_vm0, %v1049_v31, 0.0 }
 0x51d   : >> { %v1039_v38 = vsel %vm216_vm0, %v1037_v34, 0.0  ;;  %v1050_v39 = vsel %vm216_vm0, %v1048_v35, 0.0 }
 0x51e   : >> { %v1041_v40 = vadd.f32 %v1040_v36, %v1039_v38  ;;  %v1052_v41 = vadd.f32 %v1051_v37, %v1050_v39 }
 0x520   : >> { %v1042_v42 = vrot.slane %v1041_v40, 4  ;;  %v1053_v43 = vrot.slane %v1052_v41, 4 }
 0x522   : >> { %v1043_v44 = vadd.f32 %v1042_v42, %v1041_v40  ;;  %v1054_v45 = vadd.f32 %v1053_v43, %v1052_v41 }
 0x524   : >> { %v1044_v46 = vrot.slane %v1043_v44, 2  ;;  %v1055_v47 = vrot.slane %v1054_v45, 2 }
 0x526   : >> { %v1045_v48 = vadd.f32 %v1044_v46, %v1043_v44  ;;  %v1056_v49 = vadd.f32 %v1055_v47, %v1054_v45 }
 0x528   : >> { %v1046_v50 = vrot.slane %v1045_v48, 1  ;;  %v1057_v51 = vrot.slane %v1056_v49, 1  ;;  %901 = sbr.rel (!%p899_p1) target bundleno = 1068 (0x42c), region = 214 }
 0x52a   : >> { %v1047_v52 = vadd.f32 %v1046_v50, %v1045_v48  ;;  %v1058_v53 = vadd.f32 %v1057_v51, %v1056_v49 }
 0x52c   : >> { %v1059_v54 = vadd.f32 %v1047_v52, %v908_v16  ;;  %v1063_v55 = vadd.f32 %v1809_v62, %v1058_v53 }
 0x52e   : >> { %1062 = vst.msk [vmem:[%s1060_s26] sm:$0x1] %vm385_vm1, %v1059_v54  ;;  %1814 = vst.msk [vmem:[%s1060_s26 + $0x10] sm:$0x1] %vm385_vm1, %v1063_v55 }
 0x52f LB: >> { %s1076_s28 = scalar_lea.vmem [#allocation3], %s2271_s27  ;;  %s1081_s29 = scvt.s32.f32 %s2271_s27  ;;  %s2271_s27 = sphi %s2529_s27, %s1071_s27  }
 0x530   : >> { %s1229_s30 = scalar_lea.vmem [#allocation2], %s2271_s27  ;;  %s1071_s27 = sadd.s32 1, %s2271_s27  }
 0x531   : >> { %v1082_v13 = vstv %s1081_s29  ;;  %p1068_p2 = scmp.ge.s32.totalorder %s1071_s27, 16  }
 0x532   : > { %s2557_s4 = smov (%p1068_p2), 0  }
 0x535   : >> { %v1072_v56 = vld [vmem:[#allocation3] sm:$0xff]  ;;  %v1074_v57 = vld [vmem:[#allocation3 + $0x10] sm:$0xff]  ;;  %v1073_v10 = vld [vmem:[#allocation3 + $0x8] sm:$0xff] }
 0x536   : >> { %1942 = vmatprep.mubr.msk.f32.mxu0 %vm216_vm0, %v1072_v56  ;;  %1945 = vmatprep.mubr.msk.f32.mxu1 %vm216_vm0, %v1074_v57  ;;  %v1815_v58 = vld [vmem:[%s1076_s28 + $0x10] sm:$0x1]  ;;  %v1075_v11 = vld [vmem:[#allocation3 + $0x18] sm:$0xff]  ;;  %v1077_v12 = vld [vmem:[%s1076_s28] sm:$0x1] }
 0x537   : >> { %v1084_v59 = vadd.f32 %v1815_v58, %v2366_v5  ;;  %v1083_v14 = vadd.f32 %v1082_v13, %v1077_v12 }
 0x539   : >> { %v1100_v60 = vrot.slane %v1084_v59, %v2394_v17  ;;  %v1088_v15 = vrot.slane %v1083_v14, %v2394_v17 }
 0x53b   : >> { %v1101_v61 = vsub.f32 %v1100_v60, %v2364_v4  ;;  %v1102_v62 = vsub.f32 %v1100_v60, %v2376_v6  ;;  %v1090_v16 = vsub.f32 %v1088_v15, %v2376_v6  ;;  %v1089_v1 = vsub.f32 %v1088_v15, %v2364_v4 }
 0x53d   : >> { %v1103_v63 = vand.u32 2147483647, %v1101_v61  ;;  %v1104_v0 = vand.u32 2147483647, %v1102_v62  ;;  %v1092_v18 = vand.u32 2147483647, %v1090_v16 }
 0x53e   : >> { %v1091_v19 = vand.u32 2147483647, %v1089_v1 }
 0x53f   : >> { %v1105_v2 = vsub.f32 1.0, %v1103_v63  ;;  %v1106_v3 = vsub.f32 1.0, %v1104_v0  ;;  %v1094_v20 = vsub.f32 1.0, %v1092_v18 }
 0x540   : >> { %v1093_v21 = vsub.f32 1.0, %v1091_v19 }
 0x541   : >> { %v1107_v7 = vmax.f32 %v1105_v2, 0.0  ;;  %v1108_v8 = vmax.f32 %v1106_v3, 0.0  ;;  %v1096_v22 = vmax.f32 %v1094_v20, 0.0 }
 0x542   : >> { %v1095_v23 = vmax.f32 %v1093_v21, 0.0 }
 0x543   : >> { %v1985_v9 = vpack.c.bf16 %v1108_v8, %v1107_v7 }
 0x545   : >> { %1986 = vmatprep.subr.bf16.mxu0 %v1985_v9  ;;  %2007 = vmatprep.subr.bf16.mxu1 %v1985_v9 }
 0x546   : >> { %1988 = vmatpush3.bf16.msra.mxu0 %v1985_v9  ;;  %2008 = vmatpush3.bf16.msra.mxu1 %v1985_v9 }
 0x549   : >> { %1943 = vmatmul.mubr.msk.f32.vlgmr.msra.gmra.mrb[0].mxu0 %vm216_vm0, %v1073_v10  ;;  %1946 = vmatmul.mubr.msk.f32.vlgmr.msra.gmra.mrb[0].mxu1 %vm216_vm0, %v1075_v11 }
 0x61c   : >> { %v1944_v24 = vpop.f32.mrb[0].mxu0  ;;  %v1947_v25 = vpop.f32.mrb[0].mxu1 }
 0x61d   : >> { %v1207_v26 = vmul.f32 %v1944_v24, %v1096_v22  ;;  %v1218_v27 = vmul.f32 %v1947_v25, %v1096_v22  ;;  %v1187_v28 = vpop.f32.mrb[1].mxu0  ;;  %v1197_v29 = vpop.f32.mrb[1].mxu1 }
 0x61e   : >> { %v1206_v30 = vmul.f32 %v1187_v28, %v1095_v23  ;;  %v1217_v31 = vmul.f32 %v1197_v29, %v1095_v23 }
 0x61f   : >> { %v1209_v32 = vsel %vm216_vm0, %v1207_v26, 0.0  ;;  %v1220_v33 = vsel %vm216_vm0, %v1218_v27, 0.0 }
 0x620   : >> { %v1208_v34 = vsel %vm216_vm0, %v1206_v30, 0.0  ;;  %v1219_v35 = vsel %vm216_vm0, %v1217_v31, 0.0 }
 0x621   : >> { %v1210_v36 = vadd.f32 %v1209_v32, %v1208_v34  ;;  %v1221_v37 = vadd.f32 %v1220_v33, %v1219_v35 }
 0x623   : >> { %v1211_v38 = vrot.slane %v1210_v36, 4  ;;  %v1222_v39 = vrot.slane %v1221_v37, 4 }
 0x625   : >> { %v1212_v40 = vadd.f32 %v1211_v38, %v1210_v36  ;;  %v1223_v41 = vadd.f32 %v1222_v39, %v1221_v37 }
 0x627   : >> { %v1213_v42 = vrot.slane %v1212_v40, 2  ;;  %v1224_v43 = vrot.slane %v1223_v41, 2 }
 0x629   : >> { %v1214_v44 = vadd.f32 %v1213_v42, %v1212_v40  ;;  %v1225_v45 = vadd.f32 %v1224_v43, %v1223_v41 }
 0x62b   : >> { %v1215_v46 = vrot.slane %v1214_v44, 1  ;;  %v1226_v47 = vrot.slane %v1225_v45, 1  ;;  %1070 = sbr.rel (!%p1068_p2) target bundleno = 1327 (0x52f), region = 225 }
 0x62d   : >> { %v1216_v48 = vadd.f32 %v1215_v46, %v1214_v44  ;;  %v1227_v49 = vadd.f32 %v1226_v47, %v1225_v45 }
 0x62f   : >> { %v1228_v50 = vadd.f32 %v1216_v48, %v1077_v12  ;;  %v1232_v51 = vadd.f32 %v1815_v58, %v1227_v49 }
 0x631   : >> { %1231 = vst.msk [vmem:[%s1229_s30] sm:$0x1] %vm385_vm1, %v1228_v50  ;;  %1820 = vst.msk [vmem:[%s1229_s30 + $0x10] sm:$0x1] %vm385_vm1, %v1232_v51 }
 0x632 LB: >> { %s1245_s5 = scalar_lea.vmem [#allocation2], %s2275_s4  ;;  %s1250_s6 = scvt.s32.f32 %s2275_s4  ;;  %s2275_s4 = sphi %s2557_s4, %s1240_s4  }
 0x633   : >> { %s1398_s7 = scalar_lea.vmem [#allocation3], %s2275_s4  ;;  %s1240_s4 = sadd.s32 1, %s2275_s4  }
 0x634   : >> { %v1251_v9 = vstv %s1250_s6  ;;  %p1237_p3 = scmp.ge.s32.totalorder %s1240_s4, 16  }
 0x635   : > { %s2593_s11 = smov (%p1237_p3), 0  }
 0x638   : >> { %v1241_v52 = vld [vmem:[#allocation2] sm:$0xff]  ;;  %v1243_v53 = vld [vmem:[#allocation2 + $0x10] sm:$0xff]  ;;  %v1242_v3 = vld [vmem:[#allocation2 + $0x8] sm:$0xff] }
 0x639   : >> { %1952 = vmatprep.mubr.msk.f32.mxu0 %vm216_vm0, %v1241_v52  ;;  %1955 = vmatprep.mubr.msk.f32.mxu1 %vm216_vm0, %v1243_v53  ;;  %v1821_v54 = vld [vmem:[%s1245_s5 + $0x10] sm:$0x1]  ;;  %v1244_v7 = vld [vmem:[#allocation2 + $0x18] sm:$0xff]  ;;  %v1246_v8 = vld [vmem:[%s1245_s5] sm:$0x1] }
 0x63a   : >> { %v1253_v55 = vadd.f32 %v1821_v54, %v2366_v5  ;;  %v1252_v10 = vadd.f32 %v1251_v9, %v1246_v8 }
 0x63c   : >> { %v1269_v56 = vrot.slane %v1253_v55, %v2394_v17  ;;  %v1257_v11 = vrot.slane %v1252_v10, %v2394_v17 }
 0x63e   : >> { %v1270_v57 = vsub.f32 %v1269_v56, %v2364_v4  ;;  %v1271_v58 = vsub.f32 %v1269_v56, %v2376_v6  ;;  %v1259_v12 = vsub.f32 %v1257_v11, %v2376_v6  ;;  %v1258_v13 = vsub.f32 %v1257_v11, %v2364_v4 }
 0x640   : >> { %v1272_v59 = vand.u32 2147483647, %v1270_v57  ;;  %v1273_v60 = vand.u32 2147483647, %v1271_v58  ;;  %v1261_v14 = vand.u32 2147483647, %v1259_v12 }
 0x641   : >> { %v1260_v15 = vand.u32 2147483647, %v1258_v13 }
 0x642   : >> { %v1274_v61 = vsub.f32 1.0, %v1272_v59  ;;  %v1275_v62 = vsub.f32 1.0, %v1273_v60  ;;  %v1263_v16 = vsub.f32 1.0, %v1261_v14 }
 0x643   : >> { %v1262_v1 = vsub.f32 1.0, %v1260_v15 }
 0x644   : >> { %v1276_v63 = vmax.f32 %v1274_v61, 0.0  ;;  %v1277_v0 = vmax.f32 %v1275_v62, 0.0  ;;  %v1265_v18 = vmax.f32 %v1263_v16, 0.0 }
 0x645   : >> { %v1264_v19 = vmax.f32 %v1262_v1, 0.0 }
 0x646   : >> { %v1989_v2 = vpack.c.bf16 %v1277_v0, %v1276_v63 }
 0x648   : >> { %1990 = vmatprep.subr.bf16.mxu0 %v1989_v2  ;;  %2009 = vmatprep.subr.bf16.mxu1 %v1989_v2 }
 0x649   : >> { %1992 = vmatpush3.bf16.msra.mxu0 %v1989_v2  ;;  %2010 = vmatpush3.bf16.msra.mxu1 %v1989_v2 }
 0x64c   : >> { %1953 = vmatmul.mubr.msk.f32.vlgmr.msra.gmra.mrb[0].mxu0 %vm216_vm0, %v1242_v3  ;;  %1956 = vmatmul.mubr.msk.f32.vlgmr.msra.gmra.mrb[0].mxu1 %vm216_vm0, %v1244_v7 }
 0x71f   : >> { %v1954_v20 = vpop.f32.mrb[0].mxu0  ;;  %v1957_v21 = vpop.f32.mrb[0].mxu1 }
 0x720   : >> { %v1376_v22 = vmul.f32 %v1954_v20, %v1265_v18  ;;  %v1387_v23 = vmul.f32 %v1957_v21, %v1265_v18  ;;  %v1356_v24 = vpop.f32.mrb[1].mxu0  ;;  %v1366_v25 = vpop.f32.mrb[1].mxu1 }
 0x721   : >> { %v1375_v26 = vmul.f32 %v1356_v24, %v1264_v19  ;;  %v1386_v27 = vmul.f32 %v1366_v25, %v1264_v19 }
 0x722   : >> { %v1378_v28 = vsel %vm216_vm0, %v1376_v22, 0.0  ;;  %v1389_v29 = vsel %vm216_vm0, %v1387_v23, 0.0 }
 0x723   : >> { %v1377_v30 = vsel %vm216_vm0, %v1375_v26, 0.0  ;;  %v1388_v31 = vsel %vm216_vm0, %v1386_v27, 0.0 }
 0x724   : >> { %v1379_v32 = vadd.f32 %v1378_v28, %v1377_v30  ;;  %v1390_v33 = vadd.f32 %v1389_v29, %v1388_v31 }
 0x726   : >> { %v1380_v34 = vrot.slane %v1379_v32, 4  ;;  %v1391_v35 = vrot.slane %v1390_v33, 4 }
 0x728   : >> { %v1381_v36 = vadd.f32 %v1380_v34, %v1379_v32  ;;  %v1392_v37 = vadd.f32 %v1391_v35, %v1390_v33 }
 0x72a   : >> { %v1382_v38 = vrot.slane %v1381_v36, 2  ;;  %v1393_v39 = vrot.slane %v1392_v37, 2 }
 0x72c   : >> { %v1383_v40 = vadd.f32 %v1382_v38, %v1381_v36  ;;  %v1394_v41 = vadd.f32 %v1393_v39, %v1392_v37 }
 0x72e   : >> { %v1384_v42 = vrot.slane %v1383_v40, 1  ;;  %v1395_v43 = vrot.slane %v1394_v41, 1  ;;  %1239 = sbr.rel (!%p1237_p3) target bundleno = 1586 (0x632), region = 236 }
 0x730   : >> { %v1385_v44 = vadd.f32 %v1384_v42, %v1383_v40  ;;  %v1396_v45 = vadd.f32 %v1395_v43, %v1394_v41 }
 0x732   : >> { %v1397_v46 = vadd.f32 %v1385_v44, %v1246_v8  ;;  %v1401_v47 = vadd.f32 %v1821_v54, %v1396_v45 }
 0x734   : >> { %1400 = vst.msk [vmem:[%s1398_s7] sm:$0x1] %vm385_vm1, %v1397_v46  ;;  %1826 = vst.msk [vmem:[%s1398_s7 + $0x10] sm:$0x1] %vm385_vm1, %v1401_v47 }
 0x73b   : > { %v1404_v48 = vld [vmem:[#allocation3] sm:$0xff]  ;;  %v1405_v49 = vld [vmem:[#allocation3 + $0x8] sm:$0xff]  ;;  %v1406_v50 = vld [vmem:[#allocation3 + $0x10] sm:$0xff] }
 0x73c   : > { %1408 = vst.msk [vmem:[%s2382_s9] sm:$0xff] %vm216_vm0, %v1404_v48  ;;  %1409 = vst.msk [vmem:[%s2382_s9 + $0x8] sm:$0xff] %vm216_vm0, %v1405_v49  ;;  %v1407_v51 = vld [vmem:[#allocation3 + $0x18] sm:$0xff] }
 0x73d   : > { %1410 = vst.msk [vmem:[%s2382_s9 + $0x10] sm:$0xff] %vm216_vm0, %v1406_v50  ;;  %1411 = vst.msk [vmem:[%s2382_s9 + $0x18] sm:$0xff] %vm216_vm0, %v1407_v51 }
 0x73e LB: >> { %v1418_v52 = vld [vmem:[%s2374_s8] sm:$0xff]  ;;  %s1420_s17 = scalar_lea.vmem [#allocation3], %s2279_s11  ;;  %v1419_v2 = vld [vmem:[%s2374_s8 + $0x8] sm:$0xff]  ;;  %s1425_s19 = scvt.s32.f32 %s2279_s11  ;;  %s2279_s11 = sphi %s2593_s11, %s1417_s11  }
 0x73f   : >> { %1962 = vmatprep.mubr.msk.f32.mxu0 %vm216_vm0, %v1418_v52  ;;  %v1827_v53 = vld [vmem:[%s1420_s17 + $0x10] sm:$0x1]  ;;  %v1421_v3 = vld [vmem:[%s1420_s17] sm:$0x1]  ;;  %s1545_s20 = scalar_lea.vmem %s2384_s10, %s2279_s11 [#allocation6]  ;;  %s1417_s11 = sadd.s32 1, %s2279_s11  }
 0x740   : >> { %v1428_v54 = vadd.f32 %v1827_v53, %v2366_v5  ;;  %v1426_v7 = vstv %s1425_s19  ;;  %p1414_p4 = scmp.ge.s32.totalorder %s1417_s11, 16  }
 0x741   : >> { %v1427_v8 = vadd.f32 %v1426_v7, %v1421_v3  ;;  %s1840_s25 = sshll.u32 (%p1414_p4), %s2326_s16, 9  ;;  %s1567_s29 = sshll.u32 (%p1414_p4), %s2382_s9, 4  ;;  %s2626_s29 = int_to_ptr.vmem [resolvable:$true] %s1567_s29 }
 0x742   : >> { %v1444_v55 = vrot.slane %v1428_v54, %v2394_v17  ;;  %s2623_s28 = scalar_lea.hbm (%p1414_p4), %s2710_s2, %s1840_s25  ;;  %s1549_s30 = scalar_lea.sflag (%p1414_p4), [#allocation5], %s2354_s24 }
 0x743   : >> { %v1432_v9 = vrot.slane %v1427_v8, %v2394_v17  ;;  %s2121_s4 = scalar_lea.vmem (%p1414_p4), %s2626_s29, 512  ;;  %s2281_s8 = smov (%p1414_p4), [#allocation4]  }
 0x744   : >> { %v1445_v56 = vsub.f32 %v1444_v55, %v2364_v4  ;;  %v1446_v57 = vsub.f32 %v1444_v55, %v2376_v6  ;;  %p2122_p7 = scmp.ne.s32.totalorder (%p1414_p4), %s2626_s29, %s2121_s4  ;;  %s2125_s5 = sshll.u32 (%p1414_p4), %s2281_s8, 4  ;;  %s2126_s5 = int_to_ptr.vmem [resolvable:$false] %s2125_s5 }
 0x745   : >> { %v1434_v10 = vsub.f32 %v1432_v9, %v2376_v6  ;;  %v1433_v11 = vsub.f32 %v1432_v9, %v2364_v4  ;;  %s2127_s6 = scalar_lea.vmem (%p1414_p4), %s2126_s5, 1024  ;;  %p2128_p10 = scmp.lt.s32.totalorder (%p1414_p4), %s2626_s29, %s2126_s5 }
 0x746   : >> { %v1447_v58 = vand.u32 2147483647, %v1445_v56  ;;  %v1448_v59 = vand.u32 2147483647, %v1446_v57  ;;  %p2123_p8 = pnand (%p1414_p4), %p2122_p7, %p2343_p5  ;;  %p2129_p11 = scmp.lt.s32.totalorder (%p1414_p4), %s2127_s6, %s2121_s4 }
 0x747   : >> { %v1436_v12 = vand.u32 2147483647, %v1434_v10  ;;  %v1435_v13 = vand.u32 2147483647, %v1433_v11 }
 0x748   : >> { %v1449_v60 = vsub.f32 1.0, %v1447_v58  ;;  %v1450_v61 = vsub.f32 1.0, %v1448_v59  ;;  %p2124_p9 = pneg (%p1414_p4), %p2123_p8  ;;  %p2130_p12 = por (%p1414_p4), %p2129_p11, %p2128_p10 }
 0x749   : >> { %v1438_v14 = vsub.f32 1.0, %v1436_v12  ;;  %v1437_v15 = vsub.f32 1.0, %v1435_v13 }
 0x74a   : >> { %v1451_v62 = vmax.f32 %v1449_v60, 0.0  ;;  %v1452_v63 = vmax.f32 %v1450_v61, 0.0  ;;  %p2131_p13 = pnand (%p1414_p4), %p2130_p12, %p2124_p9 }
 0x74b   : >> { %v1440_v16 = vmax.f32 %v1438_v14, 0.0  ;;  %v1439_v1 = vmax.f32 %v1437_v15, 0.0 }
 0x74c   : >> { %v1993_v0 = vpack.c.bf16 %v1452_v63, %v1451_v62 }
 0x74e   : >> { %1994 = vmatprep.subr.bf16.mxu0 %v1993_v0 }
 0x74f   : >> { %1996 = vmatpush3.bf16.msra.mxu0 %v1993_v0 }
 0x752   : >> { %1963 = vmatmul.mubr.msk.f32.vlgmr.msra.gmra.mrb[0].mxu0 %vm216_vm0, %v1419_v2 }
 0x825   : >> { %v1964_v18 = vpop.f32.mrb[0].mxu0 }
 0x826   : >> { %v1535_v19 = vmul.f32 %v1964_v18, %v1440_v16  ;;  %v1525_v20 = vpop.f32.mrb[1].mxu0 }
 0x827   : >> { %v1534_v21 = vmul.f32 %v1525_v20, %v1439_v1 }
 0x828   : >> { %v1537_v22 = vsel %vm216_vm0, %v1535_v19, 0.0 }
 0x829   : >> { %v1536_v23 = vsel %vm216_vm0, %v1534_v21, 0.0 }
 0x82a   : >> { %v1538_v24 = vadd.f32 %v1537_v22, %v1536_v23 }
 0x82c   : >> { %v1539_v25 = vrot.slane %v1538_v24, 4 }
 0x82e   : >> { %v1540_v26 = vadd.f32 %v1539_v25, %v1538_v24 }
 0x830   : >> { %v1541_v27 = vrot.slane %v1540_v26, 2 }
 0x832   : >> { %v1542_v28 = vadd.f32 %v1541_v27, %v1540_v26  ;;  %1416 = sbr.rel (!%p1414_p4) target bundleno = 1854 (0x73e), region = 247 }
 0x834   : >> { %v1543_v29 = vrot.slane %v1542_v28, 1 }
 0x836   : >> { %v1544_v30 = vadd.f32 %v1543_v29, %v1542_v28 }
 0x838   : >> { %1547 = vst.msk [vmem:[%s1545_s20] sm:$0x1] %vm385_vm1, %v1544_v30 }
 0x839   : > { %2134 = shalt.err (!%p2131_p13)
}
 0x83a   : > { %s2135_s9 = scalar_lea.hbm %s2623_s28, 512  ;;  %s2139_s17 = scalar_lea.hbm %s2710_s2, 1024 }
 0x83b   : > { %p2136_p0 = scmp.ne.s32.totalorder %s2623_s28, %s2135_s9  ;;  %p2140_p3 = scmp.lt.u32.totalorder %s2623_s28, %s2710_s2 }
 0x83c   : > { %p2141_p4 = scmp.lt.u32.totalorder %s2139_s17, %s2135_s9  ;;  %p2143_p8 = scmp.lt.u32.totalorder %s2135_s9, %s2623_s28 }
 0x83d   : > { %p2137_p1 = pnand %p2136_p0, %p2343_p5 }
 0x83e   : > { %p2142_p7 = por %p2141_p4, %p2140_p3 }
 0x83f   : > { %p2138_p2 = pneg %p2137_p1 }
 0x840   : > { %p2144_p9 = por %p2143_p8, %p2142_p7 }
 0x842   : > { %p2145_p10 = pnand %p2144_p9, %p2138_p2 }
 0x844   : > { %2148 = shalt.err (!%p2145_p10)
}
 0x845   : > { %s2282_s25 = smov 128   ;;  %s2283_s26 = smov 8  }
 0x846   : > { %2011 = dma.vmem_to_hbm [thread:$0]  (%p2343_p5), %s2626_s29, 512, %s2623_s28, %s1549_s30, %s2282_s25, %s2282_s25, %s2283_s26  }
 0x847   : > { %s1841_s27 = sshll.u32 %s2326_s16, 8  ;;  %s1583_s4 = sshll.u32 %s2384_s10, 4  ;;  %s2662_s4 = int_to_ptr.vmem [resolvable:$true] %s1583_s4 }
 0x848   : > { %s2660_s6 = scalar_lea.hbm %s2711_s3, %s1841_s27  ;;  %s1554_s9 = scalar_lea.sflag [#allocation7], %s2354_s24 }
 0x849   : > { %s2149_s7 = scalar_lea.vmem %s2662_s4, 256  ;;  %s2284_s11 = smov [#allocation6]  }
 0x84a   : > { %p2150_p11 = scmp.ne.s32.totalorder %s2662_s4, %s2149_s7  ;;  %s2153_s28 = sshll.u32 %s2284_s11, 4  ;;  %s2154_s28 = int_to_ptr.vmem [resolvable:$false] %s2153_s28 }
 0x84b   : > { %s2155_s16 = scalar_lea.vmem %s2154_s28, 512  ;;  %p2156_p0 = scmp.lt.s32.totalorder %s2662_s4, %s2154_s28 }
 0x84c   : > { %p2151_p12 = pnand %p2150_p11, %p2343_p5  ;;  %p2157_p1 = scmp.lt.s32.totalorder %s2155_s16, %s2149_s7 }
 0x84e   : > { %p2152_p13 = pneg %p2151_p12  ;;  %p2158_p2 = por %p2157_p1, %p2156_p0 }
 0x850   : > { %p2159_p3 = pnand %p2158_p2, %p2152_p13 }
 0x852   : > { %2162 = shalt.err (!%p2159_p3)
}
 0x853   : > { %s2163_s10 = scalar_lea.hbm %s2660_s6, 256  ;;  %s2167_s17 = scalar_lea.hbm %s2711_s3, 512 }
 0x854   : > { %p2164_p4 = scmp.ne.s32.totalorder %s2660_s6, %s2163_s10  ;;  %p2168_p9 = scmp.lt.u32.totalorder %s2660_s6, %s2711_s3 }
 0x855   : > { %p2169_p10 = scmp.lt.u32.totalorder %s2167_s17, %s2163_s10  ;;  %p2171_p12 = scmp.lt.u32.totalorder %s2163_s10, %s2660_s6 }
 0x856   : > { %p2165_p7 = pnand %p2164_p4, %p2343_p5 }
 0x857   : > { %p2170_p11 = por %p2169_p10, %p2168_p9 }
 0x858   : > { %p2166_p8 = pneg %p2165_p7 }
 0x859   : > { %p2172_p13 = por %p2171_p12, %p2170_p11 }
 0x85b   : > { %p2173_p0 = pnand %p2172_p13, %p2166_p8 }
 0x85d   : > { %2176 = shalt.err (!%p2173_p0)
}
 0x85e   : > { %2012 = dma.vmem_to_hbm [thread:$0]  (%p2343_p5), %s2662_s4, 256, %s2660_s6, %s1554_s9, %s2282_s25, %s2282_s25, %s2283_s26  }
 0x85f PF: > { %p2022_p1 = scmp.ge.s32.totalorder %s2247_s15, 2  ;;  %s1598_s27 = sand.u32 1, %s2235_s12  }
 0x860   : > { %s1599_s8 = scalar_lea.sflag [#allocation5], %s1598_s27 }
 0x861   : > { %p2016_p2 = pnand %p2022_p1, %p2347_p6 }
 0x863   : > { %2226 = dma.done.wait (!%p2016_p2), %s1599_s8, 512  }
 0x864   : > { %2228 = vsyncadd (!%p2016_p2), %s1599_s8, 4294966784  ;;  %s1608_s22 = scalar_lea.sflag [#allocation7], %s1598_s27 }
 0x865   : > { %2230 = dma.done.wait (!%p2016_p2), %s1608_s22, 256  }
 0x866   : > { %2232 = vsyncadd (!%p2016_p2), %s1608_s22, 4294967040  ;;  %p17_p5 = scmp.ge.s32.totalorder %s2330_s18, 4   ;;  %s2714_s12 = smov %s2239_s13 }
 0x867   : > { %s2715_s13 = smov %s2243_s14  ;;  %s2716_s14 = smov %s2341_s21 }
 0x868   : > { %s2717_s15 = smov %s2330_s18  ;;  %19 = sbr.rel (!%p17_p5) target bundleno = 5 (0x5), region = 258 }
 0x86f   :  { %1613 = vsyncpa [#allocation5], 1 }
 0x870   :  { %1615 = vsyncpa [#allocation5 + $0x1], 1 }
 0x871   :  { %1616 = vsyncpa [#allocation7], 1 }
 0x872   :  { %1618 = vsyncpa [#allocation7 + $0x1], 1 }

</bundles_post_ra>
